<compile_context>
chip_gen: v7x
topology: tpu7x:2x2x1
jax: 0.10.0
libtpu: 0.0.40
codegen_flags: <defaults>
</compile_context>

<pallas_src>
import functools

import jax
import jax.numpy as jnp
from jax.experimental import pallas as pl
from jax.experimental.pallas import tpu as pltpu

_ROW_TILE = 128            # query-row tile (sublane aligned; also lane-aligned for alpha_src^T)
_LANE = 128
_NEG_INF = -1e30           # finite additive mask; relies on self-loops so every row has >=1 edge
# Explicit scoped-VMEM limit: above the 16 MiB (v5e) / 32 MiB (v6e, v7x) defaults,
# below v7x's 64 MiB physical VMEM.
_VMEM_LIMIT_BYTES = 48 * 1024 * 1024


def _round_up(v, m):
    return ((v + m - 1) // m) * m


def _compiler_params():
    return pltpu.CompilerParams(
        dimension_semantics=("parallel",),
        vmem_limit_bytes=_VMEM_LIMIT_BYTES,
    )


# ---------------------------------------------------------------------------
# Kernel 1 (per layer): projection.  One wide MXU pass per row tile.
# ---------------------------------------------------------------------------
def project_kernel(x_ref, w_ref, hx_ref, a_dst_ref, a_src_t_ref, *, hf, heads):
    """[hx | alpha_dst | alpha_src] = x_tile @ W_cat.

    hx is stored in bf16 (it feeds the bf16 aggregation matmul); alpha_src is stored
    already transposed ([heads, TM]) so the attention kernel never transposes.
    """
    hxa = jnp.dot(x_ref[...], w_ref[...], preferred_element_type=jnp.float32)
    hx_ref[...] = hxa[:, :hf].astype(jnp.bfloat16)
    a_dst_ref[...] = hxa[:, hf:hf + heads]
    a_src_t_ref[...] = hxa[:, hf + heads:].T


def _project(x, w_cat, *, hf, heads, tq):
    n_pad, in_dim = x.shape
    k = w_cat.shape[1]
    kern = functools.partial(project_kernel, hf=hf, heads=heads)
    return pl.pallas_call(
        kern,
        grid=(n_pad // tq,),
        in_specs=[pl.BlockSpec((tq, in_dim), lambda i: (i, 0)),
                  pl.BlockSpec((in_dim, k), lambda i: (0, 0))],
        out_specs=[pl.BlockSpec((tq, hf), lambda i: (i, 0)),
                   pl.BlockSpec((tq, heads), lambda i: (i, 0)),
                   pl.BlockSpec((heads, tq), lambda i: (0, i))],
        out_shape=[jax.ShapeDtypeStruct((n_pad, hf), jnp.bfloat16),
                   jax.ShapeDtypeStruct((n_pad, heads), jnp.float32),
                   jax.ShapeDtypeStruct((heads, n_pad), jnp.float32)],
        compiler_params=_compiler_params(),
    )(x, w_cat)


# ---------------------------------------------------------------------------
# Kernel 2 (per layer): row-tiled attention + aggregation (+ ReLU / log_softmax epilogue).
# ---------------------------------------------------------------------------
def attention_kernel(hx_ref, a_dst_ref, a_src_t_ref, mask_ref, bias_ref, out_ref,
                     *, heads, fdim, is_last):
    mask = mask_ref[...].astype(jnp.float32)     # (TQ, N): bf16 -> f32 once, reused across heads
    hx_bf = hx_ref[...]                          # (N, heads*fdim) bf16, resident across the grid
    a_dst = a_dst_ref[...]                       # (TQ, heads) f32
    a_src_t = a_src_t_ref[...]                   # (heads, N) f32
    bias = bias_ref[...]                         # (1, heads*fdim) f32
    neg_slope = jnp.float32(0.2)

    head_outs = []
    for h in range(heads):                       # heads is tiny (<=2): static unroll
        # e[i, j] = leaky_relu(alpha_dst[i] + alpha_src[j], 0.2) restricted to edges j -> i.
        e = a_dst[:, h:h + 1] + a_src_t[h:h + 1, :]        # (TQ, N)
        e = jnp.maximum(e, neg_slope * e) + mask           # fused leaky-ReLU (vmax) + edge mask
        m = jnp.max(e, axis=-1, keepdims=True)
        p = jnp.exp(e - m)                                 # exactly 0 on non-edges (underflow)
        denom = jnp.sum(p, axis=-1, keepdims=True)
        # approx reciprocal -> rows sum to 1 only to ~1e-3; final log_softmax renormalizes in f32.
        attn = (p * pl.reciprocal(denom, approx=True)).astype(jnp.bfloat16)
        head_outs.append(
            jnp.dot(attn, hx_bf[:, h * fdim:(h + 1) * fdim],
                    preferred_element_type=jnp.float32))

    out = head_outs[0] if heads == 1 else jnp.concatenate(head_outs, axis=-1)
    out = out + bias

    if is_last:
        # log_softmax over (lane-padded) classes; padded columns carry bias = -1e30 -> exp == 0.
        mm = jnp.max(out, axis=-1, keepdims=True)
        s = out - mm
        lse = jnp.log(jnp.sum(jnp.exp(s), axis=-1, keepdims=True))
        out_ref[...] = s - lse
    else:
        # BatchNorm (eval-mode) already folded into W/bias on the host; only ReLU remains.
        # TODO(synk): F.dropout with training=True not implemented; eval-mode => identity.
        out_ref[...] = jnp.maximum(out, jnp.float32(0.0))


def _attention(hx, a_dst, a_src_t, mask, bias, *, heads, fdim, is_last, tq):
    n_pad = hx.shape[0]
    hf = heads * fdim
    kern = functools.partial(attention_kernel, heads=heads, fdim=fdim, is_last=is_last)
    return pl.pallas_call(
        kern,
        grid=(n_pad // tq,),
        in_specs=[pl.BlockSpec((n_pad, hf), lambda i: (0, 0)),      # hx (resident, bf16)
                  pl.BlockSpec((tq, heads), lambda i: (i, 0)),      # alpha_dst tile
                  pl.BlockSpec((heads, n_pad), lambda i: (0, 0)),   # alpha_src^T (resident)
                  pl.BlockSpec((tq, n_pad), lambda i: (i, 0)),      # additive mask tile (bf16)
                  pl.BlockSpec((1, hf), lambda i: (0, 0))],         # bias
        out_specs=pl.BlockSpec((tq, hf), lambda i: (i, 0)),
        out_shape=jax.ShapeDtypeStruct((n_pad, hf), jnp.float32),
        compiler_params=_compiler_params(),
    )(hx, a_dst, a_src_t, mask, bias)


# ---------------------------------------------------------------------------
# Host-side parameter prep (BN fold + attention-vector fold + last-layer lane padding)
# ---------------------------------------------------------------------------
def _block_att(a):
    """[heads, F] -> block matrix [heads*F, heads] so W @ blk gives per-head logit weights."""
    heads, f = a.shape
    eye = jnp.eye(heads, dtype=a.dtype)
    return (a[:, :, None] * eye[:, None, :]).reshape(heads * f, heads)


def build_fused_layers(params, eps=1e-5):
    """Returns (flat [w_cat, bias_row] per layer, static layer_meta, real output_dim).

    w_cat = [W_hx | W @ blk(a_dst) | W @ blk(a_src)].  For hidden layers the eval-mode
    BatchNorm scale is folded into W_hx and gamma/beta into bias.  The last layer's W_hx /
    bias are lane-padded to a 128 multiple (pad bias = -1e30 so log_softmax ignores them).
    NOTE: the BN fold assumes running_mean=0, running_var=1 (freshly initialized module);
    a trained model's running statistics would have to be folded here instead.
    """
    flat, meta = [], []
    n = len(params["convs"])
    for i, p in enumerate(params["convs"]):
        heads, fdim = p["heads"], p["out_dim"]
        w = p["w"]
        # attention logits are computed from the *unscaled* hx = x @ W.
        w_att = jnp.concatenate(
            [jnp.dot(w, _block_att(p["a_dst"]), precision="highest"),
             jnp.dot(w, _block_att(p["a_src"]), precision="highest")], axis=1)
        is_last = i == n - 1
        if is_last:
            out_pad = _round_up(fdim, _LANE)
            w_hx = jnp.zeros((w.shape[0], out_pad), w.dtype).at[:, :fdim].set(w)
            bias = jnp.full((out_pad,), _NEG_INF, jnp.float32).at[:fdim].set(p["bias"])
            fdim_k = out_pad
        else:
            gamma, beta = params["bns"][i]
            s = gamma * (1.0 + eps) ** -0.5
            w_hx = w * s[None, :]
            bias = p["bias"] * s + beta
            fdim_k = fdim
        flat += [jnp.concatenate([w_hx, w_att], axis=1), bias.reshape(1, -1)]
        meta.append((heads, fdim_k, is_last))
    return flat, tuple(meta), params["convs"][-1]["out_dim"]


def _forward(x, adj, flat, *, meta, out_dim, row_tile):
    n, in_dim = x.shape
    n_pad = _round_up(n, row_tile)
    tq = row_tile

    # Pad node rows; padded rows have zero features and no edges (fully masked columns),
    # so they never influence real rows and are sliced off at the end.
    xp = jnp.zeros((n_pad, in_dim), jnp.float32).at[:n, :].set(x.astype(jnp.float32))
    mask = jnp.full((n_pad, n_pad), jnp.float32(_NEG_INF))
    mask = mask.at[:n, :n].set(jnp.where(adj > 0, jnp.float32(0.0), jnp.float32(_NEG_INF)))
    mask = mask.astype(jnp.bfloat16)             # adjacency itself never enters a kernel

    h = xp
    for li, (heads, fdim, is_last) in enumerate(meta):
        w_cat, bias = flat[2 * li], flat[2 * li + 1]
        hf = heads * fdim
        hx, a_dst, a_src_t = _project(h, w_cat, hf=hf, heads=heads, tq=tq)
        h = _attention(hx, a_dst, a_src_t, mask, bias,
                       heads=heads, fdim=fdim, is_last=is_last, tq=tq)
    return h[:n, :out_dim]


def model_forward(x, adj, params):
    flat, meta, out_dim = build_fused_layers(params)
    fwd = jax.jit(functools.partial(_forward, meta=meta, out_dim=out_dim, row_tile=_ROW_TILE))
    return fwd(x, adj, flat)


# ---------------------------------------------------------------------------
# Parameter construction + pure-JAX reference (for correctness check)
# ---------------------------------------------------------------------------
def init_params(key, input_dim, hidden_dim, output_dim, heads, num_layers):
    convs, bns = [], []
    in_dim = input_dim
    for layer in range(num_layers):
        is_last = layer == num_layers - 1
        h = 1 if is_last else heads
        f = output_dim if is_last else hidden_dim
        key, k_w, k_s, k_d = jax.random.split(key, 4)
        glorot_w = (2.0 / (in_dim + h * f)) ** 0.5
        glorot_a = (2.0 / (1 + f)) ** 0.5
        convs.append(dict(
            w=jax.random.normal(k_w, (in_dim, h * f), jnp.float32) * glorot_w,
            a_src=jax.random.normal(k_s, (h, f), jnp.float32) * glorot_a,
            a_dst=jax.random.normal(k_d, (h, f), jnp.float32) * glorot_a,
            bias=jnp.zeros((h * f,), jnp.float32),
            heads=h, out_dim=f,
        ))
        if not is_last:
            key, k_g, k_b = jax.random.split(key, 3)
            c = h * f
            bns.append((jnp.ones((c,), jnp.float32)
                        + 0.1 * jax.random.normal(k_g, (c,), jnp.float32),
                        0.1 * jax.random.normal(k_b, (c,), jnp.float32)))
        in_dim = h * f
    return dict(convs=convs, bns=bns)


def reference_forward(x, adj, params, eps=1e-5):
    """Pure-JAX reference of the PyTorch eval-mode forward."""
    n = len(params["convs"])
    h = x
    for i, p in enumerate(params["convs"]):
        heads, fdim = p["heads"], p["out_dim"]
        hx = jnp.dot(h, p["w"], precision="highest").reshape(-1, heads, fdim)
        a_src = jnp.einsum("nhf,hf->nh", hx, p["a_src"], precision="highest")
        a_dst = jnp.einsum("nhf,hf->nh", hx, p["a_dst"], precision="highest")
        e = a_dst[:, None, :] + a_src[None, :, :]            # [N_i, N_j, H]
        e = jnp.where(e > 0, e, 0.2 * e)
        e = jnp.where(adj[:, :, None] > 0, e, -jnp.inf)
        attn = jax.nn.softmax(e, axis=1)
        out = jnp.einsum("ijh,jhf->ihf", attn, hx,
                         precision="highest").reshape(-1, heads * fdim) + p["bias"]
        if i < n - 1:
            gamma, beta = params["bns"][i]
            out = out / jnp.sqrt(1.0 + eps) * gamma + beta
            out = jnp.maximum(out, 0.0)
        h = out
    return jax.nn.log_softmax(h, axis=-1)


if __name__ == "__main__":
    # small deterministic problem (N chosen so the row grid and the padding path are exercised)
    N, INPUT_DIM, HIDDEN_DIM, OUTPUT_DIM, HEADS, NUM_LAYERS = 200, 16, 8, 8, 2, 3

    key = jax.random.PRNGKey(0)
    key, k_x, k_adj, k_p = jax.random.split(key, 4)

    x = jax.random.normal(k_x, (N, INPUT_DIM), jnp.float32)

    # random symmetric adjacency with self-loops (dense, adj[i, j]=1 => edge j -> i).
    # Self-loops guarantee every softmax row has at least one edge (required invariant for the
    # finite -1e30 additive mask).
    a = (jax.random.uniform(k_adj, (N, N)) < 0.1).astype(jnp.float32)
    adj = jnp.clip(a + a.T + jnp.eye(N, dtype=jnp.float32), 0.0, 1.0)

    params = init_params(k_p, INPUT_DIM, HIDDEN_DIM, OUTPUT_DIM, HEADS, NUM_LAYERS)

    out = jax.block_until_ready(model_forward(x, adj, params))

    assert out.shape == (N, OUTPUT_DIM)
    # log_softmax rows should (approximately) exp-sum to 1
    assert bool(jnp.all(jnp.abs(jnp.sum(jnp.exp(out), axis=-1) - 1.0) < 1e-3))

    # compare against pure-JAX reference of the original (unfused) math
    ref = reference_forward(x, adj, params)
    max_err = float(jnp.max(jnp.abs(out - ref)))
    assert max_err < 5e-2, max_err

    print("KERNEL_OK")
</pallas_src>

<mosaic_0001>
module attributes {stable_mosaic.version = 11 : i64} {
  func.func @project_kernel(%arg0: i32, %arg1: memref<128x16xf32, #tpu.memory_space<vmem>>, %arg2: memref<16x20xf32, #tpu.memory_space<vmem>>, %arg3: memref<128x16xbf16, #tpu.memory_space<vmem>>, %arg4: memref<128x2xf32, #tpu.memory_space<vmem>>, %arg5: memref<2x128xf32, #tpu.memory_space<vmem>>) attributes {dimension_semantics = [#tpu.dimension_semantics<parallel>], iteration_bounds = array<i64: 2>, scalar_prefetch = 0 : i64, scratch_operands = 0 : i64, tpu.core_type = #tpu.core_type<tc>, window_params = [{transform_indices = @transform_0, window_bounds = array<i64: 128, 16>}, {pipeline_mode = #tpu.pipeline_mode<synchronous>, transform_indices = @transform_1, window_bounds = array<i64: 16, 20>}, {transform_indices = @transform_2, window_bounds = array<i64: 128, 16>}, {transform_indices = @transform_3, window_bounds = array<i64: 128, 2>}, {transform_indices = @transform_4, window_bounds = array<i64: 2, 128>}]} {
    %c0 = arith.constant 0 : index
    %c0_0 = arith.constant 0 : index
    %0 = vector.load %arg1[%c0, %c0_0] : memref<128x16xf32, #tpu.memory_space<vmem>>, vector<128x16xf32>
    %c0_1 = arith.constant 0 : index
    %c0_2 = arith.constant 0 : index
    %1 = vector.load %arg2[%c0_1, %c0_2] : memref<16x20xf32, #tpu.memory_space<vmem>>, vector<16x20xf32>
    %cst = arith.constant dense<0.000000e+00> : vector<128x20xf32>
    %2 = tpu.matmul %0, %1, %cst {dimension_numbers = #tpu.dot_dimension_numbers<[1], [0], [0], [1], [0, 0, 1, 1], [], []>} : vector<128x16xf32>, vector<16x20xf32>, vector<128x20xf32> -> vector<128x20xf32>
    %3 = vector.extract_strided_slice %2 {offsets = [0, 0], sizes = [128, 16], strides = [1, 1]} : vector<128x20xf32> to vector<128x16xf32>
    %4 = arith.truncf %3 : vector<128x16xf32> to vector<128x16xbf16>
    %c0_3 = arith.constant 0 : index
    %c0_4 = arith.constant 0 : index
    %5 = vector.load %arg3[%c0_3, %c0_4] : memref<128x16xbf16, #tpu.memory_space<vmem>>, vector<128x16xbf16>
    tpu.vector_store %arg3[%c0_3, %c0_4], %4 {strides = array<i32>} : memref<128x16xbf16, #tpu.memory_space<vmem>>, vector<128x16xbf16>,
    %6 = vector.extract_strided_slice %2 {offsets = [0, 16], sizes = [128, 2], strides = [1, 1]} : vector<128x20xf32> to vector<128x2xf32>
    %c0_5 = arith.constant 0 : index
    %c0_6 = arith.constant 0 : index
    %7 = vector.load %arg4[%c0_5, %c0_6] : memref<128x2xf32, #tpu.memory_space<vmem>>, vector<128x2xf32>
    tpu.vector_store %arg4[%c0_5, %c0_6], %6 {strides = array<i32>} : memref<128x2xf32, #tpu.memory_space<vmem>>, vector<128x2xf32>,
    %8 = vector.extract_strided_slice %2 {offsets = [0, 18], sizes = [128, 2], strides = [1, 1]} : vector<128x20xf32> to vector<128x2xf32>
    %9 = tpu.transpose %8, [1, 0] : vector<128x2xf32> -> vector<2x128xf32>
    %c0_7 = arith.constant 0 : index
    %c0_8 = arith.constant 0 : index
    %10 = vector.load %arg5[%c0_7, %c0_8] : memref<2x128xf32, #tpu.memory_space<vmem>>, vector<2x128xf32>
    tpu.vector_store %arg5[%c0_7, %c0_8], %9 {strides = array<i32>} : memref<2x128xf32, #tpu.memory_space<vmem>>, vector<2x128xf32>,
    return
  }
  func.func @transform_0(%arg0: i32) -> (i32, i32) {
    %c0_i32 = arith.constant 0 : i32
    %c0_i32_0 = arith.constant 0 : i32
    return %arg0, %c0_i32 : i32, i32
  }
  func.func @transform_1(%arg0: i32) -> (i32, i32) {
    %c0_i32 = arith.constant 0 : i32
    %c0_i32_0 = arith.constant 0 : i32
    %c0_i32_1 = arith.constant 0 : i32
    return %c0_i32, %c0_i32_0 : i32, i32
  }
  func.func @transform_2(%arg0: i32) -> (i32, i32) {
    %c0_i32 = arith.constant 0 : i32
    %c0_i32_0 = arith.constant 0 : i32
    return %arg0, %c0_i32 : i32, i32
  }
  func.func @transform_3(%arg0: i32) -> (i32, i32) {
    %c0_i32 = arith.constant 0 : i32
    %c0_i32_0 = arith.constant 0 : i32
    return %arg0, %c0_i32 : i32, i32
  }
  func.func @transform_4(%arg0: i32) -> (i32, i32) {
    %c0_i32 = arith.constant 0 : i32
    %c0_i32_0 = arith.constant 0 : i32
    return %c0_i32, %arg0 : i32, i32
  }
}

module attributes {stable_mosaic.version = 11 : i64} {
  func.func @project_kernel(%arg0: i32, %arg1: memref<128x16xf32, #tpu.memory_space<vmem>>, %arg2: memref<16x130xf32, #tpu.memory_space<vmem>>, %arg3: memref<128x128xbf16, #tpu.memory_space<vmem>>, %arg4: memref<128x1xf32, #tpu.memory_space<vmem>>, %arg5: memref<1x128xf32, #tpu.memory_space<vmem>>) attributes {dimension_semantics = [#tpu.dimension_semantics<parallel>], iteration_bounds = array<i64: 2>, scalar_prefetch = 0 : i64, scratch_operands = 0 : i64, tpu.core_type = #tpu.core_type<tc>, window_params = [{transform_indices = @transform_0, window_bounds = array<i64: 128, 16>}, {pipeline_mode = #tpu.pipeline_mode<synchronous>, transform_indices = @transform_1, window_bounds = array<i64: 16, 130>}, {transform_indices = @transform_2, window_bounds = array<i64: 128, 128>}, {transform_indices = @transform_3, window_bounds = array<i64: 128, 1>}, {transform_indices = @transform_4, window_bounds = array<i64: 1, 128>}]} {
    %c0 = arith.constant 0 : index
    %c0_0 = arith.constant 0 : index
    %0 = vector.load %arg1[%c0, %c0_0] : memref<128x16xf32, #tpu.memory_space<vmem>>, vector<128x16xf32>
    %c0_1 = arith.constant 0 : index
    %c0_2 = arith.constant 0 : index
    %1 = vector.load %arg2[%c0_1, %c0_2] : memref<16x130xf32, #tpu.memory_space<vmem>>, vector<16x130xf32>
    %cst = arith.constant dense<0.000000e+00> : vector<128x130xf32>
    %2 = tpu.matmul %0, %1, %cst {dimension_numbers = #tpu.dot_dimension_numbers<[1], [0], [0], [1], [0, 0, 1, 1], [], []>} : vector<128x16xf32>, vector<16x130xf32>, vector<128x130xf32> -> vector<128x130xf32>
    %3 = vector.extract_strided_slice %2 {offsets = [0, 0], sizes = [128, 128], strides = [1, 1]} : vector<128x130xf32> to vector<128x128xf32>
    %4 = arith.truncf %3 : vector<128x128xf32> to vector<128x128xbf16>
    %c0_3 = arith.constant 0 : index
    %c0_4 = arith.constant 0 : index
    %5 = vector.load %arg3[%c0_3, %c0_4] : memref<128x128xbf16, #tpu.memory_space<vmem>>, vector<128x128xbf16>
    tpu.vector_store %arg3[%c0_3, %c0_4], %4 {strides = array<i32>} : memref<128x128xbf16, #tpu.memory_space<vmem>>, vector<128x128xbf16>,
    %6 = vector.extract_strided_slice %2 {offsets = [0, 128], sizes = [128, 1], strides = [1, 1]} : vector<128x130xf32> to vector<128x1xf32>
    %c0_5 = arith.constant 0 : index
    %c0_6 = arith.constant 0 : index
    %7 = vector.load %arg4[%c0_5, %c0_6] : memref<128x1xf32, #tpu.memory_space<vmem>>, vector<128x1xf32>
    tpu.vector_store %arg4[%c0_5, %c0_6], %6 {strides = array<i32>} : memref<128x1xf32, #tpu.memory_space<vmem>>, vector<128x1xf32>,
    %8 = vector.extract_strided_slice %2 {offsets = [0, 129], sizes = [128, 1], strides = [1, 1]} : vector<128x130xf32> to vector<128x1xf32>
    %9 = tpu.transpose %8, [1, 0] : vector<128x1xf32> -> vector<1x128xf32>
    %c0_7 = arith.constant 0 : index
    %c0_8 = arith.constant 0 : index
    %10 = vector.load %arg5[%c0_7, %c0_8] : memref<1x128xf32, #tpu.memory_space<vmem>>, vector<1x128xf32>
    tpu.vector_store %arg5[%c0_7, %c0_8], %9 {strides = array<i32>} : memref<1x128xf32, #tpu.memory_space<vmem>>, vector<1x128xf32>,
    return
  }
  func.func @transform_0(%arg0: i32) -> (i32, i32) {
    %c0_i32 = arith.constant 0 : i32
    %c0_i32_0 = arith.constant 0 : i32
    return %arg0, %c0_i32 : i32, i32
  }
  func.func @transform_1(%arg0: i32) -> (i32, i32) {
    %c0_i32 = arith.constant 0 : i32
    %c0_i32_0 = arith.constant 0 : i32
    %c0_i32_1 = arith.constant 0 : i32
    return %c0_i32, %c0_i32_0 : i32, i32
  }
  func.func @transform_2(%arg0: i32) -> (i32, i32) {
    %c0_i32 = arith.constant 0 : i32
    %c0_i32_0 = arith.constant 0 : i32
    return %arg0, %c0_i32 : i32, i32
  }
  func.func @transform_3(%arg0: i32) -> (i32, i32) {
    %c0_i32 = arith.constant 0 : i32
    %c0_i32_0 = arith.constant 0 : i32
    return %arg0, %c0_i32 : i32, i32
  }
  func.func @transform_4(%arg0: i32) -> (i32, i32) {
    %c0_i32 = arith.constant 0 : i32
    %c0_i32_0 = arith.constant 0 : i32
    return %c0_i32, %arg0 : i32, i32
  }
}

module attributes {stable_mosaic.version = 11 : i64} {
  func.func @attention_kernel(%arg0: i32, %arg1: memref<256x16xbf16, #tpu.memory_space<vmem>>, %arg2: memref<128x2xf32, #tpu.memory_space<vmem>>, %arg3: memref<2x256xf32, #tpu.memory_space<vmem>>, %arg4: memref<128x256xbf16, #tpu.memory_space<vmem>>, %arg5: memref<1x16xf32, #tpu.memory_space<vmem>>, %arg6: memref<128x16xf32, #tpu.memory_space<vmem>>) attributes {dimension_semantics = [#tpu.dimension_semantics<parallel>], iteration_bounds = array<i64: 2>, scalar_prefetch = 0 : i64, scratch_operands = 0 : i64, tpu.core_type = #tpu.core_type<tc>, window_params = [{pipeline_mode = #tpu.pipeline_mode<synchronous>, transform_indices = @transform_0, window_bounds = array<i64: 256, 16>}, {transform_indices = @transform_1, window_bounds = array<i64: 128, 2>}, {pipeline_mode = #tpu.pipeline_mode<synchronous>, transform_indices = @transform_2, window_bounds = array<i64: 2, 256>}, {transform_indices = @transform_3, window_bounds = array<i64: 128, 256>}, {pipeline_mode = #tpu.pipeline_mode<synchronous>, transform_indices = @transform_4, window_bounds = array<i64: 1, 16>}, {transform_indices = @transform_5, window_bounds = array<i64: 128, 16>}]} {
    %c0 = arith.constant 0 : index
    %c0_0 = arith.constant 0 : index
    %0 = vector.load %arg4[%c0, %c0_0] : memref<128x256xbf16, #tpu.memory_space<vmem>>, vector<128x256xbf16>
    %1 = arith.extf %0 : vector<128x256xbf16> to vector<128x256xf32>
    %c0_1 = arith.constant 0 : index
    %c0_2 = arith.constant 0 : index
    %2 = vector.load %arg1[%c0_1, %c0_2] : memref<256x16xbf16, #tpu.memory_space<vmem>>, vector<256x16xbf16>
    %c0_3 = arith.constant 0 : index
    %c0_4 = arith.constant 0 : index
    %3 = vector.load %arg2[%c0_3, %c0_4] : memref<128x2xf32, #tpu.memory_space<vmem>>, vector<128x2xf32>
    %c0_5 = arith.constant 0 : index
    %c0_6 = arith.constant 0 : index
    %4 = vector.load %arg3[%c0_5, %c0_6] : memref<2x256xf32, #tpu.memory_space<vmem>>, vector<2x256xf32>
    %c0_7 = arith.constant 0 : index
    %c0_8 = arith.constant 0 : index
    %5 = vector.load %arg5[%c0_7, %c0_8] : memref<1x16xf32, #tpu.memory_space<vmem>>, vector<1x16xf32>
    %6 = vector.extract_strided_slice %3 {offsets = [0, 0], sizes = [128, 1], strides = [1, 1]} : vector<128x2xf32> to vector<128x1xf32>
    %7 = vector.extract_strided_slice %4 {offsets = [0, 0], sizes = [1, 256], strides = [1, 1]} : vector<2x256xf32> to vector<1x256xf32>
    %8 = vector.broadcast %6 : vector<128x1xf32> to vector<128x256xf32>
    %9 = vector.broadcast %7 : vector<1x256xf32> to vector<128x256xf32>
    %10 = arith.addf %8, %9 : vector<128x256xf32>
    %cst = arith.constant 2.000000e-01 : f32
    %11 = vector.broadcast %cst : f32 to vector<128x256xf32>
    %12 = arith.mulf %11, %10 : vector<128x256xf32>
    %13 = arith.maximumf %10, %12 : vector<128x256xf32>
    %14 = arith.addf %13, %1 : vector<128x256xf32>
    %cst_9 = arith.constant dense<0xFF800000> : vector<128xf32>
    %15 = vector.multi_reduction <maximumf>, %14, %cst_9 [1] : vector<128x256xf32> to vector<128xf32>
    %16 = vector.shape_cast %15 : vector<128xf32> to vector<128x1xf32>
    %17 = vector.broadcast %16 : vector<128x1xf32> to vector<128x256xf32>
    %18 = arith.subf %14, %17 : vector<128x256xf32>
    %19 = math.exp %18 : vector<128x256xf32>
    %cst_10 = arith.constant dense<0.000000e+00> : vector<128xf32>
    %20 = vector.multi_reduction <add>, %19, %cst_10 [1] : vector<128x256xf32> to vector<128xf32>
    %21 = vector.shape_cast %20 : vector<128xf32> to vector<128x1xf32>
    %22 = tpu.reciprocal %21 {approx = true} : vector<128x1xf32> -> vector<128x1xf32>
    %23 = vector.broadcast %22 : vector<128x1xf32> to vector<128x256xf32>
    %24 = arith.mulf %19, %23 : vector<128x256xf32>
    %25 = arith.truncf %24 : vector<128x256xf32> to vector<128x256xbf16>
    %26 = vector.extract_strided_slice %2 {offsets = [0, 0], sizes = [256, 8], strides = [1, 1]} : vector<256x16xbf16> to vector<256x8xbf16>
    %cst_11 = arith.constant dense<0.000000e+00> : vector<128x8xf32>
    %27 = tpu.matmul %25, %26, %cst_11 {dimension_numbers = #tpu.dot_dimension_numbers<[1], [0], [0], [1], [0, 0, 1, 1], [], []>} : vector<128x256xbf16>, vector<256x8xbf16>, vector<128x8xf32> -> vector<128x8xf32>
    %28 = vector.extract_strided_slice %3 {offsets = [0, 1], sizes = [128, 1], strides = [1, 1]} : vector<128x2xf32> to vector<128x1xf32>
    %29 = vector.extract_strided_slice %4 {offsets = [1, 0], sizes = [1, 256], strides = [1, 1]} : vector<2x256xf32> to vector<1x256xf32>
    %30 = vector.broadcast %28 : vector<128x1xf32> to vector<128x256xf32>
    %31 = vector.broadcast %29 : vector<1x256xf32> to vector<128x256xf32>
    %32 = arith.addf %30, %31 : vector<128x256xf32>
    %cst_12 = arith.constant 2.000000e-01 : f32
    %33 = vector.broadcast %cst_12 : f32 to vector<128x256xf32>
    %34 = arith.mulf %33, %32 : vector<128x256xf32>
    %35 = arith.maximumf %32, %34 : vector<128x256xf32>
    %36 = arith.addf %35, %1 : vector<128x256xf32>
    %cst_13 = arith.constant dense<0xFF800000> : vector<128xf32>
    %37 = vector.multi_reduction <maximumf>, %36, %cst_13 [1] : vector<128x256xf32> to vector<128xf32>
    %38 = vector.shape_cast %37 : vector<128xf32> to vector<128x1xf32>
    %39 = vector.broadcast %38 : vector<128x1xf32> to vector<128x256xf32>
    %40 = arith.subf %36, %39 : vector<128x256xf32>
    %41 = math.exp %40 : vector<128x256xf32>
    %cst_14 = arith.constant dense<0.000000e+00> : vector<128xf32>
    %42 = vector.multi_reduction <add>, %41, %cst_14 [1] : vector<128x256xf32> to vector<128xf32>
    %43 = vector.shape_cast %42 : vector<128xf32> to vector<128x1xf32>
    %44 = tpu.reciprocal %43 {approx = true} : vector<128x1xf32> -> vector<128x1xf32>
    %45 = vector.broadcast %44 : vector<128x1xf32> to vector<128x256xf32>
    %46 = arith.mulf %41, %45 : vector<128x256xf32>
    %47 = arith.truncf %46 : vector<128x256xf32> to vector<128x256xbf16>
    %48 = vector.extract_strided_slice %2 {offsets = [0, 8], sizes = [256, 8], strides = [1, 1]} : vector<256x16xbf16> to vector<256x8xbf16>
    %cst_15 = arith.constant dense<0.000000e+00> : vector<128x8xf32>
    %49 = tpu.matmul %47, %48, %cst_15 {dimension_numbers = #tpu.dot_dimension_numbers<[1], [0], [0], [1], [0, 0, 1, 1], [], []>} : vector<128x256xbf16>, vector<256x8xbf16>, vector<128x8xf32> -> vector<128x8xf32>
    %50 = tpu.concatenate %27, %49 in 1 : vector<128x8xf32>, vector<128x8xf32> -> vector<128x16xf32>
    %51 = vector.broadcast %5 : vector<1x16xf32> to vector<128x16xf32>
    %52 = arith.addf %50, %51 : vector<128x16xf32>
    %cst_16 = arith.constant 0.000000e+00 : f32
    %53 = vector.broadcast %cst_16 : f32 to vector<128x16xf32>
    %54 = arith.maximumf %52, %53 : vector<128x16xf32>
    %c0_17 = arith.constant 0 : index
    %c0_18 = arith.constant 0 : index
    %55 = vector.load %arg6[%c0_17, %c0_18] : memref<128x16xf32, #tpu.memory_space<vmem>>, vector<128x16xf32>
    tpu.vector_store %arg6[%c0_17, %c0_18], %54 {strides = array<i32>} : memref<128x16xf32, #tpu.memory_space<vmem>>, vector<128x16xf32>,
    return
  }
  func.func @transform_0(%arg0: i32) -> (i32, i32) {
    %c0_i32 = arith.constant 0 : i32
    %c0_i32_0 = arith.constant 0 : i32
    %c0_i32_1 = arith.constant 0 : i32
    return %c0_i32, %c0_i32_0 : i32, i32
  }
  func.func @transform_1(%arg0: i32) -> (i32, i32) {
    %c0_i32 = arith.constant 0 : i32
    %c0_i32_0 = arith.constant 0 : i32
    return %arg0, %c0_i32 : i32, i32
  }
  func.func @transform_2(%arg0: i32) -> (i32, i32) {
    %c0_i32 = arith.constant 0 : i32
    %c0_i32_0 = arith.constant 0 : i32
    %c0_i32_1 = arith.constant 0 : i32
    return %c0_i32, %c0_i32_0 : i32, i32
  }
  func.func @transform_3(%arg0: i32) -> (i32, i32) {
    %c0_i32 = arith.constant 0 : i32
    %c0_i32_0 = arith.constant 0 : i32
    return %arg0, %c0_i32 : i32, i32
  }
  func.func @transform_4(%arg0: i32) -> (i32, i32) {
    %c0_i32 = arith.constant 0 : i32
    %c0_i32_0 = arith.constant 0 : i32
    %c0_i32_1 = arith.constant 0 : i32
    return %c0_i32, %c0_i32_0 : i32, i32
  }
  func.func @transform_5(%arg0: i32) -> (i32, i32) {
    %c0_i32 = arith.constant 0 : i32
    %c0_i32_0 = arith.constant 0 : i32
    return %arg0, %c0_i32 : i32, i32
  }
}

module attributes {stable_mosaic.version = 11 : i64} {
  func.func @attention_kernel(%arg0: i32, %arg1: memref<256x128xbf16, #tpu.memory_space<vmem>>, %arg2: memref<128x1xf32, #tpu.memory_space<vmem>>, %arg3: memref<1x256xf32, #tpu.memory_space<vmem>>, %arg4: memref<128x256xbf16, #tpu.memory_space<vmem>>, %arg5: memref<1x128xf32, #tpu.memory_space<vmem>>, %arg6: memref<128x128xf32, #tpu.memory_space<vmem>>) attributes {dimension_semantics = [#tpu.dimension_semantics<parallel>], iteration_bounds = array<i64: 2>, scalar_prefetch = 0 : i64, scratch_operands = 0 : i64, tpu.core_type = #tpu.core_type<tc>, window_params = [{pipeline_mode = #tpu.pipeline_mode<synchronous>, transform_indices = @transform_0, window_bounds = array<i64: 256, 128>}, {transform_indices = @transform_1, window_bounds = array<i64: 128, 1>}, {pipeline_mode = #tpu.pipeline_mode<synchronous>, transform_indices = @transform_2, window_bounds = array<i64: 1, 256>}, {transform_indices = @transform_3, window_bounds = array<i64: 128, 256>}, {pipeline_mode = #tpu.pipeline_mode<synchronous>, transform_indices = @transform_4, window_bounds = array<i64: 1, 128>}, {transform_indices = @transform_5, window_bounds = array<i64: 128, 128>}]} {
    %c0 = arith.constant 0 : index
    %c0_0 = arith.constant 0 : index
    %0 = vector.load %arg4[%c0, %c0_0] : memref<128x256xbf16, #tpu.memory_space<vmem>>, vector<128x256xbf16>
    %1 = arith.extf %0 : vector<128x256xbf16> to vector<128x256xf32>
    %c0_1 = arith.constant 0 : index
    %c0_2 = arith.constant 0 : index
    %2 = vector.load %arg1[%c0_1, %c0_2] : memref<256x128xbf16, #tpu.memory_space<vmem>>, vector<256x128xbf16>
    %c0_3 = arith.constant 0 : index
    %c0_4 = arith.constant 0 : index
    %3 = vector.load %arg2[%c0_3, %c0_4] : memref<128x1xf32, #tpu.memory_space<vmem>>, vector<128x1xf32>
    %c0_5 = arith.constant 0 : index
    %c0_6 = arith.constant 0 : index
    %4 = vector.load %arg3[%c0_5, %c0_6] : memref<1x256xf32, #tpu.memory_space<vmem>>, vector<1x256xf32>
    %c0_7 = arith.constant 0 : index
    %c0_8 = arith.constant 0 : index
    %5 = vector.load %arg5[%c0_7, %c0_8] : memref<1x128xf32, #tpu.memory_space<vmem>>, vector<1x128xf32>
    %6 = vector.broadcast %3 : vector<128x1xf32> to vector<128x256xf32>
    %7 = vector.broadcast %4 : vector<1x256xf32> to vector<128x256xf32>
    %8 = arith.addf %6, %7 : vector<128x256xf32>
    %cst = arith.constant 2.000000e-01 : f32
    %9 = vector.broadcast %cst : f32 to vector<128x256xf32>
    %10 = arith.mulf %9, %8 : vector<128x256xf32>
    %11 = arith.maximumf %8, %10 : vector<128x256xf32>
    %12 = arith.addf %11, %1 : vector<128x256xf32>
    %cst_9 = arith.constant dense<0xFF800000> : vector<128xf32>
    %13 = vector.multi_reduction <maximumf>, %12, %cst_9 [1] : vector<128x256xf32> to vector<128xf32>
    %14 = vector.shape_cast %13 : vector<128xf32> to vector<128x1xf32>
    %15 = vector.broadcast %14 : vector<128x1xf32> to vector<128x256xf32>
    %16 = arith.subf %12, %15 : vector<128x256xf32>
    %17 = math.exp %16 : vector<128x256xf32>
    %cst_10 = arith.constant dense<0.000000e+00> : vector<128xf32>
    %18 = vector.multi_reduction <add>, %17, %cst_10 [1] : vector<128x256xf32> to vector<128xf32>
    %19 = vector.shape_cast %18 : vector<128xf32> to vector<128x1xf32>
    %20 = tpu.reciprocal %19 {approx = true} : vector<128x1xf32> -> vector<128x1xf32>
    %21 = vector.broadcast %20 : vector<128x1xf32> to vector<128x256xf32>
    %22 = arith.mulf %17, %21 : vector<128x256xf32>
    %23 = arith.truncf %22 : vector<128x256xf32> to vector<128x256xbf16>
    %cst_11 = arith.constant dense<0.000000e+00> : vector<128x128xf32>
    %24 = tpu.matmul %23, %2, %cst_11 {dimension_numbers = #tpu.dot_dimension_numbers<[1], [0], [0], [1], [0, 0, 1, 1], [], []>} : vector<128x256xbf16>, vector<256x128xbf16>, vector<128x128xf32> -> vector<128x128xf32>
    %25 = vector.broadcast %5 : vector<1x128xf32> to vector<128x128xf32>
    %26 = arith.addf %24, %25 : vector<128x128xf32>
    %cst_12 = arith.constant dense<0xFF800000> : vector<128xf32>
    %27 = vector.multi_reduction <maximumf>, %26, %cst_12 [1] : vector<128x128xf32> to vector<128xf32>
    %28 = vector.shape_cast %27 : vector<128xf32> to vector<128x1xf32>
    %29 = vector.broadcast %28 : vector<128x1xf32> to vector<128x128xf32>
    %30 = arith.subf %26, %29 : vector<128x128xf32>
    %31 = math.exp %30 : vector<128x128xf32>
    %cst_13 = arith.constant dense<0.000000e+00> : vector<128xf32>
    %32 = vector.multi_reduction <add>, %31, %cst_13 [1] : vector<128x128xf32> to vector<128xf32>
    %33 = vector.shape_cast %32 : vector<128xf32> to vector<128x1xf32>
    %34 = math.log %33 : vector<128x1xf32>
    %35 = vector.broadcast %34 : vector<128x1xf32> to vector<128x128xf32>
    %36 = arith.subf %30, %35 : vector<128x128xf32>
    %c0_14 = arith.constant 0 : index
    %c0_15 = arith.constant 0 : index
    %37 = vector.load %arg6[%c0_14, %c0_15] : memref<128x128xf32, #tpu.memory_space<vmem>>, vector<128x128xf32>
    tpu.vector_store %arg6[%c0_14, %c0_15], %36 {strides = array<i32>} : memref<128x128xf32, #tpu.memory_space<vmem>>, vector<128x128xf32>,
    return
  }
  func.func @transform_0(%arg0: i32) -> (i32, i32) {
    %c0_i32 = arith.constant 0 : i32
    %c0_i32_0 = arith.constant 0 : i32
    %c0_i32_1 = arith.constant 0 : i32
    return %c0_i32, %c0_i32_0 : i32, i32
  }
  func.func @transform_1(%arg0: i32) -> (i32, i32) {
    %c0_i32 = arith.constant 0 : i32
    %c0_i32_0 = arith.constant 0 : i32
    return %arg0, %c0_i32 : i32, i32
  }
  func.func @transform_2(%arg0: i32) -> (i32, i32) {
    %c0_i32 = arith.constant 0 : i32
    %c0_i32_0 = arith.constant 0 : i32
    %c0_i32_1 = arith.constant 0 : i32
    return %c0_i32, %c0_i32_0 : i32, i32
  }
  func.func @transform_3(%arg0: i32) -> (i32, i32) {
    %c0_i32 = arith.constant 0 : i32
    %c0_i32_0 = arith.constant 0 : i32
    return %arg0, %c0_i32 : i32, i32
  }
  func.func @transform_4(%arg0: i32) -> (i32, i32) {
    %c0_i32 = arith.constant 0 : i32
    %c0_i32_0 = arith.constant 0 : i32
    %c0_i32_1 = arith.constant 0 : i32
    return %c0_i32, %c0_i32_0 : i32, i32
  }
  func.func @transform_5(%arg0: i32) -> (i32, i32) {
    %c0_i32 = arith.constant 0 : i32
    %c0_i32_0 = arith.constant 0 : i32
    return %arg0, %c0_i32 : i32, i32
  }
}

</mosaic_0001>

<bundles_post_ra>
// kernel: _forward.10
= control target key start
LH: loop header
LB: loop body
LE: loop exit
PB: predicated region body
PF: predicated region fallthrough
CT: control target
= control target key end

     0   :  { %s921_s15 = smov 0   ;;  %s1063_s0 = inlined_call_operand.vmem [shape: f32[256,16], index: 0, kind: input, shape index: {}]   ;;  %s1064_s1 = inlined_call_operand.vmem [shape: f32[16,130], index: 1, kind: input, shape index: {}]   ;;  %s1065_s2 = inlined_call_operand.vmem [shape: bf16[256,128], index: 2, kind: output, shape index: {0}]   ;;  %s1066_s3 = inlined_call_operand.vmem [shape: f32[256,1], index: 3, kind: output, shape index: {1}]   ;;  %s1067_s4 = inlined_call_operand.vmem [shape: f32[1,256], index: 4, kind: output, shape index: {2}]  }
   0x1 LB: > { %s927_s16 = sadd.s32 4294967295, %s892_s15   ;;  %p766_p0 = scmp.ge.s32.totalorder %s892_s15, 1  ;;  %s892_s15 = sphi %s921_s15, %s15_s15  }
   0x2   : > { %p168_p1 = scmp.lt.s32.totalorder %s892_s15, 3 }
   0x4   : > { %p169_p2 = pnand %p766_p0, %p168_p1 }
   0x5   : > { %v240_v0 = vld [vmem:[%s1064_s1 + $0x8] sm:$0xff] (!%p169_p2)  ;;  %v242_v1 = vld [vmem:[%s1064_s1 + $0x18] sm:$0xff] (!%p169_p2)  ;;  %v239_v2 = vld [vmem:[%s1064_s1] sm:$0xff] (!%p169_p2)  ;;  %s767_s23 = sshll.u32 (!%p169_p2), %s927_s16, 4  ;;  %v894_v5 = vmov (!%p169_p2), 0.0   ;;  %vm243_vm0 = vcmask (!%p169_p2), 130048  }
   0x6   : > { %172 = sbr.rel (%p169_p2) target bundleno = 479 (0x1df), region = 28  ;;  %v870_v3 = vpack.c.bf16 (!%p169_p2), %v242_v1, %v240_v0  ;;  %v241_v4 = vld [vmem:[%s1064_s1 + $0x10] sm:$0xff] (!%p169_p2)  ;;  %356 = vmatprep.mubr.f32.mxu0 (!%p169_p2), %v894_v5  ;;  %404 = vmatprep.mubr.f32.mxu1 (!%p169_p2), %v894_v5  ;;  %p203_p3 = scmp.lt.s32.totalorder (!%p169_p2), %s767_s23, 31  ;;  %vm533_vm1 = vcmask (!%p169_p2), 7168  }
   0x7   : > { %v872_v6 = vpack.c.bf16 (!%p169_p2), %v241_v4, %v239_v2  ;;  %s895_s8 = smov (!%p169_p2), 127   ;;  %p220_p4 = scmp.lt.s32.totalorder (!%p169_p2), %s927_s16, 1 }
   0x8   : > { %871 = vmatprep.subr.bf16.mxu0 (!%p169_p2), %v870_v3  ;;  %874 = vmatprep.subr.bf16.mxu1 (!%p169_p2), %v870_v3 }
   0x9   : > { %873 = vmatpush1.bf16.msra.mxu0 (!%p169_p2), %v872_v6  ;;  %875 = vmatpush1.bf16.msra.mxu1 (!%p169_p2), %v872_v6 }
   0xd   : > { %s1069_s23 = smov (!%p203_p3, %s767_s23), 31  ;;  %s1071_s16 = smov (!%p220_p4, %s927_s16), 1 }
   0xe   : > { %s768_s26 = sshll.u32 %s1069_s23, 3  ;;  %s770_s7 = sshll.u32 %s1069_s23, 2 }
   0xf   : > { %s952_s29 = scalar_lea.vmem %s1063_s0, %s768_s26  ;;  %s991_s6 = scalar_lea.vmem %s1066_s3, %s768_s26 }
  0x10   : > { %v223_v7 = vld [vmem:[%s952_s29] sm:$0xff]  ;;  %v224_v9 = vld [vmem:[%s952_s29 + $0x8] sm:$0xff]  ;;  %v225_v11 = vld [vmem:[%s952_s29 + $0x10] sm:$0xff]  ;;  %s1002_s11 = scalar_lea.vmem %s1065_s2, %s770_s7  ;;  %s222_s14 = scalar_lea.vmem %s1067_s4, %s1071_s16 }
  0x11   : > { %v231_v8 = vld [vmem:[%s952_s29 + $0x40] sm:$0xff]  ;;  %773 = vmatmul.mubr.msk.f32.vlgmr.msra.gmra.mrb[0].mxu0 %vm243_vm0, %v223_v7  ;;  %v232_v10 = vld [vmem:[%s952_s29 + $0x48] sm:$0xff]  ;;  %v233_v12 = vld [vmem:[%s952_s29 + $0x50] sm:$0xff] }
  0x12   : > { %781 = vmatmul.mubr.msk.f32.vlgmr.msra.gmra.mrb[0].mxu1 %vm243_vm0, %v231_v8  ;;  %362 = vmatprep.mubr.f32.mxu0 %v894_v5  ;;  %v226_v13 = vld [vmem:[%s952_s29 + $0x18] sm:$0xff]  ;;  %v227_v15 = vld [vmem:[%s952_s29 + $0x20] sm:$0xff]  ;;  %v228_v17 = vld [vmem:[%s952_s29 + $0x28] sm:$0xff] }
  0x13   : > { %410 = vmatprep.mubr.f32.mxu1 %v894_v5  ;;  %v234_v14 = vld [vmem:[%s952_s29 + $0x58] sm:$0xff]  ;;  %v235_v16 = vld [vmem:[%s952_s29 + $0x60] sm:$0xff]  ;;  %v236_v18 = vld [vmem:[%s952_s29 + $0x68] sm:$0xff] }
  0x14   : > { %v229_v19 = vld [vmem:[%s952_s29 + $0x30] sm:$0xff]  ;;  %v230_v21 = vld [vmem:[%s952_s29 + $0x38] sm:$0xff] }
  0x15   : > { %774 = vmatmul.mubr.msk.f32.gmra.mrb[2].mxu0 %vm243_vm0, %v224_v9  ;;  %v237_v20 = vld [vmem:[%s952_s29 + $0x70] sm:$0xff]  ;;  %v238_v22 = vld [vmem:[%s952_s29 + $0x78] sm:$0xff] }
  0x16   : > { %782 = vmatmul.mubr.msk.f32.gmra.mrb[2].mxu1 %vm243_vm0, %v232_v10  ;;  %368 = vmatprep.mubr.f32.mxu0 %v894_v5 }
  0x17   : > { %416 = vmatprep.mubr.f32.mxu1 %v894_v5 }
  0x19   : > { %775 = vmatmul.mubr.msk.f32.gmra.mrb[4].mxu0 %vm243_vm0, %v225_v11 }
  0x1a   : > { %783 = vmatmul.mubr.msk.f32.gmra.mrb[4].mxu1 %vm243_vm0, %v233_v12  ;;  %374 = vmatprep.mubr.f32.mxu0 %v894_v5 }
  0x1b   : > { %422 = vmatprep.mubr.f32.mxu1 %v894_v5 }
  0x1d   : > { %776 = vmatmul.mubr.msk.f32.gmra.mrb[6].mxu0 %vm243_vm0, %v226_v13 }
  0x1e   : > { %784 = vmatmul.mubr.msk.f32.gmra.mrb[6].mxu1 %vm243_vm0, %v234_v14  ;;  %380 = vmatprep.mubr.f32.mxu0 %v894_v5 }
  0x1f   : > { %428 = vmatprep.mubr.f32.mxu1 %v894_v5 }
  0x21   : > { %777 = vmatmul.mubr.msk.f32.gmra.mrb[8].mxu0 %vm243_vm0, %v227_v15 }
  0x22   : > { %785 = vmatmul.mubr.msk.f32.gmra.mrb[8].mxu1 %vm243_vm0, %v235_v16  ;;  %386 = vmatprep.mubr.f32.mxu0 %v894_v5 }
  0x23   : > { %434 = vmatprep.mubr.f32.mxu1 %v894_v5 }
  0x25   : > { %778 = vmatmul.mubr.msk.f32.gmra.mrb[10].mxu0 %vm243_vm0, %v228_v17 }
  0x26   : > { %786 = vmatmul.mubr.msk.f32.gmra.mrb[10].mxu1 %vm243_vm0, %v236_v18  ;;  %392 = vmatprep.mubr.f32.mxu0 %v894_v5 }
  0x27   : > { %440 = vmatprep.mubr.f32.mxu1 %v894_v5 }
  0x29   : > { %779 = vmatmul.mubr.msk.f32.gmra.mrb[12].mxu0 %vm243_vm0, %v229_v19 }
  0x2a   : > { %787 = vmatmul.mubr.msk.f32.gmra.mrb[12].mxu1 %vm243_vm0, %v237_v20  ;;  %398 = vmatprep.mubr.f32.mxu0 %v894_v5 }
  0x2b   : > { %446 = vmatprep.mubr.f32.mxu1 %v894_v5 }
  0x2d   : > { %780 = vmatmul.mubr.msk.f32.gmra.mrb[14].mxu0 %vm243_vm0, %v230_v21 }
  0x2e   : > { %788 = vmatmul.mubr.msk.f32.gmra.mrb[14].mxu1 %vm243_vm0, %v238_v22 }
  0xe4   : > { %v358_v23 = vpop.f32.mrb[0].mxu0 }
  0xe5   : > { %v406_v24 = vpop.f32.mrb[0].mxu1  ;;  %v360_v25 = vpop.f32.mrb[1].mxu0 }
  0xe6   : > { %v408_v26 = vpop.f32.mrb[1].mxu1  ;;  %534 = vst.msk [vmem:[%s991_s6] sm:$0xff] %vm533_vm1, %v360_v25  ;;  %566 = vrot.lane.b32.xlu0 %v360_v25, %s895_s8 }
  0xe7   : > { %542 = vst.msk [vmem:[%s991_s6 + $0x40] sm:$0xff] %vm533_vm1, %v408_v26 }
  0xe8   : > { %v364_v27 = vpop.f32.mrb[2].mxu0 }
  0xe9   : > { %v412_v28 = vpop.f32.mrb[2].mxu1  ;;  %v826_v29 = vpack.c.bf16 %v364_v27, %v358_v23  ;;  %v366_v31 = vpop.f32.mrb[3].mxu0 }
  0xea   : > { %v846_v30 = vpack.c.bf16 %v412_v28, %v406_v24  ;;  %v414_v32 = vpop.f32.mrb[3].mxu1  ;;  %582 = vrot.lane.b32.xlu0 %v408_v26, %s895_s8  ;;  %535 = vst.msk [vmem:[%s991_s6 + $0x8] sm:$0xff] %vm533_vm1, %v366_v31 }
  0xeb   : > { %543 = vst.msk [vmem:[%s991_s6 + $0x48] sm:$0xff] %vm533_vm1, %v414_v32  ;;  %827 = vst [vmem:[%s1002_s11] sm:$0xff] %v826_v29  }
  0xec   : > { %866 = vst [vmem:[%s1002_s11 + $0x20] sm:$0xff] %v846_v30   ;;  %v370_v33 = vpop.f32.mrb[4].mxu0 }
  0xed   : > { %v418_v34 = vpop.f32.mrb[4].mxu1  ;;  %v372_v35 = vpop.f32.mrb[5].mxu0 }
  0xee   : > { %v420_v36 = vpop.f32.mrb[5].mxu1  ;;  %568 = vrot.lane.b32.xlu0 %v366_v31, %s895_s8  ;;  %536 = vst.msk [vmem:[%s991_s6 + $0x10] sm:$0xff] %vm533_vm1, %v372_v35  ;;  %570 = vrot.lane.b32.xlu1 %v372_v35, %s895_s8 }
  0xef   : > { %544 = vst.msk [vmem:[%s991_s6 + $0x50] sm:$0xff] %vm533_vm1, %v420_v36 }
  0xf0   : > { %v376_v37 = vpop.f32.mrb[6].mxu0 }
  0xf1   : > { %v424_v38 = vpop.f32.mrb[6].mxu1  ;;  %v831_v39 = vpack.c.bf16 %v376_v37, %v370_v33  ;;  %v378_v40 = vpop.f32.mrb[7].mxu0 }
  0xf2   : > { %v851_v41 = vpack.c.bf16 %v424_v38, %v418_v34  ;;  %v426_v42 = vpop.f32.mrb[7].mxu1  ;;  %537 = vst.msk [vmem:[%s991_s6 + $0x18] sm:$0xff] %vm533_vm1, %v378_v40  ;;  %572 = vrot.lane.b32.xlu1 %v378_v40, %s895_s8 }
  0xf3   : > { %545 = vst.msk [vmem:[%s991_s6 + $0x58] sm:$0xff] %vm533_vm1, %v426_v42  ;;  %863 = vst [vmem:[%s1002_s11 + $0x8] sm:$0xff] %v831_v39  }
  0xf4   : > { %867 = vst [vmem:[%s1002_s11 + $0x28] sm:$0xff] %v851_v41   ;;  %v382_v43 = vpop.f32.mrb[8].mxu0 }
  0xf5   : > { %v430_v44 = vpop.f32.mrb[8].mxu1  ;;  %v384_v45 = vpop.f32.mrb[9].mxu0 }
  0xf6   : > { %v432_v46 = vpop.f32.mrb[9].mxu1  ;;  %538 = vst.msk [vmem:[%s991_s6 + $0x20] sm:$0xff] %vm533_vm1, %v384_v45  ;;  %574 = vrot.lane.b32.xlu0 %v384_v45, %s895_s8 }
  0xf7   : > { %546 = vst.msk [vmem:[%s991_s6 + $0x60] sm:$0xff] %vm533_vm1, %v432_v46 }
  0xf8   : > { %v388_v47 = vpop.f32.mrb[10].mxu0 }
  0xf9   : > { %v436_v48 = vpop.f32.mrb[10].mxu1  ;;  %v836_v49 = vpack.c.bf16 %v388_v47, %v382_v43  ;;  %v390_v50 = vpop.f32.mrb[11].mxu0 }
  0xfa   : > { %v856_v51 = vpack.c.bf16 %v436_v48, %v430_v44  ;;  %v438_v52 = vpop.f32.mrb[11].mxu1  ;;  %539 = vst.msk [vmem:[%s991_s6 + $0x28] sm:$0xff] %vm533_vm1, %v390_v50  ;;  %576 = vrot.lane.b32.xlu1 %v390_v50, %s895_s8 }
  0xfb   : > { %547 = vst.msk [vmem:[%s991_s6 + $0x68] sm:$0xff] %vm533_vm1, %v438_v52  ;;  %864 = vst [vmem:[%s1002_s11 + $0x10] sm:$0xff] %v836_v49  }
  0xfc   : > { %868 = vst [vmem:[%s1002_s11 + $0x30] sm:$0xff] %v856_v51   ;;  %v394_v53 = vpop.f32.mrb[12].mxu0 }
  0xfd   : > { %v442_v54 = vpop.f32.mrb[12].mxu1  ;;  %v396_v55 = vpop.f32.mrb[13].mxu0 }
  0xfe   : > { %v444_v56 = vpop.f32.mrb[13].mxu1  ;;  %540 = vst.msk [vmem:[%s991_s6 + $0x30] sm:$0xff] %vm533_vm1, %v396_v55  ;;  %578 = vrot.lane.b32.xlu0 %v396_v55, %s895_s8 }
  0xff   : > { %548 = vst.msk [vmem:[%s991_s6 + $0x70] sm:$0xff] %vm533_vm1, %v444_v56 }
 0x100   : > { %v400_v57 = vpop.f32.mrb[14].mxu0 }
 0x101   : > { %v448_v58 = vpop.f32.mrb[14].mxu1  ;;  %v841_v59 = vpack.c.bf16 %v400_v57, %v394_v53  ;;  %v402_v60 = vpop.f32.mrb[15].mxu0 }
 0x102   : > { %v861_v61 = vpack.c.bf16 %v448_v58, %v442_v54  ;;  %v450_v62 = vpop.f32.mrb[15].mxu1  ;;  %541 = vst.msk [vmem:[%s991_s6 + $0x38] sm:$0xff] %vm533_vm1, %v402_v60  ;;  %580 = vrot.lane.b32.xlu1 %v402_v60, %s895_s8  ;;  %586 = vrot.lane.b32.xlu0 %v420_v36, %s895_s8 }
 0x103   : > { %549 = vst.msk [vmem:[%s991_s6 + $0x78] sm:$0xff] %vm533_vm1, %v450_v62  ;;  %865 = vst [vmem:[%s1002_s11 + $0x18] sm:$0xff] %v841_v59  }
 0x104   : > { %869 = vst [vmem:[%s1002_s11 + $0x38] sm:$0xff] %v861_v61  }
 0x106   : > { %584 = vrot.lane.b32.xlu1 %v414_v32, %s895_s8  ;;  %590 = vrot.lane.b32.xlu0 %v432_v46, %s895_s8 }
 0x10a   : > { %588 = vrot.lane.b32.xlu1 %v426_v42, %s895_s8  ;;  %594 = vrot.lane.b32.xlu0 %v444_v56, %s895_s8 }
 0x10e   : > { %592 = vrot.lane.b32.xlu1 %v438_v52, %s895_s8 }
 0x112   : > { %596 = vrot.lane.b32.xlu1 %v450_v62, %s895_s8 }
 0x158   : > { %v567_v63 = vpop.permute.xlu0 %566 }
 0x159   : > { %614 = vxpose.xlu0.b32.start [1/16] (narrow) %v567_v63, 8 }
 0x15c   : > { %v583_v0 = vpop.permute.xlu0 %582 }
 0x160   : > { %v569_v1 = vpop.permute.xlu0 %568  ;;  %v571_v2 = vpop.permute.xlu1 %570 }
 0x161   : > { %615 = vxpose.xlu0.b32.cont [2/16] (narrow) %v569_v1, 8 }
 0x164   : > { %v573_v3 = vpop.permute.xlu1 %572 }
 0x165   : > { %616 = vxpose.xlu0.b32.cont [3/16] (narrow) %v571_v2, 8 }
 0x168   : > { %v575_v4 = vpop.permute.xlu0 %574 }
 0x169   : > { %617 = vxpose.xlu0.b32.cont [4/16] (narrow) %v573_v3, 8 }
 0x16c   : > { %v577_v5 = vpop.permute.xlu1 %576 }
 0x16d   : > { %618 = vxpose.xlu0.b32.cont [5/16] (narrow) %v575_v4, 8 }
 0x170   : > { %v579_v6 = vpop.permute.xlu0 %578 }
 0x171   : > { %619 = vxpose.xlu0.b32.cont [6/16] (narrow) %v577_v5, 8 }
 0x174   : > { %v581_v7 = vpop.permute.xlu1 %580  ;;  %v587_v9 = vpop.permute.xlu0 %586 }
 0x175   : > { %620 = vxpose.xlu0.b32.cont [7/16] (narrow) %v579_v6, 8 }
 0x178   : > { %v585_v8 = vpop.permute.xlu1 %584  ;;  %v591_v11 = vpop.permute.xlu0 %590 }
 0x179   : > { %621 = vxpose.xlu0.b32.cont [8/16] (narrow) %v581_v7, 8 }
 0x17c   : > { %v589_v10 = vpop.permute.xlu1 %588  ;;  %v595_v13 = vpop.permute.xlu0 %594 }
 0x17d   : > { %622 = vxpose.xlu0.b32.cont [9/16] (narrow) %v583_v0, 8 }
 0x180   : > { %v593_v12 = vpop.permute.xlu1 %592 }
 0x181   : > { %623 = vxpose.xlu0.b32.cont [10/16] (narrow) %v585_v8, 8 }
 0x184   : > { %v597_v14 = vpop.permute.xlu1 %596 }
 0x185   : > { %624 = vxpose.xlu0.b32.cont [11/16] (narrow) %v587_v9, 8 }
 0x189   : > { %625 = vxpose.xlu0.b32.cont [12/16] (narrow) %v589_v10, 8 }
 0x18d   : > { %626 = vxpose.xlu0.b32.cont [13/16] (narrow) %v591_v11, 8 }
 0x191   : > { %627 = vxpose.xlu0.b32.cont [14/16] (narrow) %v593_v12, 8 }
 0x195   : > { %628 = vxpose.xlu0.b32.cont [15/16] (narrow) %v595_v13, 8 }
 0x199   : > { %629 = vxpose.xlu0.b32.end [16/16] (narrow) %v597_v14, 8 }
 0x1dd   : > { %v630_v15 = vpop.trf.xlu0 }
 0x1de   : > { %646 = vst [vmem:[%s222_s14] sm:$0x1] %v630_v15 }
 0x1df PF: > { %s15_s15 = sadd.s32 1, %s892_s15  }
 0x1e0   : > { %p12_p5 = scmp.ge.s32.totalorder %s15_s15, 4  }
 0x1e2   :  { %14 = sbr.rel (!%p12_p5) target bundleno = 1 (0x1), region = 82 }

// kernel: _forward.6
= control target key start
LH: loop header
LB: loop body
LE: loop exit
PB: predicated region body
PF: predicated region fallthrough
CT: control target
= control target key end

     0   :  { %s960_s15 = smov 0   ;;  %s1114_s0 = inlined_call_operand.vmem [shape: f32[256,16], index: 0, kind: input, shape index: {}]   ;;  %s1115_s1 = inlined_call_operand.vmem [shape: f32[16,20], index: 1, kind: input, shape index: {}]   ;;  %s1116_s2 = inlined_call_operand.vmem [shape: bf16[256,16], index: 2, kind: output, shape index: {0}]   ;;  %s1117_s3 = inlined_call_operand.vmem [shape: f32[256,2], index: 3, kind: output, shape index: {1}]   ;;  %s1118_s4 = inlined_call_operand.vmem [shape: f32[2,256], index: 4, kind: output, shape index: {2}]  }
   0x1 LB: > { %s966_s16 = sadd.s32 4294967295, %s931_s15   ;;  %p805_p0 = scmp.ge.s32.totalorder %s931_s15, 1  ;;  %s931_s15 = sphi %s960_s15, %s15_s15  }
   0x2   : > { %p168_p1 = scmp.lt.s32.totalorder %s931_s15, 3 }
   0x4   : > { %p169_p2 = pnand %p805_p0, %p168_p1 }
   0x5   : > { %v241_v0 = vld [vmem:[%s1115_s1] sm:$0xff] (!%p169_p2)  ;;  %v242_v1 = vld [vmem:[%s1115_s1 + $0x8] sm:$0xff] (!%p169_p2)  ;;  %s806_s21 = sshll.u32 (!%p169_p2), %s966_s16, 4  ;;  %vm243_vm0 = vcmask (!%p169_p2), 130048   ;;  %vm501_vm1 = vcmask (!%p169_p2), 125952   ;;  %s933_s30 = smov (!%p169_p2), 110  }
   0x6   : > { %172 = sbr.rel (%p169_p2) target bundleno = 499 (0x1f3), region = 28  ;;  %v909_v2 = vpack.c.bf16 (!%p169_p2), %v242_v1, %v241_v0  ;;  %p204_p3 = scmp.lt.s32.totalorder (!%p169_p2), %s806_s21, 31  ;;  %vm582_vm2 = vcmask (!%p169_p2), 15360  }
   0x7   : > { %s934_s5 = smov (!%p169_p2), 112   ;;  %p221_p4 = scmp.lt.s32.totalorder (!%p169_p2), %s966_s16, 1 }
   0x8   : > { %910 = vmatprep.subr.bf16.mxu0 (!%p169_p2), %v909_v2  ;;  %913 = vmatprep.subr.bf16.mxu1 (!%p169_p2), %v909_v2 }
   0x9   : > { %912 = vmatpush3.bf16.msra.mxu0 (!%p169_p2), %v909_v2  ;;  %914 = vmatpush3.bf16.msra.mxu1 (!%p169_p2), %v909_v2 }
   0xd   : > { %s1120_s21 = smov (!%p204_p3, %s806_s21), 31  ;;  %s1122_s16 = smov (!%p221_p4, %s966_s16), 1 }
   0xe   : > { %s807_s22 = sshll.u32 %s1120_s21, 3  ;;  %s809_s26 = sshll.u32 %s1120_s21, 2 }
   0xf   : > { %s207_s25 = scalar_lea.vmem %s1114_s0, %s807_s22  ;;  %s1005_s29 = scalar_lea.vmem %s1116_s2, %s809_s26 }
  0x10   : > { %v225_v3 = vld [vmem:[%s207_s25] sm:$0xff]  ;;  %v226_v4 = vld [vmem:[%s207_s25 + $0x8] sm:$0xff]  ;;  %v227_v5 = vld [vmem:[%s207_s25 + $0x10] sm:$0xff]  ;;  %s1072_s8 = scalar_lea.vmem %s1117_s3, %s807_s22  ;;  %s812_s9 = sshll.u32 %s1122_s16, 1 }
  0x11   : > { %885 = vmatprep.mubr.msk.f32.mxu0 %vm243_vm0, %v225_v3  ;;  %v233_v6 = vld [vmem:[%s207_s25 + $0x40] sm:$0xff]  ;;  %v234_v7 = vld [vmem:[%s207_s25 + $0x48] sm:$0xff]  ;;  %v235_v8 = vld [vmem:[%s207_s25 + $0x50] sm:$0xff]  ;;  %s224_s12 = scalar_lea.vmem %s1118_s4, %s812_s9 }
  0x12   : > { %886 = vmatmul.mubr.msk.f32.vlgmr.msra.gmra.mrb[0].mxu0 %vm243_vm0, %v226_v4  ;;  %897 = vmatprep.mubr.msk.f32.mxu1 %vm243_vm0, %v233_v6  ;;  %v228_v9 = vld [vmem:[%s207_s25 + $0x18] sm:$0xff]  ;;  %v229_v10 = vld [vmem:[%s207_s25 + $0x20] sm:$0xff]  ;;  %v230_v13 = vld [vmem:[%s207_s25 + $0x28] sm:$0xff] }
  0x13   : > { %888 = vmatprep.mubr.msk.f32.mxu0 %vm243_vm0, %v227_v5  ;;  %898 = vmatmul.mubr.msk.f32.vlgmr.msra.gmra.mrb[0].mxu1 %vm243_vm0, %v234_v7  ;;  %v236_v11 = vld [vmem:[%s207_s25 + $0x58] sm:$0xff]  ;;  %v237_v12 = vld [vmem:[%s207_s25 + $0x60] sm:$0xff]  ;;  %v231_v14 = vld [vmem:[%s207_s25 + $0x30] sm:$0xff] }
  0x14   : > { %900 = vmatprep.mubr.msk.f32.mxu1 %vm243_vm0, %v235_v8  ;;  %v238_v15 = vld [vmem:[%s207_s25 + $0x68] sm:$0xff]  ;;  %v239_v16 = vld [vmem:[%s207_s25 + $0x70] sm:$0xff]  ;;  %v232_v17 = vld [vmem:[%s207_s25 + $0x38] sm:$0xff] }
  0x15   : > { %v240_v18 = vld [vmem:[%s207_s25 + $0x78] sm:$0xff] }
  0x16   : > { %889 = vmatmul.mubr.msk.f32.gmra.mrb[2].mxu0 %vm243_vm0, %v228_v9 }
  0x17   : > { %891 = vmatprep.mubr.msk.f32.mxu0 %vm243_vm0, %v229_v10  ;;  %901 = vmatmul.mubr.msk.f32.gmra.mrb[2].mxu1 %vm243_vm0, %v236_v11 }
  0x18   : > { %903 = vmatprep.mubr.msk.f32.mxu1 %vm243_vm0, %v237_v12 }
  0x1a   : > { %892 = vmatmul.mubr.msk.f32.gmra.mrb[4].mxu0 %vm243_vm0, %v230_v13 }
  0x1b   : > { %894 = vmatprep.mubr.msk.f32.mxu0 %vm243_vm0, %v231_v14  ;;  %904 = vmatmul.mubr.msk.f32.gmra.mrb[4].mxu1 %vm243_vm0, %v238_v15 }
  0x1c   : > { %906 = vmatprep.mubr.msk.f32.mxu1 %vm243_vm0, %v239_v16 }
  0x1e   : > { %895 = vmatmul.mubr.msk.f32.gmra.mrb[6].mxu0 %vm243_vm0, %v232_v17 }
  0x1f   : > { %907 = vmatmul.mubr.msk.f32.gmra.mrb[6].mxu1 %vm243_vm0, %v240_v18 }
  0xe5   : > { %v1007_v19 = vpop.f32.mrb[0].mxu0 }
  0xe6   : > { %v848_v20 = vpack.c.bf16 %v1007_v19, %v1007_v19  ;;  %601 = vrot.lane.b32.xlu0 %v1007_v19, %s933_s30  ;;  %v358_v21 = vpop.f32.mrb[1].mxu0  ;;  %v1013_v22 = vpop.f32.mrb[0].mxu1 }
  0xe7   : > { %v847_v23 = vpack.c.bf16 %v358_v21, %v358_v21  ;;  %v856_v24 = vpack.c.bf16 %v1013_v22, %v1013_v22  ;;  %v398_v25 = vpop.f32.mrb[1].mxu1 }
  0xe8   : > { %503 = vst.msk [vmem:[%s1005_s29 + $0x4] sm:$0xf] %vm501_vm1, %v848_v20  ;;  %v855_v26 = vpack.c.bf16 %v398_v25, %v398_v25 }
  0xe9   : > { %502 = vst.msk [vmem:[%s1005_s29] sm:$0xf] %vm501_vm1, %v847_v23  ;;  %v890_v27 = vpop.f32.mrb[2].mxu0  ;;  %511 = vst.msk [vmem:[%s1005_s29 + $0x24] sm:$0xf] %vm501_vm1, %v856_v24 }
  0xea   : > { %v850_v28 = vpack.c.bf16 %v890_v27, %v890_v27  ;;  %599 = vrot.lane.b32.xlu0 %v358_v21, %s933_s30  ;;  %v368_v29 = vpop.f32.mrb[3].mxu0  ;;  %510 = vst.msk [vmem:[%s1005_s29 + $0x20] sm:$0xf] %vm501_vm1, %v855_v26  ;;  %v902_v30 = vpop.f32.mrb[2].mxu1 }
  0xeb   : > { %v849_v31 = vpack.c.bf16 %v368_v29, %v368_v29  ;;  %603 = vrot.lane.b32.xlu1 %v368_v29, %s933_s30  ;;  %v858_v32 = vpack.c.bf16 %v902_v30, %v902_v30  ;;  %v408_v33 = vpop.f32.mrb[3].mxu1 }
  0xec   : > { %505 = vst.msk [vmem:[%s1005_s29 + $0xc] sm:$0xf] %vm501_vm1, %v850_v28  ;;  %v857_v34 = vpack.c.bf16 %v408_v33, %v408_v33 }
  0xed   : > { %504 = vst.msk [vmem:[%s1005_s29 + $0x8] sm:$0xf] %vm501_vm1, %v849_v31  ;;  %v893_v35 = vpop.f32.mrb[4].mxu0  ;;  %513 = vst.msk [vmem:[%s1005_s29 + $0x2c] sm:$0xf] %vm501_vm1, %v858_v32 }
  0xee   : > { %615 = vrot.lane.b32.xlu0 %v398_v25, %s933_s30  ;;  %v852_v36 = vpack.c.bf16 %v893_v35, %v893_v35  ;;  %v378_v37 = vpop.f32.mrb[5].mxu0  ;;  %512 = vst.msk [vmem:[%s1005_s29 + $0x28] sm:$0xf] %vm501_vm1, %v857_v34  ;;  %v905_v38 = vpop.f32.mrb[4].mxu1 }
  0xef   : > { %605 = vrot.lane.b32.xlu1 %v890_v27, %s933_s30  ;;  %v851_v39 = vpack.c.bf16 %v378_v37, %v378_v37  ;;  %v860_v40 = vpack.c.bf16 %v905_v38, %v905_v38  ;;  %v418_v41 = vpop.f32.mrb[5].mxu1 }
  0xf0   : > { %507 = vst.msk [vmem:[%s1005_s29 + $0x14] sm:$0xf] %vm501_vm1, %v852_v36  ;;  %v859_v42 = vpack.c.bf16 %v418_v41, %v418_v41 }
  0xf1   : > { %506 = vst.msk [vmem:[%s1005_s29 + $0x10] sm:$0xf] %vm501_vm1, %v851_v39  ;;  %v896_v43 = vpop.f32.mrb[6].mxu0  ;;  %515 = vst.msk [vmem:[%s1005_s29 + $0x34] sm:$0xf] %vm501_vm1, %v860_v40 }
  0xf2   : > { %607 = vrot.lane.b32.xlu0 %v378_v37, %s933_s30  ;;  %v854_v44 = vpack.c.bf16 %v896_v43, %v896_v43  ;;  %514 = vst.msk [vmem:[%s1005_s29 + $0x30] sm:$0xf] %vm501_vm1, %v859_v42  ;;  %v908_v45 = vpop.f32.mrb[6].mxu1  ;;  %v388_v46 = vpop.f32.mrb[7].mxu0 }
  0xf3   : > { %609 = vrot.lane.b32.xlu1 %v893_v35, %s933_s30  ;;  %v862_v47 = vpack.c.bf16 %v908_v45, %v908_v45  ;;  %v853_v48 = vpack.c.bf16 %v388_v46, %v388_v46  ;;  %v428_v49 = vpop.f32.mrb[7].mxu1 }
  0xf4   : > { %509 = vst.msk [vmem:[%s1005_s29 + $0x1c] sm:$0xf] %vm501_vm1, %v854_v44  ;;  %v861_v50 = vpack.c.bf16 %v428_v49, %v428_v49 }
  0xf5   : > { %517 = vst.msk [vmem:[%s1005_s29 + $0x3c] sm:$0xf] %vm501_vm1, %v862_v47  ;;  %508 = vst.msk [vmem:[%s1005_s29 + $0x18] sm:$0xf] %vm501_vm1, %v853_v48 }
  0xf6   : > { %619 = vrot.lane.b32.xlu0 %v408_v33, %s933_s30  ;;  %516 = vst.msk [vmem:[%s1005_s29 + $0x38] sm:$0xf] %vm501_vm1, %v861_v50 }
  0xf7   : > { %613 = vrot.lane.b32.xlu1 %v896_v43, %s933_s30 }
  0xfa   : > { %623 = vrot.lane.b32.xlu0 %v418_v41, %s933_s30 }
  0xfb   : > { %617 = vrot.lane.b32.xlu1 %v1013_v22, %s933_s30 }
  0xfe   : > { %534 = vrot.lane.b32.xlu0 %v358_v21, %s934_s5 }
  0xff   : > { %621 = vrot.lane.b32.xlu1 %v902_v30, %s933_s30 }
 0x102   : > { %538 = vrot.lane.b32.xlu0 %v368_v29, %s934_s5 }
 0x103   : > { %625 = vrot.lane.b32.xlu1 %v905_v38, %s933_s30 }
 0x106   : > { %542 = vrot.lane.b32.xlu0 %v378_v37, %s934_s5 }
 0x107   : > { %629 = vrot.lane.b32.xlu1 %v908_v45, %s933_s30 }
 0x10a   : > { %550 = vrot.lane.b32.xlu0 %v398_v25, %s934_s5 }
 0x10b   : > { %536 = vrot.lane.b32.xlu1 %v1007_v19, %s934_s5 }
 0x10e   : > { %554 = vrot.lane.b32.xlu0 %v408_v33, %s934_s5 }
 0x10f   : > { %540 = vrot.lane.b32.xlu1 %v890_v27, %s934_s5 }
 0x112   : > { %558 = vrot.lane.b32.xlu0 %v418_v41, %s934_s5 }
 0x113   : > { %544 = vrot.lane.b32.xlu1 %v893_v35, %s934_s5 }
 0x116   : > { %611 = vrot.lane.b32.xlu0 %v388_v46, %s933_s30 }
 0x117   : > { %552 = vrot.lane.b32.xlu1 %v1013_v22, %s934_s5 }
 0x11a   : > { %627 = vrot.lane.b32.xlu0 %v428_v49, %s933_s30 }
 0x11b   : > { %556 = vrot.lane.b32.xlu1 %v902_v30, %s934_s5 }
 0x11e   : > { %546 = vrot.lane.b32.xlu0 %v388_v46, %s934_s5 }
 0x11f   : > { %560 = vrot.lane.b32.xlu1 %v905_v38, %s934_s5 }
 0x122   : > { %562 = vrot.lane.b32.xlu0 %v428_v49, %s934_s5 }
 0x123   : > { %548 = vrot.lane.b32.xlu1 %v896_v43, %s934_s5 }
 0x127   : > { %564 = vrot.lane.b32.xlu1 %v908_v45, %s934_s5 }
 0x158   : > { %v602_v51 = vpop.permute.xlu0 %601 }
 0x15c   : > { %v600_v52 = vpop.permute.xlu0 %599 }
 0x15d   : > { %v604_v53 = vpop.permute.xlu1 %603  ;;  %647 = vxpose.xlu0.b32.start [1/16] (narrow) %v600_v52, 8 }
 0x160   : > { %v616_v54 = vpop.permute.xlu0 %615 }
 0x161   : > { %v606_v55 = vpop.permute.xlu1 %605  ;;  %648 = vxpose.xlu0.b32.cont [2/16] (narrow) %v602_v51, 8 }
 0x164   : > { %v608_v56 = vpop.permute.xlu0 %607 }
 0x165   : > { %v610_v57 = vpop.permute.xlu1 %609  ;;  %649 = vxpose.xlu0.b32.cont [3/16] (narrow) %v604_v53, 8 }
 0x168   : > { %v620_v58 = vpop.permute.xlu0 %619 }
 0x169   : > { %v614_v59 = vpop.permute.xlu1 %613  ;;  %650 = vxpose.xlu0.b32.cont [4/16] (narrow) %v606_v55, 8 }
 0x16c   : > { %v624_v60 = vpop.permute.xlu0 %623 }
 0x16d   : > { %v618_v61 = vpop.permute.xlu1 %617  ;;  %651 = vxpose.xlu0.b32.cont [5/16] (narrow) %v608_v56, 8 }
 0x170   : > { %v535_v62 = vpop.permute.xlu0 %534 }
 0x171   : > { %583 = vst.msk [vmem:[%s1072_s8] sm:$0xff] %vm582_vm2, %v535_v62  ;;  %v622_v63 = vpop.permute.xlu1 %621  ;;  %652 = vxpose.xlu0.b32.cont [6/16] (narrow) %v610_v57, 8 }
 0x174   : > { %v539_v0 = vpop.permute.xlu0 %538 }
 0x175   : > { %585 = vst.msk [vmem:[%s1072_s8 + $0x10] sm:$0xff] %vm582_vm2, %v539_v0  ;;  %v626_v1 = vpop.permute.xlu1 %625 }
 0x178   : > { %v543_v2 = vpop.permute.xlu0 %542 }
 0x179   : > { %587 = vst.msk [vmem:[%s1072_s8 + $0x20] sm:$0xff] %vm582_vm2, %v543_v2  ;;  %v630_v3 = vpop.permute.xlu1 %629 }
 0x17c   : > { %v551_v4 = vpop.permute.xlu0 %550 }
 0x17d   : > { %591 = vst.msk [vmem:[%s1072_s8 + $0x40] sm:$0xff] %vm582_vm2, %v551_v4  ;;  %v537_v5 = vpop.permute.xlu1 %536 }
 0x17e   : > { %584 = vst.msk [vmem:[%s1072_s8 + $0x8] sm:$0xff] %vm582_vm2, %v537_v5 }
 0x180   : > { %v555_v6 = vpop.permute.xlu0 %554 }
 0x181   : > { %593 = vst.msk [vmem:[%s1072_s8 + $0x50] sm:$0xff] %vm582_vm2, %v555_v6  ;;  %v541_v7 = vpop.permute.xlu1 %540 }
 0x182   : > { %586 = vst.msk [vmem:[%s1072_s8 + $0x18] sm:$0xff] %vm582_vm2, %v541_v7 }
 0x184   : > { %v559_v8 = vpop.permute.xlu0 %558 }
 0x185   : > { %595 = vst.msk [vmem:[%s1072_s8 + $0x60] sm:$0xff] %vm582_vm2, %v559_v8  ;;  %v545_v9 = vpop.permute.xlu1 %544 }
 0x186   : > { %588 = vst.msk [vmem:[%s1072_s8 + $0x28] sm:$0xff] %vm582_vm2, %v545_v9 }
 0x188   : > { %v612_v10 = vpop.permute.xlu0 %611 }
 0x189   : > { %v553_v11 = vpop.permute.xlu1 %552  ;;  %653 = vxpose.xlu0.b32.cont [7/16] (narrow) %v612_v10, 8 }
 0x18a   : > { %592 = vst.msk [vmem:[%s1072_s8 + $0x48] sm:$0xff] %vm582_vm2, %v553_v11 }
 0x18c   : > { %v628_v12 = vpop.permute.xlu0 %627 }
 0x18d   : > { %v557_v13 = vpop.permute.xlu1 %556  ;;  %654 = vxpose.xlu0.b32.cont [8/16] (narrow) %v614_v59, 8 }
 0x18e   : > { %594 = vst.msk [vmem:[%s1072_s8 + $0x58] sm:$0xff] %vm582_vm2, %v557_v13 }
 0x190   : > { %v547_v14 = vpop.permute.xlu0 %546 }
 0x191   : > { %589 = vst.msk [vmem:[%s1072_s8 + $0x30] sm:$0xff] %vm582_vm2, %v547_v14  ;;  %v561_v15 = vpop.permute.xlu1 %560  ;;  %655 = vxpose.xlu0.b32.cont [9/16] (narrow) %v616_v54, 8 }
 0x192   : > { %596 = vst.msk [vmem:[%s1072_s8 + $0x68] sm:$0xff] %vm582_vm2, %v561_v15 }
 0x194   : > { %v563_v16 = vpop.permute.xlu0 %562 }
 0x195   : > { %v549_v17 = vpop.permute.xlu1 %548  ;;  %656 = vxpose.xlu0.b32.cont [10/16] (narrow) %v618_v61, 8  ;;  %597 = vst.msk [vmem:[%s1072_s8 + $0x70] sm:$0xff] %vm582_vm2, %v563_v16 }
 0x196   : > { %590 = vst.msk [vmem:[%s1072_s8 + $0x38] sm:$0xff] %vm582_vm2, %v549_v17 }
 0x199   : > { %657 = vxpose.xlu0.b32.cont [11/16] (narrow) %v620_v58, 8  ;;  %v565_v18 = vpop.permute.xlu1 %564 }
 0x19a   : > { %598 = vst.msk [vmem:[%s1072_s8 + $0x78] sm:$0xff] %vm582_vm2, %v565_v18 }
 0x19d   : > { %658 = vxpose.xlu0.b32.cont [12/16] (narrow) %v622_v63, 8 }
 0x1a1   : > { %659 = vxpose.xlu0.b32.cont [13/16] (narrow) %v624_v60, 8 }
 0x1a5   : > { %660 = vxpose.xlu0.b32.cont [14/16] (narrow) %v626_v1, 8 }
 0x1a9   : > { %661 = vxpose.xlu0.b32.cont [15/16] (narrow) %v628_v12, 8 }
 0x1ad   : > { %662 = vxpose.xlu0.b32.end [16/16] (narrow) %v630_v3, 8 }
 0x1f1   : > { %v663_v19 = vpop.trf.xlu0 }
 0x1f2   : > { %679 = vst [vmem:[%s224_s12] sm:$0x3] %v663_v19 }
 0x1f3 PF: > { %s15_s15 = sadd.s32 1, %s931_s15  }
 0x1f4   : > { %p12_p5 = scmp.ge.s32.totalorder %s15_s15, 4  }
 0x1f6   :  { %14 = sbr.rel (!%p12_p5) target bundleno = 1 (0x1), region = 82 }

// kernel: _forward.11
= control target key start
LH: loop header
LB: loop body
LE: loop exit
PB: predicated region body
PF: predicated region fallthrough
CT: control target
= control target key end

     0   :  { %s1608_s18 = smov 0   ;;  %s2307_s0 = inlined_call_operand.vmem [shape: bf16[256,128], index: 0, kind: input, shape index: {}]   ;;  %s2308_s1 = inlined_call_operand.vmem [shape: f32[256,1], index: 1, kind: input, shape index: {}]   ;;  %s2309_s2 = inlined_call_operand.vmem [shape: f32[1,256], index: 2, kind: input, shape index: {}]   ;;  %s2310_s3 = inlined_call_operand.vmem [shape: bf16[256,256], index: 3, kind: input, shape index: {}]   ;;  %s2311_s4 = inlined_call_operand.vmem [shape: f32[1,128], index: 4, kind: input, shape index: {}]   ;;  %s2312_s5 = inlined_call_operand.vmem [shape: f32[256,128], index: 5, kind: output, shape index: {}]  }
   0x1 LB: > { %s1270_s19 = sadd.s32 4294967295, %s1575_s18   ;;  %p1274_p0 = scmp.ge.s32.totalorder %s1575_s18, 1  ;;  %s1575_s18 = sphi %s1608_s18, %s15_s18  }
   0x2   : > { %p200_p1 = scmp.lt.s32.totalorder %s1575_s18, 3 }
   0x4   : > { %p201_p2 = pnand %p1274_p0, %p200_p1 }
   0x5   : > { %s1275_s20 = sshll.u32 (!%p201_p2), %s1270_s19, 4  ;;  %v1577_v0 = vmov (!%p201_p2), 0   ;;  %v433_v17 = vlaneseq (!%p201_p2)  ;;  %v350_v20 = vld [vmem:[%s2309_s2] sm:$0x3] (!%p201_p2) }
   0x6   : > { %204 = sbr.rel (%p201_p2) target bundleno = 1047 (0x417), region = 40  ;;  %1392 = vset.pattern.permute.xlu1 (!%p201_p2), %v1577_v0  ;;  %1391 = vset.pattern.permute.xlu0 (!%p201_p2), %v1577_v0  ;;  %p235_p3 = scmp.lt.s32.totalorder (!%p201_p2), %s1275_s20, 31 }
   0x7   : > { %v434_v18 = vshrl.u32 (!%p201_p2), %v433_v17, 7 }
   0x9   : > { %v435_v19 = vsub.s32 (!%p201_p2), 0, %v434_v18  ;;  %v439_v21 = vsub.s32 (!%p201_p2), 1, %v434_v18 }
   0xb   : > { %v1643_v26 = vrot.slane (!%p201_p2), %v350_v20, %v435_v19  ;;  %v1651_v29 = vrot.slane (!%p201_p2), %v350_v20, %v439_v21 }
   0xd   : > { %s2320_s20 = smov (!%p235_p3, %s1275_s20), 31 }
   0xe   : > { %s1616_s21 = sshll.u32 %s2320_s20, 3 }
   0xf   : > { %s238_s24 = scalar_lea.vmem %s2308_s1, %s1616_s21  ;;  %s1626_s27 = scalar_lea.vmem %s2310_s3, %s1616_s21 }
  0x10   : > { %v342_v1 = vld [vmem:[%s238_s24 + $0x40] sm:$0xff]  ;;  %v343_v3 = vld [vmem:[%s238_s24 + $0x48] sm:$0xff]  ;;  %v337_v5 = vld [vmem:[%s238_s24 + $0x18] sm:$0xff]  ;;  %s2270_s19 = scalar_lea.vmem %s2312_s5, %s1616_s21 }
  0x11   : > { %v334_v2 = vld [vmem:[%s238_s24] sm:$0xff]  ;;  %394 = vperm.xlu1 %1392, %v342_v1   ;;  %v335_v4 = vld [vmem:[%s238_s24 + $0x8] sm:$0xff]  ;;  %v336_v6 = vld [vmem:[%s238_s24 + $0x10] sm:$0xff] }
  0x12   : > { %354 = vperm.xlu0 %1391, %v334_v2   ;;  %v345_v7 = vld [vmem:[%s238_s24 + $0x58] sm:$0xff]  ;;  %v344_v8 = vld [vmem:[%s238_s24 + $0x50] sm:$0xff]  ;;  %v339_v9 = vld [vmem:[%s238_s24 + $0x28] sm:$0xff] }
  0x13   : > { %v338_v10 = vld [vmem:[%s238_s24 + $0x20] sm:$0xff]  ;;  %v347_v11 = vld [vmem:[%s238_s24 + $0x68] sm:$0xff]  ;;  %v341_v13 = vld [vmem:[%s238_s24 + $0x38] sm:$0xff] }
  0x14   : > { %v346_v12 = vld [vmem:[%s238_s24 + $0x60] sm:$0xff]  ;;  %v340_v14 = vld [vmem:[%s238_s24 + $0x30] sm:$0xff]  ;;  %v349_v15 = vld [vmem:[%s238_s24 + $0x78] sm:$0xff] }
  0x15   : > { %399 = vperm.xlu1 %1392, %v343_v3   ;;  %v348_v16 = vld [vmem:[%s238_s24 + $0x70] sm:$0xff]  ;;  %v1632_v22 = vld [vmem:[%s1626_s27] sm:$0xff]  ;;  %v1638_v24 = vld [vmem:[%s1626_s27 + $0x8] sm:$0xff] }
  0x16   : > { %359 = vperm.xlu0 %1391, %v335_v4   ;;  %v1635_v23 = vld [vmem:[%s1626_s27 + $0x40] sm:$0xff]  ;;  %v1641_v25 = vld [vmem:[%s1626_s27 + $0x48] sm:$0xff]  ;;  %v1646_v27 = vld [vmem:[%s1626_s27 + $0x10] sm:$0xff]  ;;  %v270_v30 = vunpack.c.l.bf16 %v1632_v22  ;;  %v271_v31 = vunpack.c.h.bf16 %v1632_v22  ;;  %v272_v36 = vunpack.c.l.bf16 %v1638_v24  ;;  %v273_v37 = vunpack.c.h.bf16 %v1638_v24 }
  0x17   : > { %v1649_v28 = vld [vmem:[%s1626_s27 + $0x18] sm:$0xff]  ;;  %v286_v32 = vunpack.c.l.bf16 %v1635_v23  ;;  %v1657_v33 = vld [vmem:[%s1626_s27 + $0x50] sm:$0xff]  ;;  %v287_v35 = vunpack.c.h.bf16 %v1635_v23  ;;  %v288_v38 = vunpack.c.l.bf16 %v1641_v25  ;;  %v1667_v39 = vld [vmem:[%s1626_s27 + $0x20] sm:$0xff]  ;;  %v289_v41 = vunpack.c.h.bf16 %v1641_v25 }
  0x18   : > { %v1660_v34 = vld [vmem:[%s1626_s27 + $0x58] sm:$0xff]  ;;  %v1670_v40 = vld [vmem:[%s1626_s27 + $0x28] sm:$0xff]  ;;  %v274_v42 = vunpack.c.l.bf16 %v1646_v27  ;;  %v275_v43 = vunpack.c.h.bf16 %v1646_v27  ;;  %v276_v44 = vunpack.c.l.bf16 %v1649_v28  ;;  %v277_v45 = vunpack.c.h.bf16 %v1649_v28  ;;  %v1681_v49 = vld [vmem:[%s1626_s27 + $0x60] sm:$0xff] }
  0x19   : > { %369 = vperm.xlu1 %1392, %v337_v5   ;;  %v290_v46 = vunpack.c.l.bf16 %v1657_v33  ;;  %v291_v47 = vunpack.c.h.bf16 %v1657_v33  ;;  %v292_v48 = vunpack.c.l.bf16 %v1660_v34  ;;  %v1684_v50 = vld [vmem:[%s1626_s27 + $0x68] sm:$0xff]  ;;  %v293_v53 = vunpack.c.h.bf16 %v1660_v34  ;;  %v1695_v61 = vld [vmem:[%s1626_s27 + $0x30] sm:$0xff]  ;;  %v1698_v62 = vld [vmem:[%s1626_s27 + $0x38] sm:$0xff] }
  0x1a   : > { %364 = vperm.xlu0 %1391, %v336_v6   ;;  %v278_v54 = vunpack.c.l.bf16 %v1667_v39  ;;  %v279_v55 = vunpack.c.h.bf16 %v1667_v39  ;;  %v280_v56 = vunpack.c.l.bf16 %v1670_v40  ;;  %v281_v63 = vunpack.c.h.bf16 %v1670_v40 }
  0x1b   : > { %v294_v0 = vunpack.c.l.bf16 %v1681_v49  ;;  %v295_v1 = vunpack.c.h.bf16 %v1681_v49  ;;  %v2313_v40 = vunpack.c.l.bf16 %v1684_v50 }
  0x1d   : > { %409 = vperm.xlu1 %1392, %v345_v7  }
  0x1e   : > { %404 = vperm.xlu0 %1391, %v344_v8  }
  0x21   : > { %379 = vperm.xlu1 %1392, %v339_v9  }
  0x22   : > { %374 = vperm.xlu0 %1391, %v338_v10  }
  0x25   : > { %419 = vperm.xlu1 %1392, %v347_v11  }
  0x26   : > { %414 = vperm.xlu0 %1391, %v346_v12   ;;  %v1730_v12 = vld [vmem:[%s1626_s27 + $0x70] sm:$0xff] }
  0x27   : > { %v299_v25 = vunpack.c.h.bf16 %v1730_v12 }
  0x29   : > { %389 = vperm.xlu1 %1392, %v341_v13  }
  0x2a   : > { %384 = vperm.xlu0 %1391, %v340_v14  }
  0x2d   : > { %429 = vperm.xlu1 %1392, %v349_v15  }
  0x2e   : > { %424 = vperm.xlu0 %1391, %v348_v16  }
  0x90   : > { %v395_v51 = vpop.permute.xlu1 %394 }
  0x91   : > { %v355_v52 = vpop.permute.xlu0 %354  ;;  %v459_v57 = vadd.f32 %v1643_v26, %v395_v51  ;;  %v460_v58 = vadd.f32 %v1651_v29, %v395_v51 }
  0x92   : > { %v443_v59 = vadd.f32 %v1643_v26, %v355_v52  ;;  %v444_v60 = vadd.f32 %v1651_v29, %v355_v52 }
  0x93   : > { %v491_v3 = vmul.f32 0.2, %v459_v57  ;;  %v492_v4 = vmul.f32 0.2, %v460_v58 }
  0x94   : > { %v475_v5 = vmul.f32 0.2, %v443_v59  ;;  %v476_v7 = vmul.f32 0.2, %v444_v60  ;;  %v400_v8 = vpop.permute.xlu1 %399 }
  0x95   : > { %v360_v9 = vpop.permute.xlu0 %359  ;;  %v523_v13 = vmax.f32 %v459_v57, %v491_v3  ;;  %v524_v14 = vmax.f32 %v460_v58, %v492_v4  ;;  %v461_v16 = vadd.f32 %v1643_v26, %v400_v8  ;;  %v462_v18 = vadd.f32 %v1651_v29, %v400_v8 }
  0x96   : > { %v507_v15 = vmax.f32 %v443_v59, %v475_v5  ;;  %v508_v17 = vmax.f32 %v444_v60, %v476_v7  ;;  %v445_v19 = vadd.f32 %v1643_v26, %v360_v9  ;;  %v446_v20 = vadd.f32 %v1651_v29, %v360_v9 }
  0x97   : > { %v493_v21 = vmul.f32 0.2, %v461_v16  ;;  %v1714_v52 = vadd.f32 %v523_v13, %v286_v32  ;;  %v494_v57 = vmul.f32 0.2, %v462_v18  ;;  %v1726_v32 = vadd.f32 %v524_v14, %v287_v35 }
  0x98   : > { %v1712_v51 = vadd.f32 %v507_v15, %v270_v30  ;;  %v477_v58 = vmul.f32 0.2, %v445_v19  ;;  %v478_v59 = vmul.f32 0.2, %v446_v20  ;;  %v370_v3 = vpop.permute.xlu1 %369  ;;  %v1719_v60 = vadd.f32 %v508_v17, %v271_v31 }
  0x99   : > { %v365_v4 = vpop.permute.xlu0 %364  ;;  %v449_v5 = vadd.f32 %v1643_v26, %v370_v3  ;;  %v450_v7 = vadd.f32 %v1651_v29, %v370_v3  ;;  %v525_v8 = vmax.f32 %v461_v16, %v493_v21  ;;  %v526_v22 = vmax.f32 %v462_v18, %v494_v57 }
  0x9a   : > { %v447_v30 = vadd.f32 %v1643_v26, %v365_v4  ;;  %v509_v9 = vmax.f32 %v445_v19, %v477_v58  ;;  %v510_v13 = vmax.f32 %v446_v20, %v478_v59  ;;  %v448_v15 = vadd.f32 %v1651_v29, %v365_v4 }
  0x9b   : > { %v481_v31 = vmul.f32 0.2, %v449_v5  ;;  %v571_v11 = vmax.f32 %v1712_v51, %v1719_v60  ;;  %v482_v3 = vmul.f32 0.2, %v450_v7  ;;  %v595_v18 = vmax.f32 %v1714_v52, %v1726_v32 }
  0x9c   : > { %v479_v17 = vmul.f32 0.2, %v447_v30  ;;  %v480_v10 = vmul.f32 0.2, %v448_v15  ;;  %v410_v6 = vpop.permute.xlu1 %409  ;;  %v1736_v23 = vadd.f32 %v509_v9, %v272_v36  ;;  %v1740_v35 = vadd.f32 %v510_v13, %v273_v37 }
  0x9d   : > { %v405_v2 = vpop.permute.xlu0 %404  ;;  %v513_v14 = vmax.f32 %v449_v5, %v481_v31  ;;  %572 = vmax.xlane.f32.xlu0 %v571_v11  ;;  %v1743_v16 = vadd.f32 %v1643_v26, %v410_v6  ;;  %v298_v19 = vunpack.c.l.bf16 %v1730_v12  ;;  %v1749_v21 = vadd.f32 %v1651_v29, %v410_v6 }
  0x9e   : > { %v511_v20 = vmax.f32 %v447_v30, %v479_v17  ;;  %v463_v36 = vadd.f32 %v1643_v26, %v405_v2  ;;  %v464_v24 = vadd.f32 %v1651_v29, %v405_v2  ;;  %v574_v11 = vmax.f32 %v1736_v23, %v1740_v35 }
  0x9f   : > { %v1754_v37 = vmul.f32 0.2, %v1743_v16  ;;  %v1760_v57 = vadd.f32 %v525_v8, %v288_v38  ;;  %v1764_v58 = vadd.f32 %v526_v22, %v289_v41  ;;  %v514_v6 = vmax.f32 %v450_v7, %v482_v3 }
  0xa0   : > { %v512_v59 = vmax.f32 %v448_v15, %v480_v10  ;;  %v495_v4 = vmul.f32 0.2, %v463_v36  ;;  %v496_v5 = vmul.f32 0.2, %v464_v24  ;;  %v380_v30 = vpop.permute.xlu1 %379  ;;  %v498_v9 = vmul.f32 0.2, %v1749_v21  ;;  %575 = vmax.xlane.f32.xlu1 %v574_v11 }
  0xa1   : > { %v375_v2 = vpop.permute.xlu0 %374  ;;  %596 = vmax.xlane.f32.xlu0 %v595_v18  ;;  %v1768_v13 = vadd.f32 %v1643_v26, %v380_v30  ;;  %v1771_v38 = vadd.f32 %v1651_v29, %v380_v30  ;;  %v529_v41 = vmax.f32 %v1743_v16, %v1754_v37  ;;  %v1779_v8 = vadd.f32 %v511_v20, %v274_v42 }
  0xa2   : > { %v527_v10 = vmax.f32 %v463_v36, %v495_v4  ;;  %v451_v7 = vadd.f32 %v1643_v26, %v375_v2  ;;  %v528_v15 = vmax.f32 %v464_v24, %v496_v5  ;;  %v452_v31 = vadd.f32 %v1651_v29, %v375_v2 }
  0xa3   : > { %v1782_v22 = vmul.f32 0.2, %v1768_v13  ;;  %v598_v17 = vmax.f32 %v1760_v57, %v1764_v58  ;;  %v1789_v16 = vadd.f32 %v512_v59, %v275_v43  ;;  %v1793_v42 = vadd.f32 %v513_v14, %v276_v44 }
  0xa4   : > { %v483_v3 = vmul.f32 0.2, %v451_v7  ;;  %v420_v18 = vpop.permute.xlu1 %419  ;;  %v1797_v20 = vadd.f32 %v514_v6, %v277_v45  ;;  %v530_v24 = vmax.f32 %v1749_v21, %v498_v9  ;;  %v486_v37 = vmul.f32 0.2, %v1771_v38 }
  0xa5   : > { %v415_v36 = vpop.permute.xlu0 %414  ;;  %v484_v11 = vmul.f32 0.2, %v452_v31  ;;  %599 = vmax.xlane.f32.xlu0 %v598_v17  ;;  %v1802_v27 = vadd.f32 %v1643_v26, %v420_v18  ;;  %v517_v43 = vmax.f32 %v1768_v13, %v1782_v22  ;;  %v577_v44 = vmax.f32 %v1779_v8, %v1789_v16 }
  0xa6   : > { %v1809_v14 = vadd.f32 %v1651_v29, %v420_v18  ;;  %v467_v28 = vadd.f32 %v1643_v26, %v415_v36  ;;  %v515_v45 = vmax.f32 %v451_v7, %v483_v3  ;;  %v468_v6 = vadd.f32 %v1651_v29, %v415_v36 }
  0xa7   : > { %v501_v21 = vmul.f32 0.2, %v1802_v27  ;;  %v580_v59 = vmax.f32 %v1793_v42, %v1797_v20  ;;  %578 = vmax.xlane.f32.xlu1 %v577_v44  ;;  %v1819_v30 = vadd.f32 %v527_v10, %v290_v46  ;;  %v1823_v2 = vadd.f32 %v528_v15, %v291_v47 }
  0xa8   : > { %v502_v4 = vmul.f32 0.2, %v1809_v14  ;;  %v499_v5 = vmul.f32 0.2, %v467_v28  ;;  %v390_v9 = vpop.permute.xlu1 %389  ;;  %v516_v7 = vmax.f32 %v452_v31, %v484_v11  ;;  %v500_v22 = vmul.f32 0.2, %v468_v6 }
  0xa9   : > { %v385_v13 = vpop.permute.xlu0 %384  ;;  %581 = vmax.xlane.f32.xlu0 %v580_v59  ;;  %v457_v17 = vadd.f32 %v1643_v26, %v390_v9  ;;  %v458_v3 = vadd.f32 %v1651_v29, %v390_v9  ;;  %v518_v18 = vmax.f32 %v1771_v38, %v486_v37  ;;  %v533_v36 = vmax.f32 %v1802_v27, %v501_v21 }
  0xaa   : > { %v601_v46 = vmax.f32 %v1819_v30, %v1823_v2  ;;  %v455_v33 = vadd.f32 %v1643_v26, %v385_v13  ;;  %v534_v47 = vmax.f32 %v1809_v14, %v502_v4  ;;  %v531_v10 = vmax.f32 %v467_v28, %v499_v5 }
  0xab   : > { %v532_v15 = vmax.f32 %v468_v6, %v500_v22  ;;  %v456_v31 = vadd.f32 %v1651_v29, %v385_v13  ;;  %v1836_v44 = vadd.f32 %v529_v41, %v292_v48  ;;  %v1840_v38 = vadd.f32 %v530_v24, %v293_v53 }
  0xac   : > { %602 = vmax.xlane.f32.xlu1 %v601_v46  ;;  %v487_v11 = vmul.f32 0.2, %v455_v33  ;;  %v1844_v37 = vadd.f32 %v515_v45, %v278_v54  ;;  %v430_v27 = vpop.permute.xlu1 %429  ;;  %v489_v28 = vmul.f32 0.2, %v457_v17  ;;  %v490_v21 = vmul.f32 0.2, %v458_v3 }
  0xad   : > { %v425_v14 = vpop.permute.xlu0 %424  ;;  %v488_v6 = vmul.f32 0.2, %v456_v31  ;;  %v1848_v59 = vadd.f32 %v516_v7, %v279_v55  ;;  %v604_v48 = vmax.f32 %v1836_v44, %v1840_v38  ;;  %v473_v34 = vadd.f32 %v1643_v26, %v430_v27 }
  0xae   : > { %v519_v4 = vmax.f32 %v455_v33, %v487_v11  ;;  %v474_v53 = vadd.f32 %v1651_v29, %v430_v27  ;;  %v471_v24 = vadd.f32 %v1643_v26, %v425_v14  ;;  %v472_v45 = vadd.f32 %v1651_v29, %v425_v14  ;;  %v269_v29 = vld [vmem:[%s1626_s27 + $0x78] sm:$0xff] }
  0xaf   : > { %v520_v54 = vmax.f32 %v456_v31, %v488_v6  ;;  %v583_v41 = vmax.f32 %v1844_v37, %v1848_v59  ;;  %605 = vmax.xlane.f32.xlu0 %v604_v48  ;;  %v505_v39 = vmul.f32 0.2, %v473_v34  ;;  %v1860_v5 = vadd.f32 %v517_v43, %v280_v56 }
  0xb0   : > { %v506_v55 = vmul.f32 0.2, %v474_v53  ;;  %v1864_v9 = vadd.f32 %v518_v18, %v281_v63  ;;  %v503_v13 = vmul.f32 0.2, %v471_v24  ;;  %v504_v7 = vmul.f32 0.2, %v472_v45 }
  0xb1   : > { %584 = vmax.xlane.f32.xlu1 %v583_v41  ;;  %v1868_v22 = vadd.f32 %v531_v10, %v294_v0  ;;  %v1872_v26 = vadd.f32 %v532_v15, %v295_v1  ;;  %v521_v46 = vmax.f32 %v457_v17, %v489_v28  ;;  %v522_v33 = vmax.f32 %v458_v3, %v490_v21  ;;  %v1396_v41 = vld [vmem:[%s2307_s0 + $0x8] sm:$0xff]  }
  0xb2   : > { %v586_v56 = vmax.f32 %v1860_v5, %v1864_v9  ;;  %v1879_v63 = vadd.f32 %v533_v36, %v2313_v40  ;;  %v535_v43 = vmax.f32 %v471_v24, %v503_v13  ;;  %v536_v18 = vmax.f32 %v472_v45, %v504_v7  ;;  %v1397_v24 = vld [vmem:[%s2307_s0 + $0x50] sm:$0xff]  }
  0xb3   : > { %v607_v0 = vmax.f32 %v1868_v22, %v1872_v26  ;;  %v2314_v10 = vunpack.c.h.bf16 %v1684_v50  ;;  %v2315_v1 = vunpack.c.l.bf16 %v1695_v61  ;;  %v2316_v3 = vunpack.c.h.bf16 %v1695_v61  ;;  %v1398_v45 = vld [vmem:[%s2307_s0 + $0x10] sm:$0xff]  }
  0xb4   : > { %587 = vmax.xlane.f32.xlu0 %v586_v56  ;;  %v300_v36 = vunpack.c.l.bf16 %v269_v29  ;;  %v301_v31 = vunpack.c.h.bf16 %v269_v29  ;;  %v537_v11 = vmax.f32 %v473_v34, %v505_v39  ;;  %v538_v27 = vmax.f32 %v474_v53, %v506_v55  ;;  %v1394_v53 = vld [vmem:[%s2307_s0] sm:$0xff]  }
  0xb5   : > { %v1885_v49 = vadd.f32 %v534_v47, %v2314_v10  ;;  %v1889_v17 = vadd.f32 %v519_v4, %v2315_v1  ;;  %v1893_v15 = vadd.f32 %v520_v54, %v2316_v3  ;;  %608 = vmax.xlane.f32.xlu1 %v607_v0  ;;  %v1897_v14 = vadd.f32 %v535_v43, %v298_v19  ;;  %v1395_v54 = vld [vmem:[%s2307_s0 + $0x48] sm:$0xff]  }
  0xb6   : > { %v1901_v50 = vadd.f32 %v536_v18, %v299_v25  ;;  %v2317_v28 = vunpack.c.l.bf16 %v1698_v62  ;;  %v2318_v6 = vunpack.c.h.bf16 %v1698_v62  ;;  %v1919_v25 = vadd.f32 %v537_v11, %v300_v36  ;;  %v1393_v62 = vld [vmem:[%s2307_s0 + $0x40] sm:$0xff]  }
  0xb7   : > { %v610_v47 = vmax.f32 %v1879_v63, %v1885_v49  ;;  %v589_v61 = vmax.f32 %v1889_v17, %v1893_v15  ;;  %v1921_v48 = vadd.f32 %v538_v27, %v301_v31  ;;  %1302 = vmatprep.subr.bf16.mxu0 %v1393_v62  ;;  %1366 = vmatprep.subr.bf16.mxu1 %v1393_v62 }
  0xb8   : > { %v1909_v21 = vadd.f32 %v521_v46, %v2317_v28  ;;  %v1913_v4 = vadd.f32 %v522_v33, %v2318_v6  ;;  %v613_v12 = vmax.f32 %v1897_v14, %v1901_v50  ;;  %1303 = vmatpush3.bf16.msra.mxu0 %v1394_v53  ;;  %1374 = vmatpush3.bf16.msra.mxu1 %v1394_v53 }
  0xb9   : > { %611 = vmax.xlane.f32.xlu0 %v610_v47  ;;  %590 = vmax.xlane.f32.xlu1 %v589_v61  ;;  %v616_v34 = vmax.f32 %v1919_v25, %v1921_v48 }
  0xba   : > { %v592_v19 = vmax.f32 %v1909_v21, %v1913_v4  ;;  %1304 = vmatprep.subr.bf16.mxu0 %v1395_v54  ;;  %1367 = vmatprep.subr.bf16.mxu1 %v1395_v54 }
  0xbc   : > { %1305 = vmatpush3.bf16.msra.mxu0 %v1396_v41  ;;  %1375 = vmatpush3.bf16.msra.mxu1 %v1396_v41 }
  0xbd   : > { %593 = vmax.xlane.f32.xlu0 %v592_v19  ;;  %614 = vmax.xlane.f32.xlu1 %v613_v12 }
  0xbe   : > { %1306 = vmatprep.subr.bf16.mxu0 %v1397_v24  ;;  %1368 = vmatprep.subr.bf16.mxu1 %v1397_v24 }
  0xc0   : > { %1307 = vmatpush3.bf16.msra.mxu0 %v1398_v45  ;;  %1376 = vmatpush3.bf16.msra.mxu1 %v1398_v45 }
  0xc1   : > { %617 = vmax.xlane.f32.xlu0 %v616_v34 }
 0x12a   : > { %v573_v39 = vpop.xlane.xlu0 %572 }
 0x12b   : > { %v619_v55 = vsub.f32 %v1712_v51, %v573_v39  ;;  %v620_v13 = vsub.f32 %v1719_v60, %v573_v39 }
 0x12d   : > { %v651_v7 = vmul.f32 1.442695, %v619_v55  ;;  %v653_v29 = vmul.f32 1.442695, %v620_v13  ;;  %v576_v46 = vpop.xlane.xlu1 %575 }
 0x12e   : > { %v597_v33 = vpop.xlane.xlu0 %596  ;;  %v621_v56 = vsub.f32 %v1736_v23, %v576_v46  ;;  %v622_v40 = vsub.f32 %v1740_v35, %v576_v46 }
 0x12f   : > { %1409 = vpow2.f32 %v651_v7  ;;  %v635_v43 = vsub.f32 %v1714_v52, %v597_v33  ;;  %v636_v18 = vsub.f32 %v1726_v32, %v597_v33 }
 0x130   : > { %1411 = vpow2.f32 %v653_v29  ;;  %v655_v0 = vmul.f32 1.442695, %v621_v56  ;;  %v657_v10 = vmul.f32 1.442695, %v622_v40 }
 0x131   : > { %v683_v1 = vmul.f32 1.442695, %v635_v43  ;;  %v685_v51 = vmul.f32 1.442695, %v636_v18 }
 0x132   : > { %v600_v3 = vpop.xlane.xlu0 %599  ;;  %1413 = vpow2.f32 %v655_v0 }
 0x133   : > { %v637_v60 = vsub.f32 %v1760_v57, %v600_v3  ;;  %v638_v36 = vsub.f32 %v1764_v58, %v600_v3  ;;  %1415 = vpow2.f32 %v657_v10 }
 0x134   : > { %1417 = vpow2.f32 %v683_v1  ;;  %v579_v23 = vpop.xlane.xlu1 %578 }
 0x135   : > { %v687_v31 = vmul.f32 1.442695, %v637_v60  ;;  %v689_v35 = vmul.f32 1.442695, %v638_v36  ;;  %1419 = vpow2.f32 %v685_v51  ;;  %v623_v52 = vsub.f32 %v1779_v8, %v579_v23 }
 0x136   : > { %v624_v32 = vsub.f32 %v1789_v16, %v579_v23  ;;  %v582_v11 = vpop.xlane.xlu0 %581 }
 0x137   : > { %1421 = vpow2.f32 %v687_v31  ;;  %v625_v27 = vsub.f32 %v1793_v42, %v582_v11  ;;  %v626_v47 = vsub.f32 %v1797_v20, %v582_v11  ;;  %v659_v61 = vmul.f32 1.442695, %v623_v52 }
 0x138   : > { %v661_v57 = vmul.f32 1.442695, %v624_v32  ;;  %1423 = vpow2.f32 %v689_v35 }
 0x139   : > { %v1955_v58 = vpop.eup %1409  ;;  %v603_v28 = vpop.xlane.xlu1 %602  ;;  %v663_v6 = vmul.f32 1.442695, %v625_v27  ;;  %v665_v12 = vmul.f32 1.442695, %v626_v47  ;;  %1425 = vpow2.f32 %v659_v61 }
 0x13a   : > { %v1957_v19 = vpop.eup %1411  ;;  %v639_v8 = vsub.f32 %v1819_v30, %v603_v28  ;;  %v640_v16 = vsub.f32 %v1823_v2, %v603_v28  ;;  %1427 = vpow2.f32 %v661_v57 }
 0x13b   : > { %v715_v42 = vadd.f32 %v1957_v19, %v1955_v58  ;;  %1429 = vpow2.f32 %v663_v6 }
 0x13c   : > { %v691_v20 = vmul.f32 1.442695, %v639_v8  ;;  %v693_v34 = vmul.f32 1.442695, %v640_v16  ;;  %v1963_v62 = vpop.eup %1413  ;;  %1431 = vpow2.f32 %v665_v12  ;;  %v606_v53 = vpop.xlane.xlu0 %605 }
 0x13d   : > { %716 = vadd.xlane.f32.xlu1 %v715_v42  ;;  %v1965_v54 = vpop.eup %1415  ;;  %v641_v30 = vsub.f32 %v1836_v44, %v606_v53  ;;  %v642_v2 = vsub.f32 %v1840_v38, %v606_v53 }
 0x13e   : > { %1433 = vpow2.f32 %v691_v20  ;;  %v585_v41 = vpop.xlane.xlu1 %584  ;;  %v1969_v24 = vpop.eup %1417  ;;  %v718_v55 = vadd.f32 %v1965_v54, %v1963_v62  ;;  %v1399_v20 = vld [vmem:[%s2307_s0 + $0x58] sm:$0xff]  }
 0x13f   : > { %1435 = vpow2.f32 %v693_v34  ;;  %v627_v45 = vsub.f32 %v1844_v37, %v585_v41  ;;  %v628_v39 = vsub.f32 %v1848_v59, %v585_v41  ;;  %v1975_v13 = vpop.eup %1419  ;;  %v695_v7 = vmul.f32 1.442695, %v641_v30  ;;  %v1400_v34 = vld [vmem:[%s2307_s0 + $0x18] sm:$0xff]   ;;  %1308 = vmatprep.subr.bf16.mxu0 %v1399_v20  ;;  %1369 = vmatprep.subr.bf16.mxu1 %v1399_v20 }
 0x140   : > { %v697_v44 = vmul.f32 1.442695, %v642_v2  ;;  %719 = vadd.xlane.f32.xlu0 %v718_v55  ;;  %v739_v38 = vadd.f32 %v1975_v13, %v1969_v24  ;;  %1309 = vmatpush3.bf16.msra.mxu0 %v1400_v34 }
 0x141   : > { %v1977_v29 = vpop.eup %1421  ;;  %v667_v46 = vmul.f32 1.442695, %v627_v45  ;;  %v669_v33 = vmul.f32 1.442695, %v628_v39  ;;  %v588_v56 = vpop.xlane.xlu0 %587  ;;  %1437 = vpow2.f32 %v695_v7  ;;  %1377 = vmatpush3.bf16.msra.mxu1 %v1400_v34 }
 0x142   : > { %v1981_v40 = vpop.eup %1423  ;;  %v609_v37 = vpop.xlane.xlu1 %608  ;;  %v629_v59 = vsub.f32 %v1860_v5, %v588_v56  ;;  %v630_v43 = vsub.f32 %v1864_v9, %v588_v56  ;;  %740 = vadd.xlane.f32.xlu1 %v739_v38 }
 0x143   : > { %1439 = vpow2.f32 %v667_v46  ;;  %v643_v18 = vsub.f32 %v1868_v22, %v609_v37  ;;  %v644_v0 = vsub.f32 %v1872_v26, %v609_v37  ;;  %v742_v10 = vadd.f32 %v1981_v40, %v1977_v29  ;;  %v1989_v1 = vpop.eup %1425 }
 0x144   : > { %1441 = vpow2.f32 %v669_v33  ;;  %v671_v51 = vmul.f32 1.442695, %v629_v59  ;;  %v1991_v3 = vpop.eup %1427  ;;  %v673_v36 = vmul.f32 1.442695, %v630_v43 }
 0x145   : > { %1443 = vpow2.f32 %v697_v44  ;;  %v699_v60 = vmul.f32 1.442695, %v643_v18  ;;  %v701_v5 = vmul.f32 1.442695, %v644_v0  ;;  %743 = vadd.xlane.f32.xlu0 %v742_v10  ;;  %v1993_v23 = vpop.eup %1429  ;;  %v721_v35 = vadd.f32 %v1991_v3, %v1989_v1 }
 0x146   : > { %v612_v9 = vpop.xlane.xlu0 %611  ;;  %1445 = vpow2.f32 %v671_v51  ;;  %v591_v22 = vpop.xlane.xlu1 %590 }
 0x147   : > { %v645_v26 = vsub.f32 %v1879_v63, %v612_v9  ;;  %v646_v31 = vsub.f32 %v1885_v49, %v612_v9  ;;  %v1999_v52 = vpop.eup %1431  ;;  %1447 = vpow2.f32 %v699_v60  ;;  %v631_v32 = vsub.f32 %v1889_v17, %v591_v22  ;;  %722 = vadd.xlane.f32.xlu1 %v721_v35  ;;  %v1403_v60 = vld [vmem:[%s2307_s0 + $0x68] sm:$0xff]  }
 0x148   : > { %v632_v11 = vsub.f32 %v1893_v15, %v591_v22  ;;  %v2003_v27 = vpop.eup %1433  ;;  %1449 = vpow2.f32 %v701_v5  ;;  %v724_v63 = vadd.f32 %v1999_v52, %v1993_v23  ;;  %v1404_v5 = vld [vmem:[%s2307_s0 + $0x28] sm:$0xff]  }
 0x149   : > { %v703_v47 = vmul.f32 1.442695, %v645_v26  ;;  %v2007_v61 = vpop.eup %1435  ;;  %1451 = vpow2.f32 %v673_v36  ;;  %v675_v49 = vmul.f32 1.442695, %v631_v32  ;;  %v705_v28 = vmul.f32 1.442695, %v646_v31 }
 0x14a   : > { %v677_v57 = vmul.f32 1.442695, %v632_v11  ;;  %v594_v6 = vpop.xlane.xlu0 %593  ;;  %v615_v12 = vpop.xlane.xlu1 %614  ;;  %v745_v8 = vadd.f32 %v2007_v61, %v2003_v27  ;;  %725 = vadd.xlane.f32.xlu0 %v724_v63  ;;  %v1405_v32 = vld [vmem:[%s2307_s0 + $0x70] sm:$0xff]  }
 0x14b   : > { %1453 = vpow2.f32 %v703_v47  ;;  %v633_v17 = vsub.f32 %v1909_v21, %v594_v6  ;;  %v634_v15 = vsub.f32 %v1913_v4, %v594_v6  ;;  %v647_v16 = vsub.f32 %v1897_v14, %v615_v12  ;;  %v2021_v21 = vpop.eup %1437  ;;  %v1406_v11 = vld [vmem:[%s2307_s0 + $0x30] sm:$0xff]  }
 0x14c   : > { %1455 = vpow2.f32 %v675_v49  ;;  %v648_v42 = vsub.f32 %v1901_v50, %v615_v12  ;;  %746 = vadd.xlane.f32.xlu1 %v745_v8  ;;  %v1407_v12 = vld [vmem:[%s2307_s0 + $0x78] sm:$0xff]  }
 0x14d   : > { %1457 = vpow2.f32 %v677_v57  ;;  %v679_v4 = vmul.f32 1.442695, %v633_v17  ;;  %v2023_v53 = vpop.eup %1439  ;;  %v707_v41 = vmul.f32 1.442695, %v647_v16  ;;  %v681_v30 = vmul.f32 1.442695, %v634_v15 }
 0x14e   : > { %1459 = vpow2.f32 %v705_v28  ;;  %v709_v14 = vmul.f32 1.442695, %v648_v42  ;;  %v618_v50 = vpop.xlane.xlu0 %617  ;;  %v2025_v2 = vpop.eup %1441  ;;  %v1408_v17 = vld [vmem:[%s2307_s0 + $0x38] sm:$0xff]  }
 0x14f   : > { %1461 = vpow2.f32 %v679_v4  ;;  %v649_v45 = vsub.f32 %v1919_v25, %v618_v50  ;;  %v650_v39 = vsub.f32 %v1921_v48, %v618_v50  ;;  %v2029_v55 = vpop.eup %1443  ;;  %v727_v7 = vadd.f32 %v2025_v2, %v2023_v53  ;;  %v1401_v25 = vld [vmem:[%s2307_s0 + $0x60] sm:$0xff]  }
 0x150   : > { %1463 = vpow2.f32 %v707_v41  ;;  %v2033_v46 = vpop.eup %1445  ;;  %v748_v56 = vadd.f32 %v2029_v55, %v2021_v21  ;;  %v1402_v48 = vld [vmem:[%s2307_s0 + $0x20] sm:$0xff]   ;;  %1310 = vmatprep.subr.bf16.mxu0 %v1401_v25  ;;  %1370 = vmatprep.subr.bf16.mxu1 %v1401_v25 }
 0x151   : > { %1465 = vpow2.f32 %v709_v14  ;;  %v711_v33 = vmul.f32 1.442695, %v649_v45  ;;  %v713_v44 = vmul.f32 1.442695, %v650_v39  ;;  %v2037_v38 = vpop.eup %1447  ;;  %728 = vadd.xlane.f32.xlu1 %v727_v7  ;;  %1311 = vmatpush3.bf16.msra.mxu0 %v1402_v48 }
 0x152   : > { %1467 = vpow2.f32 %v681_v30  ;;  %v2045_v37 = vpop.eup %1449  ;;  %749 = vadd.xlane.f32.xlu0 %v748_v56  ;;  %1378 = vmatpush3.bf16.msra.mxu1 %v1402_v48 }
 0x153   : > { %1469 = vpow2.f32 %v711_v33  ;;  %v2047_v59 = vpop.eup %1451  ;;  %v751_v43 = vadd.f32 %v2045_v37, %v2037_v38  ;;  %1312 = vmatprep.subr.bf16.mxu0 %v1403_v60  ;;  %1371 = vmatprep.subr.bf16.mxu1 %v1403_v60 }
 0x154   : > { %1471 = vpow2.f32 %v713_v44  ;;  %v730_v0 = vadd.f32 %v2047_v59, %v2033_v46 }
 0x155   : > { %v2051_v18 = vpop.eup %1453  ;;  %752 = vadd.xlane.f32.xlu1 %v751_v43  ;;  %1313 = vmatpush3.bf16.msra.mxu0 %v1404_v5 }
 0x156   : > { %v2055_v10 = vpop.eup %1455  ;;  %731 = vadd.xlane.f32.xlu0 %v730_v0  ;;  %1379 = vmatpush3.bf16.msra.mxu1 %v1404_v5 }
 0x157   : > { %v2057_v51 = vpop.eup %1457  ;;  %1314 = vmatprep.subr.bf16.mxu0 %v1405_v32  ;;  %1372 = vmatprep.subr.bf16.mxu1 %v1405_v32 }
 0x158   : > { %v2065_v36 = vpop.eup %1459  ;;  %v733_v9 = vadd.f32 %v2057_v51, %v2055_v10 }
 0x159   : > { %v2069_v22 = vpop.eup %1461  ;;  %v754_v26 = vadd.f32 %v2065_v36, %v2051_v18  ;;  %1315 = vmatpush3.bf16.msra.mxu0 %v1406_v11 }
 0x15a   : > { %v2073_v31 = vpop.eup %1463  ;;  %734 = vadd.xlane.f32.xlu1 %v733_v9  ;;  %1380 = vmatpush3.bf16.msra.mxu1 %v1406_v11 }
 0x15b   : > { %v2075_v35 = vpop.eup %1465  ;;  %755 = vadd.xlane.f32.xlu0 %v754_v26  ;;  %1316 = vmatprep.subr.bf16.mxu0 %v1407_v12 }
 0x15c   : > { %v2083_v47 = vpop.eup %1467  ;;  %v757_v63 = vadd.f32 %v2075_v35, %v2073_v31  ;;  %1373 = vmatprep.subr.bf16.mxu1 %v1407_v12 }
 0x15d   : > { %v2087_v49 = vpop.eup %1469  ;;  %v736_v57 = vadd.f32 %v2083_v47, %v2069_v22  ;;  %1317 = vmatpush3.bf16.msra.mxu0 %v1408_v17 }
 0x15e   : > { %v2091_v28 = vpop.eup %1471  ;;  %758 = vadd.xlane.f32.xlu1 %v757_v63  ;;  %1381 = vmatpush3.bf16.msra.mxu1 %v1408_v17 }
 0x15f   : > { %737 = vadd.xlane.f32.xlu0 %v736_v57  ;;  %v760_v6 = vadd.f32 %v2091_v28, %v2087_v49 }
 0x163   : > { %761 = vadd.xlane.f32.xlu0 %v760_v6 }
 0x1ca   : > { %v717_v15 = vpop.xlane.xlu1 %716 }
 0x1cb   : > { %1473 = vrcp.f32 %v717_v15 }
 0x1cd   : > { %v720_v8 = vpop.xlane.xlu0 %719 }
 0x1ce   : > { %1475 = vrcp.f32 %v720_v8 }
 0x1cf   : > { %v741_v16 = vpop.xlane.xlu1 %740 }
 0x1d0   : > { %1477 = vrcp.f32 %v741_v16 }
 0x1d2   : > { %v744_v42 = vpop.xlane.xlu0 %743 }
 0x1d3   : > { %1479 = vrcp.f32 %v744_v42 }
 0x1d4   : > { %v723_v20 = vpop.xlane.xlu1 %722 }
 0x1d5   : > { %1481 = vrcp.f32 %v723_v20  ;;  %v1474_v34 = vpop.eup %1473 }
 0x1d6   : > { %v780_v30 = vmul.f32 %v1474_v34, %v1957_v19  ;;  %v779_v45 = vmul.f32 %v1474_v34, %v1955_v58 }
 0x1d7   : > { %v726_v4 = vpop.xlane.xlu0 %725 }
 0x1d8   : > { %1483 = vrcp.f32 %v726_v4  ;;  %v1476_v41 = vpop.eup %1475 }
 0x1d9   : > { %v747_v14 = vpop.xlane.xlu1 %746  ;;  %v782_v50 = vmul.f32 %v1476_v41, %v1965_v54  ;;  %v781_v39 = vmul.f32 %v1476_v41, %v1963_v62 }
 0x1da   : > { %v1478_v7 = vpop.eup %1477  ;;  %1485 = vrcp.f32 %v747_v14 }
 0x1db   : > { %v812_v33 = vpack.c.bf16 %v782_v50, %v780_v30  ;;  %v811_v44 = vpack.c.bf16 %v781_v39, %v779_v45  ;;  %v796_v48 = vmul.f32 %v1478_v7, %v1975_v13  ;;  %v795_v0 = vmul.f32 %v1478_v7, %v1969_v24 }
 0x1dd   : > { %v1480_v56 = vpop.eup %1479  ;;  %961 = vmatprep.mubr.bf16.mxu0 %v812_v33 }
 0x1de   : > { %v729_v25 = vpop.xlane.xlu1 %728  ;;  %v798_v43 = vmul.f32 %v1480_v56, %v1981_v40  ;;  %v797_v19 = vmul.f32 %v1480_v56, %v1977_v29  ;;  %962 = vmatmul.mubr.bf16.vlgmr.msra.gmra.mrb[0].mxu0 %v811_v44 }
 0x1df   : > { %v750_v54 = vpop.xlane.xlu0 %749  ;;  %v1482_v58 = vpop.eup %1481 }
 0x1e0   : > { %1487 = vrcp.f32 %v750_v54  ;;  %v820_v62 = vpack.c.bf16 %v798_v43, %v796_v48  ;;  %v819_v60 = vpack.c.bf16 %v797_v19, %v795_v0  ;;  %v784_v13 = vmul.f32 %v1482_v58, %v1991_v3  ;;  %v2136_v54 = vld [vmem:[%s2311_s4] ss:$0 sm:$0xff] }
 0x1e1   : > { %1489 = vrcp.f32 %v729_v25  ;;  %v783_v24 = vmul.f32 %v1482_v58, %v1989_v1 }
 0x1e2   : > { %v1484_v5 = vpop.eup %1483  ;;  %v753_v9 = vpop.xlane.xlu1 %752  ;;  %993 = vmatprep.mubr.bf16.mxu1 %v820_v62 }
 0x1e3   : > { %v732_v26 = vpop.xlane.xlu0 %731  ;;  %994 = vmatmul.mubr.bf16.vlgmr.msra.gmra.mrb[0].mxu1 %v819_v60  ;;  %v786_v40 = vmul.f32 %v1484_v5, %v1999_v52  ;;  %v785_v29 = vmul.f32 %v1484_v5, %v1993_v23 }
 0x1e4   : > { %1491 = vrcp.f32 %v732_v26  ;;  %v1486_v57 = vpop.eup %1485 }
 0x1e5   : > { %v814_v32 = vpack.c.bf16 %v786_v40, %v784_v13  ;;  %v813_v11 = vpack.c.bf16 %v785_v29, %v783_v24  ;;  %1493 = vrcp.f32 %v753_v9  ;;  %v800_v52 = vmul.f32 %v1486_v57, %v2007_v61 }
 0x1e6   : > { %v799_v23 = vmul.f32 %v1486_v57, %v2003_v27 }
 0x1e7   : > { %v735_v63 = vpop.xlane.xlu1 %734  ;;  %969 = vmatprep.mubr.bf16.mxu0 %v814_v32 }
 0x1e8   : > { %v756_v6 = vpop.xlane.xlu0 %755  ;;  %970 = vmatmul.mubr.bf16.gmra.mrb[4].mxu0 %v813_v11 }
 0x1e9   : > { %1495 = vrcp.f32 %v756_v6 }
 0x1ea   : > { %v1488_v12 = vpop.eup %1487  ;;  %1497 = vrcp.f32 %v735_v63 }
 0x1eb   : > { %v759_v17 = vpop.xlane.xlu1 %758  ;;  %v802_v1 = vmul.f32 %v1488_v12, %v2029_v55  ;;  %v801_v15 = vmul.f32 %v1488_v12, %v2021_v21  ;;  %v1490_v8 = vpop.eup %1489 }
 0x1ec   : > { %v738_v3 = vpop.xlane.xlu0 %737  ;;  %v788_v4 = vmul.f32 %v1490_v8, %v2025_v2  ;;  %v787_v61 = vmul.f32 %v1490_v8, %v2023_v53 }
 0x1ed   : > { %1499 = vrcp.f32 %v738_v3  ;;  %v822_v16 = vpack.c.bf16 %v802_v1, %v800_v52  ;;  %v821_v42 = vpack.c.bf16 %v801_v15, %v799_v23 }
 0x1ee   : > { %v1492_v20 = vpop.eup %1491  ;;  %1501 = vrcp.f32 %v759_v17 }
 0x1ef   : > { %1001 = vmatprep.mubr.bf16.mxu1 %v822_v16  ;;  %v790_v41 = vmul.f32 %v1492_v20, %v2047_v59  ;;  %v789_v55 = vmul.f32 %v1492_v20, %v2033_v46  ;;  %v1494_v14 = vpop.eup %1493 }
 0x1f0   : > { %v762_v34 = vpop.xlane.xlu0 %761  ;;  %1002 = vmatmul.mubr.bf16.gmra.mrb[4].mxu1 %v821_v42  ;;  %v804_v50 = vmul.f32 %v1494_v14, %v2045_v37  ;;  %v803_v39 = vmul.f32 %v1494_v14, %v2037_v38 }
 0x1f1   : > { %1503 = vrcp.f32 %v762_v34  ;;  %v816_v27 = vpack.c.bf16 %v790_v41, %v788_v4  ;;  %v815_v21 = vpack.c.bf16 %v789_v55, %v787_v61 }
 0x1f3   : > { %v1496_v30 = vpop.eup %1495  ;;  %977 = vmatprep.mubr.bf16.mxu0 %v816_v27 }
 0x1f4   : > { %v806_v45 = vmul.f32 %v1496_v30, %v2065_v36  ;;  %v805_v2 = vmul.f32 %v1496_v30, %v2051_v18  ;;  %v1498_v59 = vpop.eup %1497  ;;  %978 = vmatmul.mubr.bf16.gmra.mrb[8].mxu0 %v815_v21 }
 0x1f5   : > { %v792_v33 = vmul.f32 %v1498_v59, %v2057_v51  ;;  %v791_v56 = vmul.f32 %v1498_v59, %v2055_v10 }
 0x1f6   : > { %v824_v53 = vpack.c.bf16 %v806_v45, %v804_v50  ;;  %v823_v7 = vpack.c.bf16 %v805_v2, %v803_v39 }
 0x1f7   : > { %v1500_v46 = vpop.eup %1499 }
 0x1f8   : > { %1009 = vmatprep.mubr.bf16.mxu1 %v824_v53  ;;  %v794_v44 = vmul.f32 %v1500_v46, %v2083_v47  ;;  %v793_v37 = vmul.f32 %v1500_v46, %v2069_v22  ;;  %v1502_v25 = vpop.eup %1501 }
 0x1f9   : > { %1010 = vmatmul.mubr.bf16.gmra.mrb[8].mxu1 %v823_v7  ;;  %v808_v18 = vmul.f32 %v1502_v25, %v2075_v35  ;;  %v807_v0 = vmul.f32 %v1502_v25, %v2073_v31 }
 0x1fa   : > { %v818_v36 = vpack.c.bf16 %v794_v44, %v792_v33  ;;  %v817_v38 = vpack.c.bf16 %v793_v37, %v791_v56 }
 0x1fb   : > { %v1504_v48 = vpop.eup %1503 }
 0x1fc   : > { %985 = vmatprep.mubr.bf16.mxu0 %v818_v36  ;;  %v810_v43 = vmul.f32 %v1504_v48, %v2091_v28  ;;  %v809_v51 = vmul.f32 %v1504_v48, %v2087_v49 }
 0x1fd   : > { %986 = vmatmul.mubr.bf16.gmra.mrb[12].mxu0 %v817_v38 }
 0x1fe   : > { %v826_v47 = vpack.c.bf16 %v810_v43, %v808_v18  ;;  %v825_v19 = vpack.c.bf16 %v809_v51, %v807_v0 }
 0x200   : > { %1017 = vmatprep.mubr.bf16.mxu1 %v826_v47 }
 0x201   : > { %1018 = vmatmul.mubr.bf16.gmra.mrb[12].mxu1 %v825_v19 }
 0x2b1   : > { %v1318_v10 = vpop.f32.mrb[0].mxu0 }
 0x2b2   : > { %v1319_v22 = vpop.f32.mrb[1].mxu0 }
 0x2b3   : > { %v1320_v58 = vadd.f32 %v1319_v22, %v1318_v10  ;;  %v1321_v35 = vpop.f32.mrb[2].mxu0 }
 0x2b4   : > { %v1322_v62 = vpop.f32.mrb[3].mxu0 }
 0x2b5   : > { %v1323_v28 = vadd.f32 %v1322_v62, %v1321_v35  ;;  %v2139_v31 = vadd.f32 %v1320_v58, %v2136_v54 }
 0x2b6   : > { %v1342_v60 = vpop.f32.mrb[0].mxu1 }
 0x2b7   : > { %v1343_v49 = vpop.f32.mrb[1].mxu1  ;;  %1026 = vmax.xlane.f32.xlu1 %v2139_v31  ;;  %v2143_v26 = vadd.f32 %v1323_v28, %v2136_v54 }
 0x2b8   : > { %v1344_v5 = vadd.f32 %v1343_v49, %v1342_v60  ;;  %v1345_v9 = vpop.f32.mrb[2].mxu1 }
 0x2b9   : > { %v1346_v13 = vpop.f32.mrb[3].mxu1  ;;  %1028 = vmax.xlane.f32.xlu0 %v2143_v26 }
 0x2ba   : > { %v1347_v40 = vadd.f32 %v1346_v13, %v1345_v9  ;;  %v2147_v24 = vadd.f32 %v1344_v5, %v2136_v54 }
 0x2bb   : > { %v1324_v29 = vpop.f32.mrb[4].mxu0 }
 0x2bc   : > { %v1325_v32 = vpop.f32.mrb[5].mxu0  ;;  %1042 = vmax.xlane.f32.xlu1 %v2147_v24  ;;  %v2151_v11 = vadd.f32 %v1347_v40, %v2136_v54 }
 0x2bd   : > { %v1326_v63 = vadd.f32 %v1325_v32, %v1324_v29  ;;  %v1327_v57 = vpop.f32.mrb[6].mxu0 }
 0x2be   : > { %v1328_v6 = vpop.f32.mrb[7].mxu0  ;;  %1044 = vmax.xlane.f32.xlu0 %v2151_v11 }
 0x2bf   : > { %v1329_v12 = vadd.f32 %v1328_v6, %v1327_v57  ;;  %v2155_v17 = vadd.f32 %v1326_v63, %v2136_v54 }
 0x2c1   : > { %1030 = vmax.xlane.f32.xlu1 %v2155_v17  ;;  %v2159_v3 = vadd.f32 %v1329_v12, %v2136_v54 }
 0x2c3   : > { %v1348_v52 = vpop.f32.mrb[4].mxu1  ;;  %1032 = vmax.xlane.f32.xlu0 %v2159_v3 }
 0x2c4   : > { %v1349_v1 = vpop.f32.mrb[5].mxu1 }
 0x2c5   : > { %v1350_v23 = vadd.f32 %v1349_v1, %v1348_v52  ;;  %v1351_v15 = vpop.f32.mrb[6].mxu1 }
 0x2c6   : > { %v1352_v8 = vpop.f32.mrb[7].mxu1 }
 0x2c7   : > { %v1353_v16 = vadd.f32 %v1352_v8, %v1351_v15  ;;  %v1330_v42 = vpop.f32.mrb[8].mxu0  ;;  %v2163_v20 = vadd.f32 %v1350_v23, %v2136_v54 }
 0x2c8   : > { %v1331_v34 = vpop.f32.mrb[9].mxu0 }
 0x2c9   : > { %v1332_v4 = vadd.f32 %v1331_v34, %v1330_v42  ;;  %1046 = vmax.xlane.f32.xlu1 %v2163_v20  ;;  %v1333_v41 = vpop.f32.mrb[10].mxu0  ;;  %v2167_v61 = vadd.f32 %v1353_v16, %v2136_v54 }
 0x2ca   : > { %v1334_v55 = vpop.f32.mrb[11].mxu0 }
 0x2cb   : > { %v1335_v14 = vadd.f32 %v1334_v55, %v1333_v41  ;;  %1048 = vmax.xlane.f32.xlu0 %v2167_v61  ;;  %v2171_v21 = vadd.f32 %v1332_v4, %v2136_v54 }
 0x2cc   : > { %v1354_v27 = vpop.f32.mrb[8].mxu1 }
 0x2cd   : > { %v1355_v30 = vpop.f32.mrb[9].mxu1  ;;  %1034 = vmax.xlane.f32.xlu1 %v2171_v21  ;;  %v2175_v39 = vadd.f32 %v1335_v14, %v2136_v54 }
 0x2ce   : > { %v1356_v50 = vadd.f32 %v1355_v30, %v1354_v27  ;;  %v1357_v45 = vpop.f32.mrb[10].mxu1 }
 0x2cf   : > { %v1358_v2 = vpop.f32.mrb[11].mxu1  ;;  %1036 = vmax.xlane.f32.xlu0 %v2175_v39 }
 0x2d0   : > { %v1359_v59 = vadd.f32 %v1358_v2, %v1357_v45  ;;  %v1336_v53 = vpop.f32.mrb[12].mxu0  ;;  %v2179_v7 = vadd.f32 %v1356_v50, %v2136_v54 }
 0x2d1   : > { %v1337_v46 = vpop.f32.mrb[13].mxu0 }
 0x2d2   : > { %v1338_v33 = vadd.f32 %v1337_v46, %v1336_v53  ;;  %1050 = vmax.xlane.f32.xlu1 %v2179_v7  ;;  %v1339_v44 = vpop.f32.mrb[14].mxu0  ;;  %v2183_v56 = vadd.f32 %v1359_v59, %v2136_v54 }
 0x2d3   : > { %v1340_v37 = vpop.f32.mrb[15].mxu0 }
 0x2d4   : > { %v1341_v25 = vadd.f32 %v1340_v37, %v1339_v44  ;;  %1052 = vmax.xlane.f32.xlu0 %v2183_v56  ;;  %v1360_v36 = vpop.f32.mrb[12].mxu1  ;;  %v2187_v38 = vadd.f32 %v1338_v33, %v2136_v54 }
 0x2d5   : > { %v1361_v48 = vpop.f32.mrb[13].mxu1 }
 0x2d6   : > { %v1362_v18 = vadd.f32 %v1361_v48, %v1360_v36  ;;  %1038 = vmax.xlane.f32.xlu1 %v2187_v38  ;;  %v1363_v43 = vpop.f32.mrb[14].mxu1  ;;  %v2191_v0 = vadd.f32 %v1341_v25, %v2136_v54 }
 0x2d7   : > { %v1364_v51 = vpop.f32.mrb[15].mxu1 }
 0x2d8   : > { %v1365_v47 = vadd.f32 %v1364_v51, %v1363_v43  ;;  %1040 = vmax.xlane.f32.xlu0 %v2191_v0  ;;  %v2195_v19 = vadd.f32 %v1362_v18, %v2136_v54 }
 0x2da   : > { %1054 = vmax.xlane.f32.xlu1 %v2195_v19  ;;  %v2199_v10 = vadd.f32 %v1365_v47, %v2136_v54 }
 0x2dc   : > { %1056 = vmax.xlane.f32.xlu0 %v2199_v10 }
 0x344   : > { %v1027_v22 = vpop.xlane.xlu1 %1026 }
 0x345   : > { %v2203_v58 = vsub.f32 %v2139_v31, %v1027_v22 }
 0x346   : > { %v1029_v35 = vpop.xlane.xlu0 %1028 }
 0x347   : > { %v1074_v62 = vmul.f32 1.442695, %v2203_v58  ;;  %v2207_v28 = vsub.f32 %v2143_v26, %v1029_v35 }
 0x349   : > { %v1043_v60 = vpop.xlane.xlu1 %1042  ;;  %1505 = vpow2.f32 %v1074_v62  ;;  %v1076_v49 = vmul.f32 1.442695, %v2207_v28 }
 0x34a   : > { %v2211_v5 = vsub.f32 %v2147_v24, %v1043_v60 }
 0x34b   : > { %v1045_v54 = vpop.xlane.xlu0 %1044  ;;  %1507 = vpow2.f32 %v1076_v49 }
 0x34c   : > { %v1090_v9 = vmul.f32 1.442695, %v2211_v5  ;;  %v2215_v31 = vsub.f32 %v2151_v11, %v1045_v54 }
 0x34e   : > { %1509 = vpow2.f32 %v1090_v9  ;;  %v1092_v13 = vmul.f32 1.442695, %v2215_v31  ;;  %v1031_v40 = vpop.xlane.xlu1 %1030 }
 0x34f   : > { %v2219_v26 = vsub.f32 %v2155_v17, %v1031_v40 }
 0x350   : > { %1511 = vpow2.f32 %v1092_v13  ;;  %v1033_v29 = vpop.xlane.xlu0 %1032 }
 0x351   : > { %v1078_v32 = vmul.f32 1.442695, %v2219_v26  ;;  %v2223_v24 = vsub.f32 %v2159_v3, %v1033_v29 }
 0x353   : > { %1513 = vpow2.f32 %v1078_v32  ;;  %v1080_v63 = vmul.f32 1.442695, %v2223_v24  ;;  %v1506_v57 = vpop.eup %1505 }
 0x354   : > { %1106 = vadd.xlane.f32.xlu1 %v1506_v57 }
 0x355   : > { %1515 = vpow2.f32 %v1080_v63  ;;  %v1508_v11 = vpop.eup %1507 }
 0x356   : > { %v1047_v6 = vpop.xlane.xlu1 %1046  ;;  %1108 = vadd.xlane.f32.xlu0 %v1508_v11 }
 0x357   : > { %v2227_v12 = vsub.f32 %v2163_v20, %v1047_v6 }
 0x358   : > { %v1510_v17 = vpop.eup %1509  ;;  %v1049_v52 = vpop.xlane.xlu0 %1048 }
 0x359   : > { %v1094_v1 = vmul.f32 1.442695, %v2227_v12  ;;  %v2231_v23 = vsub.f32 %v2167_v61, %v1049_v52  ;;  %1122 = vadd.xlane.f32.xlu1 %v1510_v17 }
 0x35a   : > { %v1512_v3 = vpop.eup %1511  ;;  %v1035_v15 = vpop.xlane.xlu1 %1034 }
 0x35b   : > { %1517 = vpow2.f32 %v1094_v1  ;;  %v1096_v8 = vmul.f32 1.442695, %v2231_v23  ;;  %v2235_v16 = vsub.f32 %v2171_v21, %v1035_v15  ;;  %1124 = vadd.xlane.f32.xlu0 %v1512_v3 }
 0x35c   : > { %v1037_v42 = vpop.xlane.xlu0 %1036 }
 0x35d   : > { %v1514_v20 = vpop.eup %1513  ;;  %1519 = vpow2.f32 %v1096_v8  ;;  %v1082_v34 = vmul.f32 1.442695, %v2235_v16  ;;  %v2239_v4 = vsub.f32 %v2175_v39, %v1037_v42 }
 0x35e   : > { %1110 = vadd.xlane.f32.xlu1 %v1514_v20 }
 0x35f   : > { %v1051_v41 = vpop.xlane.xlu1 %1050  ;;  %v1516_v61 = vpop.eup %1515  ;;  %1521 = vpow2.f32 %v1082_v34  ;;  %v1084_v55 = vmul.f32 1.442695, %v2239_v4 }
 0x360   : > { %v2243_v14 = vsub.f32 %v2179_v7, %v1051_v41  ;;  %1112 = vadd.xlane.f32.xlu0 %v1516_v61 }
 0x361   : > { %v1053_v27 = vpop.xlane.xlu0 %1052  ;;  %1523 = vpow2.f32 %v1084_v55 }
 0x362   : > { %v1098_v21 = vmul.f32 1.442695, %v2243_v14  ;;  %v2247_v30 = vsub.f32 %v2183_v56, %v1053_v27 }
 0x363   : > { %v1039_v50 = vpop.xlane.xlu1 %1038 }
 0x364   : > { %1525 = vpow2.f32 %v1098_v21  ;;  %v1100_v45 = vmul.f32 1.442695, %v2247_v30  ;;  %v2251_v39 = vsub.f32 %v2187_v38, %v1039_v50 }
 0x365   : > { %v1041_v2 = vpop.xlane.xlu0 %1040  ;;  %v1518_v59 = vpop.eup %1517 }
 0x366   : > { %1527 = vpow2.f32 %v1100_v45  ;;  %v1086_v53 = vmul.f32 1.442695, %v2251_v39  ;;  %v2255_v7 = vsub.f32 %v2191_v0, %v1041_v2  ;;  %1126 = vadd.xlane.f32.xlu1 %v1518_v59 }
 0x367   : > { %v1055_v46 = vpop.xlane.xlu1 %1054  ;;  %v1520_v33 = vpop.eup %1519 }
 0x368   : > { %1529 = vpow2.f32 %v1086_v53  ;;  %v1088_v44 = vmul.f32 1.442695, %v2255_v7  ;;  %v2259_v56 = vsub.f32 %v2195_v19, %v1055_v46  ;;  %1128 = vadd.xlane.f32.xlu0 %v1520_v33 }
 0x369   : > { %v1057_v37 = vpop.xlane.xlu0 %1056  ;;  %v1522_v25 = vpop.eup %1521 }
 0x36a   : > { %1531 = vpow2.f32 %v1088_v44  ;;  %v1102_v36 = vmul.f32 1.442695, %v2259_v56  ;;  %v2263_v38 = vsub.f32 %v2199_v10, %v1057_v37  ;;  %1114 = vadd.xlane.f32.xlu1 %v1522_v25 }
 0x36b   : > { %v1524_v48 = vpop.eup %1523 }
 0x36c   : > { %1533 = vpow2.f32 %v1102_v36  ;;  %v1104_v18 = vmul.f32 1.442695, %v2263_v38  ;;  %1116 = vadd.xlane.f32.xlu0 %v1524_v48 }
 0x36e   : > { %v1526_v43 = vpop.eup %1525  ;;  %1535 = vpow2.f32 %v1104_v18 }
 0x36f   : > { %1130 = vadd.xlane.f32.xlu1 %v1526_v43 }
 0x370   : > { %v1528_v0 = vpop.eup %1527 }
 0x371   : > { %1132 = vadd.xlane.f32.xlu0 %v1528_v0 }
 0x372   : > { %v1530_v51 = vpop.eup %1529 }
 0x373   : > { %1118 = vadd.xlane.f32.xlu1 %v1530_v51 }
 0x374   : > { %v1532_v47 = vpop.eup %1531 }
 0x375   : > { %1120 = vadd.xlane.f32.xlu0 %v1532_v47 }
 0x376   : > { %v1534_v19 = vpop.eup %1533 }
 0x377   : > { %1134 = vadd.xlane.f32.xlu1 %v1534_v19 }
 0x378   : > { %v1536_v22 = vpop.eup %1535 }
 0x379   : > { %1136 = vadd.xlane.f32.xlu0 %v1536_v22 }
 0x3e1   : > { %v1107_v10 = vpop.xlane.xlu1 %1106 }
 0x3e2   : > { %1537 = vlog2.f32 %v1107_v10 }
 0x3e3   : > { %v1109_v35 = vpop.xlane.xlu0 %1108 }
 0x3e4   : > { %1539 = vlog2.f32 %v1109_v35 }
 0x3e6   : > { %v1123_v62 = vpop.xlane.xlu1 %1122 }
 0x3e7   : > { %1541 = vlog2.f32 %v1123_v62 }
 0x3e8   : > { %v1125_v60 = vpop.xlane.xlu0 %1124 }
 0x3e9   : > { %1543 = vlog2.f32 %v1125_v60 }
 0x3eb   : > { %v1111_v49 = vpop.xlane.xlu1 %1110 }
 0x3ec   : > { %1545 = vlog2.f32 %v1111_v49  ;;  %v1538_v54 = vpop.eup %1537 }
 0x3ed   : > { %v1113_v9 = vpop.xlane.xlu0 %1112  ;;  %v1139_v13 = vmul.f32 0.6931472, %v1538_v54 }
 0x3ee   : > { %1547 = vlog2.f32 %v1113_v9  ;;  %v1540_v40 = vpop.eup %1539 }
 0x3ef   : > { %v1170_v29 = vsub.f32 %v2203_v58, %v1139_v13  ;;  %v1141_v32 = vmul.f32 0.6931472, %v1540_v40 }
 0x3f1   : > { %v1542_v63 = vpop.eup %1541  ;;  %1186 = vst [vmem:[%s2270_s19] sm:$0xff] %v1170_v29  ;;  %v1171_v57 = vsub.f32 %v2207_v28, %v1141_v32 }
 0x3f2   : > { %v1155_v11 = vmul.f32 0.6931472, %v1542_v63 }
 0x3f3   : > { %v1544_v6 = vpop.eup %1543  ;;  %v1127_v17 = vpop.xlane.xlu1 %1126  ;;  %1187 = vst [vmem:[%s2270_s19 + $0x8] sm:$0xff] %v1171_v57 }
 0x3f4   : > { %v1178_v52 = vsub.f32 %v2211_v5, %v1155_v11  ;;  %v1157_v1 = vmul.f32 0.6931472, %v1544_v6  ;;  %1549 = vlog2.f32 %v1127_v17 }
 0x3f5   : > { %v1129_v3 = vpop.xlane.xlu0 %1128 }
 0x3f6   : > { %v1546_v15 = vpop.eup %1545  ;;  %1194 = vst [vmem:[%s2270_s19 + $0x40] sm:$0xff] %v1178_v52  ;;  %v1179_v58 = vsub.f32 %v2215_v31, %v1157_v1  ;;  %1551 = vlog2.f32 %v1129_v3 }
 0x3f7   : > { %v1143_v8 = vmul.f32 0.6931472, %v1546_v15  ;;  %v1115_v42 = vpop.xlane.xlu1 %1114 }
 0x3f8   : > { %v1548_v28 = vpop.eup %1547  ;;  %1195 = vst [vmem:[%s2270_s19 + $0x48] sm:$0xff] %v1179_v58  ;;  %1553 = vlog2.f32 %v1115_v42 }
 0x3f9   : > { %v1172_v20 = vsub.f32 %v2219_v26, %v1143_v8  ;;  %v1145_v34 = vmul.f32 0.6931472, %v1548_v28  ;;  %v1117_v41 = vpop.xlane.xlu0 %1116 }
 0x3fa   : > { %1555 = vlog2.f32 %v1117_v41 }
 0x3fb   : > { %1188 = vst [vmem:[%s2270_s19 + $0x10] sm:$0xff] %v1172_v20  ;;  %v1173_v5 = vsub.f32 %v2223_v24, %v1145_v34 }
 0x3fc   : > { %v1131_v61 = vpop.xlane.xlu1 %1130 }
 0x3fd   : > { %1557 = vlog2.f32 %v1131_v61  ;;  %1189 = vst [vmem:[%s2270_s19 + $0x18] sm:$0xff] %v1173_v5 }
 0x3fe   : > { %v1133_v55 = vpop.xlane.xlu0 %1132  ;;  %v1550_v31 = vpop.eup %1549 }
 0x3ff   : > { %1559 = vlog2.f32 %v1133_v55  ;;  %v1159_v27 = vmul.f32 0.6931472, %v1550_v31 }
 0x400   : > { %v1119_v21 = vpop.xlane.xlu1 %1118  ;;  %v1552_v50 = vpop.eup %1551 }
 0x401   : > { %1561 = vlog2.f32 %v1119_v21  ;;  %v1180_v26 = vsub.f32 %v2227_v12, %v1159_v27  ;;  %v1161_v45 = vmul.f32 0.6931472, %v1552_v50 }
 0x402   : > { %v1121_v2 = vpop.xlane.xlu0 %1120  ;;  %v1554_v59 = vpop.eup %1553 }
 0x403   : > { %1563 = vlog2.f32 %v1121_v2  ;;  %1196 = vst [vmem:[%s2270_s19 + $0x50] sm:$0xff] %v1180_v26  ;;  %v1181_v24 = vsub.f32 %v2231_v23, %v1161_v45  ;;  %v1147_v53 = vmul.f32 0.6931472, %v1554_v59 }
 0x404   : > { %v1135_v46 = vpop.xlane.xlu1 %1134  ;;  %v1556_v33 = vpop.eup %1555 }
 0x405   : > { %1565 = vlog2.f32 %v1135_v46  ;;  %1197 = vst [vmem:[%s2270_s19 + $0x58] sm:$0xff] %v1181_v24  ;;  %v1174_v44 = vsub.f32 %v2235_v16, %v1147_v53  ;;  %v1149_v37 = vmul.f32 0.6931472, %v1556_v33 }
 0x406   : > { %v1137_v12 = vpop.xlane.xlu0 %1136 }
 0x407   : > { %v1558_v25 = vpop.eup %1557  ;;  %1567 = vlog2.f32 %v1137_v12  ;;  %1190 = vst [vmem:[%s2270_s19 + $0x20] sm:$0xff] %v1174_v44  ;;  %v1175_v36 = vsub.f32 %v2239_v4, %v1149_v37 }
 0x408   : > { %v1163_v48 = vmul.f32 0.6931472, %v1558_v25 }
 0x409   : > { %v1560_v18 = vpop.eup %1559  ;;  %1191 = vst [vmem:[%s2270_s19 + $0x28] sm:$0xff] %v1175_v36 }
 0x40a   : > { %v1182_v23 = vsub.f32 %v2243_v14, %v1163_v48  ;;  %v1165_v43 = vmul.f32 0.6931472, %v1560_v18 }
 0x40b   : > { %v1562_v0 = vpop.eup %1561 }
 0x40c   : > { %1198 = vst [vmem:[%s2270_s19 + $0x60] sm:$0xff] %v1182_v23  ;;  %v1183_v16 = vsub.f32 %v2247_v30, %v1165_v43  ;;  %v1151_v51 = vmul.f32 0.6931472, %v1562_v0 }
 0x40d   : > { %v1564_v47 = vpop.eup %1563 }
 0x40e   : > { %1199 = vst [vmem:[%s2270_s19 + $0x68] sm:$0xff] %v1183_v16  ;;  %v1176_v19 = vsub.f32 %v2251_v39, %v1151_v51  ;;  %v1153_v22 = vmul.f32 0.6931472, %v1564_v47 }
 0x40f   : > { %v1566_v4 = vpop.eup %1565 }
 0x410   : > { %1192 = vst [vmem:[%s2270_s19 + $0x30] sm:$0xff] %v1176_v19  ;;  %v1177_v10 = vsub.f32 %v2255_v7, %v1153_v22  ;;  %v1167_v35 = vmul.f32 0.6931472, %v1566_v4 }
 0x411   : > { %v1568_v62 = vpop.eup %1567 }
 0x412   : > { %1193 = vst [vmem:[%s2270_s19 + $0x38] sm:$0xff] %v1177_v10  ;;  %v1184_v14 = vsub.f32 %v2259_v56, %v1167_v35  ;;  %v1169_v60 = vmul.f32 0.6931472, %v1568_v62 }
 0x414   : > { %1200 = vst [vmem:[%s2270_s19 + $0x70] sm:$0xff] %v1184_v14  ;;  %v1185_v30 = vsub.f32 %v2263_v38, %v1169_v60 }
 0x416   : > { %1201 = vst [vmem:[%s2270_s19 + $0x78] sm:$0xff] %v1185_v30 }
 0x417 PF: > { %s15_s18 = sadd.s32 1, %s1575_s18  }
 0x418   : > { %p12_p4 = scmp.ge.s32.totalorder %s15_s18, 4  }
 0x41a   :  { %14 = sbr.rel (!%p12_p4) target bundleno = 1 (0x1), region = 73 }

// kernel: _forward.7
= control target key start
LH: loop header
LB: loop body
LE: loop exit
PB: predicated region body
PF: predicated region fallthrough
CT: control target
= control target key end

     0   :  { %s2270_s18 = smov 0   ;;  %s3573_s0 = inlined_call_operand.vmem [shape: bf16[256,16], index: 0, kind: input, shape index: {}]   ;;  %s3574_s1 = inlined_call_operand.vmem [shape: f32[256,2], index: 1, kind: input, shape index: {}]   ;;  %s3575_s2 = inlined_call_operand.vmem [shape: f32[2,256], index: 2, kind: input, shape index: {}]   ;;  %s3576_s3 = inlined_call_operand.vmem [shape: bf16[256,256], index: 3, kind: input, shape index: {}]   ;;  %s3577_s4 = inlined_call_operand.vmem [shape: f32[1,16], index: 4, kind: input, shape index: {}]   ;;  %s3578_s5 = inlined_call_operand.vmem [shape: f32[256,16], index: 5, kind: output, shape index: {}]  }
   0x1 LB: > { %s1843_s19 = sadd.s32 4294967295, %s2234_s18   ;;  %p1847_p0 = scmp.ge.s32.totalorder %s2234_s18, 1  ;;  %s2234_s18 = sphi %s2270_s18, %s15_s18  }
   0x2   : > { %p200_p1 = scmp.lt.s32.totalorder %s2234_s18, 3 }
   0x4   : > { %p201_p2 = pnand %p1847_p0, %p200_p1 }
   0x6   : > { %204 = sbr.rel (%p201_p2) target bundleno = 1169 (0x491), region = 40 }
   0xd   : > { %s1848_s20 = sshll.u32 %s1843_s19, 4  ;;  %v3582_v0 = vmov 1   ;;  %v2237_v17 = vmov 0   ;;  %v433_v18 = vlaneseq  ;;  %v2341_v22 = vld [vmem:[%s3575_s2] sm:$0xf]  ;;  %s2238_s23 = smov 120  }
   0xe   : > { %2016 = vset.pattern.permute.xlu1 %v3582_v0  ;;  %2015 = vset.pattern.permute.xlu0 %v3582_v0  ;;  %p235_p3 = scmp.lt.s32.totalorder %s1848_s20, 31  ;;  %s2239_s15 = smov 8   ;;  %vm1703_vm0 = vcmask 64512   ;;  %vm1758_vm1 = vcmask 130048  }
   0xf   : > { %v2334_v19 = vshrl.u32 %v433_v18, 7 }
  0x10   : > { %s3816_s20 = smov (!%p235_p3, %s1848_s20), 31 }
  0x11   : > { %s2280_s21 = sshll.u32 %s3816_s20, 3  ;;  %v1094_v20 = vsub.s32 1, %v2334_v19  ;;  %v1098_v21 = vsub.s32 3, %v2334_v19 }
  0x12   : > { %s238_s24 = scalar_lea.vmem %s3574_s1, %s2280_s21  ;;  %s2349_s29 = scalar_lea.vmem %s3576_s3, %s2280_s21 }
  0x13   : > { %v2286_v1 = vld [vmem:[%s238_s24 + $0x10] sm:$0xff]  ;;  %v2288_v2 = vld [vmem:[%s238_s24] sm:$0xff]  ;;  %v2292_v3 = vld [vmem:[%s238_s24 + $0x18] sm:$0xff]  ;;  %v1095_v23 = vrot.slane %v2341_v22, %v1094_v20  ;;  %v1099_v24 = vrot.slane %v2341_v22, %v1098_v21  ;;  %s3500_s22 = scalar_lea.vmem %s3578_s5, %s2280_s21 }
  0x14   : > { %1037 = vperm.xlu1 %2016, %v2286_v1   ;;  %1029 = vperm.xlu0 %2015, %v2288_v2   ;;  %v2294_v4 = vld [vmem:[%s238_s24 + $0x8] sm:$0xff]  ;;  %v2300_v6 = vld [vmem:[%s238_s24 + $0x20] sm:$0xff]  ;;  %v2304_v7 = vld [vmem:[%s238_s24 + $0x38] sm:$0xff] }
  0x15   : > { %v2298_v5 = vld [vmem:[%s238_s24 + $0x28] sm:$0xff]  ;;  %v2306_v8 = vld [vmem:[%s238_s24 + $0x30] sm:$0xff]  ;;  %v2312_v10 = vld [vmem:[%s238_s24 + $0x40] sm:$0xff]  ;;  %v2351_v25 = vrot.slane %v1095_v23, %v1094_v20  ;;  %v2353_v26 = vrot.slane %v1099_v24, %v1094_v20 }
  0x16   : > { %v2310_v9 = vld [vmem:[%s238_s24 + $0x48] sm:$0xff]  ;;  %v2316_v11 = vld [vmem:[%s238_s24 + $0x58] sm:$0xff]  ;;  %v2318_v12 = vld [vmem:[%s238_s24 + $0x50] sm:$0xff] }
  0x17   : > { %v2322_v13 = vld [vmem:[%s238_s24 + $0x68] sm:$0xff]  ;;  %v2324_v14 = vld [vmem:[%s238_s24 + $0x60] sm:$0xff]  ;;  %v2328_v15 = vld [vmem:[%s238_s24 + $0x78] sm:$0xff] }
  0x18   : > { %1041 = vperm.xlu1 %2016, %v2292_v3   ;;  %1033 = vperm.xlu0 %2015, %v2294_v4   ;;  %v2330_v16 = vld [vmem:[%s238_s24 + $0x70] sm:$0xff]  ;;  %v2356_v27 = vld [vmem:[%s2349_s29] sm:$0xff]  ;;  %v2362_v29 = vld [vmem:[%s2349_s29 + $0x8] sm:$0xff] }
  0x19   : > { %v2359_v28 = vld [vmem:[%s2349_s29 + $0x10] sm:$0xff]  ;;  %v2365_v30 = vld [vmem:[%s2349_s29 + $0x18] sm:$0xff]  ;;  %v3580_v33 = vunpack.c.l.bf16 %v2356_v27  ;;  %v3579_v34 = vunpack.c.h.bf16 %v2356_v27  ;;  %v2375_v40 = vld [vmem:[%s2349_s29 + $0x20] sm:$0xff]  ;;  %v3585_v43 = vunpack.c.l.bf16 %v2362_v29  ;;  %v3584_v44 = vunpack.c.h.bf16 %v2362_v29 }
  0x1a   : > { %v3581_v35 = vunpack.c.l.bf16 %v2359_v28  ;;  %v2378_v41 = vld [vmem:[%s2349_s29 + $0x28] sm:$0xff]  ;;  %v3583_v42 = vunpack.c.h.bf16 %v2359_v28  ;;  %v3588_v45 = vunpack.c.l.bf16 %v2365_v30  ;;  %v3587_v49 = vunpack.c.h.bf16 %v2365_v30 }
  0x1b   : > { %v3586_v53 = vunpack.c.l.bf16 %v2375_v40  ;;  %v3589_v54 = vunpack.c.h.bf16 %v2375_v40 }
  0x1c   : > { %1049 = vperm.xlu1 %2016, %v2298_v5   ;;  %1045 = vperm.xlu0 %2015, %v2300_v6  }
  0x20   : > { %1057 = vperm.xlu1 %2016, %v2304_v7   ;;  %1053 = vperm.xlu0 %2015, %v2306_v8  }
  0x24   : > { %1065 = vperm.xlu1 %2016, %v2310_v9   ;;  %1061 = vperm.xlu0 %2015, %v2312_v10  }
  0x28   : > { %1073 = vperm.xlu1 %2016, %v2316_v11   ;;  %1069 = vperm.xlu0 %2015, %v2318_v12  }
  0x2c   : > { %1081 = vperm.xlu1 %2016, %v2322_v13   ;;  %1077 = vperm.xlu0 %2015, %v2324_v14  }
  0x30   : > { %1089 = vperm.xlu1 %2016, %v2328_v15   ;;  %1085 = vperm.xlu0 %2015, %v2330_v16  }
  0x34   : > { %2017 = vset.pattern.permute.xlu1 %v2237_v17  ;;  %2018 = vset.pattern.permute.xlu0 %v2237_v17 }
  0x93   : > { %v1038_v31 = vpop.permute.xlu1 %1037  ;;  %v1030_v32 = vpop.permute.xlu0 %1029 }
  0x94   : > { %v1114_v36 = vadd.f32 %v2351_v25, %v1038_v31  ;;  %v1115_v37 = vadd.f32 %v2353_v26, %v1038_v31  ;;  %v1110_v38 = vadd.f32 %v2351_v25, %v1030_v32  ;;  %v1111_v39 = vadd.f32 %v2353_v26, %v1030_v32 }
  0x96   : > { %v1146_v46 = vmul.f32 0.2, %v1114_v36  ;;  %v1147_v47 = vmul.f32 0.2, %v1115_v37  ;;  %v1142_v48 = vmul.f32 0.2, %v1110_v38 }
  0x97   : > { %v1143_v50 = vmul.f32 0.2, %v1111_v39  ;;  %v1042_v51 = vpop.permute.xlu1 %1041  ;;  %v1034_v52 = vpop.permute.xlu0 %1033 }
  0x98   : > { %v1116_v56 = vadd.f32 %v2351_v25, %v1042_v51  ;;  %v1117_v57 = vadd.f32 %v2353_v26, %v1042_v51  ;;  %v1112_v58 = vadd.f32 %v2351_v25, %v1034_v52  ;;  %v1113_v59 = vadd.f32 %v2353_v26, %v1034_v52 }
  0x99   : > { %v1174_v60 = vmax.f32 %v1110_v38, %v1142_v48  ;;  %v1175_v61 = vmax.f32 %v1111_v39, %v1143_v50  ;;  %v1178_v62 = vmax.f32 %v1114_v36, %v1146_v46  ;;  %v1179_v63 = vmax.f32 %v1115_v37, %v1147_v47  ;;  %v2406_v37 = vld [vmem:[%s2349_s29 + $0x30] sm:$0xff] }
  0x9a   : > { %v1148_v17 = vmul.f32 0.2, %v1116_v56  ;;  %v1149_v18 = vmul.f32 0.2, %v1117_v57  ;;  %v1144_v20 = vmul.f32 0.2, %v1112_v58 }
  0x9b   : > { %v1145_v23 = vmul.f32 0.2, %v1113_v59  ;;  %v1050_v24 = vpop.permute.xlu1 %1049  ;;  %v1046_v31 = vpop.permute.xlu0 %1045  ;;  %v2395_v32 = vadd.f32 %v1174_v60, %v3580_v33  ;;  %v2399_v51 = vadd.f32 %v1175_v61, %v3579_v34  ;;  %v2403_v36 = vadd.f32 %v1178_v62, %v3581_v35 }
  0x9c   : > { %v1120_v38 = vadd.f32 %v2351_v25, %v1050_v24  ;;  %v1121_v39 = vadd.f32 %v2353_v26, %v1050_v24  ;;  %v1118_v46 = vadd.f32 %v2351_v25, %v1046_v31  ;;  %v1119_v47 = vadd.f32 %v2353_v26, %v1046_v31 }
  0x9d   : > { %v1238_v48 = vmax.f32 %v2395_v32, %v2399_v51  ;;  %v2416_v50 = vadd.f32 %v1179_v63, %v3583_v42  ;;  %v1176_v52 = vmax.f32 %v1112_v58, %v1144_v20  ;;  %v1177_v60 = vmax.f32 %v1113_v59, %v1145_v23 }
  0x9e   : > { %v1152_v61 = vmul.f32 0.2, %v1120_v38  ;;  %v1150_v62 = vmul.f32 0.2, %v1118_v46  ;;  %v1180_v34 = vmax.f32 %v1116_v56, %v1148_v17  ;;  %v1153_v35 = vmul.f32 0.2, %v1121_v39 }
  0x9f   : > { %v1151_v24 = vmul.f32 0.2, %v1119_v47  ;;  %1239 = vmax.xlane.f32.xlu1 %v1238_v48  ;;  %v1058_v0 = vpop.permute.xlu1 %1057  ;;  %v1054_v21 = vpop.permute.xlu0 %1053  ;;  %v2421_v31 = vadd.f32 %v1176_v52, %v3585_v43  ;;  %v2425_v63 = vadd.f32 %v1177_v60, %v3584_v44  ;;  %v1244_v17 = vmax.f32 %v2403_v36, %v2416_v50 }
  0xa0   : > { %v1124_v58 = vadd.f32 %v2351_v25, %v1058_v0  ;;  %v1122_v59 = vadd.f32 %v2351_v25, %v1054_v21  ;;  %v1123_v56 = vadd.f32 %v2353_v26, %v1054_v21  ;;  %v1181_v23 = vmax.f32 %v1117_v57, %v1149_v18 }
  0xa1   : > { %v1241_v20 = vmax.f32 %v2421_v31, %v2425_v63  ;;  %v2436_v48 = vadd.f32 %v1180_v34, %v3588_v45  ;;  %v1182_v52 = vmax.f32 %v1118_v46, %v1150_v62  ;;  %v1125_v60 = vadd.f32 %v2353_v26, %v1058_v0  ;;  %v2449_v0 = vld [vmem:[%s2349_s29 + $0x38] sm:$0xff] }
  0xa2   : > { %v1154_v42 = vmul.f32 0.2, %v1122_v59  ;;  %v1183_v44 = vmax.f32 %v1119_v47, %v1151_v24  ;;  %v1155_v21 = vmul.f32 0.2, %v1123_v56  ;;  %v2442_v57 = vadd.f32 %v1181_v23, %v3587_v49 }
  0xa3   : > { %3656 = vst [vmem:[#allocation2_spill] sm:$0xff] %v2436_v48  ;;  %1245 = vmax.xlane.f32.xlu1 %v1244_v17  ;;  %1242 = vmax.xlane.f32.xlu0 %v1241_v20  ;;  %v1066_v33 = vpop.permute.xlu1 %1065  ;;  %v1062_v55 = vpop.permute.xlu0 %1061  ;;  %v2446_v34 = vadd.f32 %v1182_v52, %v3586_v53  ;;  %v1184_v18 = vmax.f32 %v1120_v38, %v1152_v61  ;;  %v1156_v46 = vmul.f32 0.2, %v1124_v58  ;;  %v3658_v52 = vunpack.c.l.bf16 %v2378_v41  ;;  %v2465_v61 = vld [vmem:[%s2349_s29 + $0x40] sm:$0xff] }
  0xa4   : > { %3657 = vst [vmem:[#allocation3_spill] sm:$0xff] %v2442_v57  ;;  %v1128_v47 = vadd.f32 %v2351_v25, %v1066_v33  ;;  %v1126_v62 = vadd.f32 %v2351_v25, %v1062_v55  ;;  %v1127_v24 = vadd.f32 %v2353_v26, %v1062_v55  ;;  %v1247_v17 = vmax.f32 %v2436_v48, %v2442_v57 }
  0xa5   : > { %v2458_v20 = vadd.f32 %v1183_v44, %v3589_v54  ;;  %v1185_v23 = vmax.f32 %v1121_v39, %v1153_v35  ;;  %v2462_v38 = vadd.f32 %v1184_v18, %v3658_v52  ;;  %v1157_v53 = vmul.f32 0.2, %v1125_v60 }
  0xa6   : > { %v1129_v49 = vadd.f32 %v2353_v26, %v1066_v33  ;;  %v1186_v45 = vmax.f32 %v1122_v59, %v1154_v42  ;;  %v1158_v43 = vmul.f32 0.2, %v1126_v62  ;;  %v3660_v35 = vunpack.c.h.bf16 %v2378_v41  ;;  %v2478_v33 = vld [vmem:[%s2349_s29 + $0x48] sm:$0xff] }
  0xa7   : > { %3659 = vst [vmem:[#allocation4_spill] sm:$0xff] %v2462_v38  ;;  %1248 = vmax.xlane.f32.xlu0 %v1247_v17  ;;  %v1250_v44 = vmax.f32 %v2446_v34, %v2458_v20  ;;  %v1187_v54 = vmax.f32 %v1123_v56, %v1155_v21  ;;  %v1160_v18 = vmul.f32 0.2, %v1128_v47  ;;  %v1159_v52 = vmul.f32 0.2, %v1127_v24 }
  0xa8   : > { %v2473_v39 = vadd.f32 %v1185_v23, %v3660_v35  ;;  %v3662_v59 = vunpack.c.l.bf16 %v2406_v37  ;;  %v3664_v23 = vunpack.c.h.bf16 %v2406_v37  ;;  %v1188_v56 = vmax.f32 %v1124_v58, %v1156_v46 }
  0xa9   : > { %1251 = vmax.xlane.f32.xlu1 %v1250_v44  ;;  %v1161_v21 = vmul.f32 0.2, %v1129_v49  ;;  %v1189_v55 = vmax.f32 %v1125_v60, %v1157_v53  ;;  %v3594_v57 = vunpack.c.h.bf16 %v2465_v61  ;;  %v3666_v48 = vunpack.c.l.bf16 %v2449_v0 }
  0xaa   : > { %3661 = vst [vmem:[#allocation5_spill] sm:$0xff] %v2473_v39  ;;  %v1253_v42 = vmax.f32 %v2462_v38, %v2473_v39  ;;  %v2484_v17 = vadd.f32 %v1186_v45, %v3662_v59  ;;  %v2488_v35 = vadd.f32 %v1187_v54, %v3664_v23  ;;  %v1190_v38 = vmax.f32 %v1126_v62, %v1158_v43 }
  0xab   : > { %v2495_v39 = vadd.f32 %v1188_v56, %v3666_v48  ;;  %v3596_v45 = vunpack.c.l.bf16 %v2478_v33  ;;  %v3595_v59 = vunpack.c.h.bf16 %v2478_v33  ;;  %v3668_v54 = vunpack.c.h.bf16 %v2449_v0 }
  0xac   : > { %3663 = vst [vmem:[#allocation6_spill] sm:$0xff] %v2484_v17  ;;  %3665 = vst [vmem:[#allocation7_spill] sm:$0xff] %v2488_v35  ;;  %1254 = vmax.xlane.f32.xlu0 %v1253_v42  ;;  %v1256_v44 = vmax.f32 %v2484_v17, %v2488_v35  ;;  %v1191_v53 = vmax.f32 %v1127_v24, %v1159_v52  ;;  %v3670_v60 = vunpack.c.l.bf16 %v2465_v61 }
  0xad   : > { %3667 = vst [vmem:[#allocation8_spill] sm:$0xff] %v2495_v39  ;;  %v2501_v58 = vadd.f32 %v1189_v55, %v3668_v54  ;;  %v1192_v42 = vmax.f32 %v1128_v47, %v1160_v18  ;;  %v1193_v23 = vmax.f32 %v1129_v49, %v1161_v21 }
  0xae   : > { %1257 = vmax.xlane.f32.xlu1 %v1256_v44  ;;  %v2505_v46 = vadd.f32 %v1190_v38, %v3670_v60  ;;  %v2511_v43 = vadd.f32 %v1191_v53, %v3594_v57  ;;  %v2565_v44 = vld [vmem:[%s2349_s29 + $0x58] sm:$0xff] }
  0xaf   : > { %3669 = vst [vmem:[#allocation9_spill] sm:$0xff] %v2501_v58  ;;  %v1259_v48 = vmax.f32 %v2495_v39, %v2501_v58  ;;  %v2515_v62 = vadd.f32 %v1192_v42, %v3596_v45  ;;  %v2521_v38 = vadd.f32 %v1193_v23, %v3595_v59  ;;  %v3704_v39 = vunpack.c.l.bf16 %v2359_v28 }
  0xb0   : > { %3671 = vst [vmem:[#allocation10_spill] sm:$0xff] %v2505_v46  ;;  %3672 = vst [vmem:[#allocation11_spill] sm:$0xff] %v2511_v43  ;;  %v1262_v24 = vmax.f32 %v2505_v46, %v2511_v43  ;;  %v3702_v43 = vunpack.c.h.bf16 %v2362_v29 }
  0xb1   : > { %3673 = vst [vmem:[#allocation12_spill] sm:$0xff] %v2515_v62  ;;  %1260 = vmax.xlane.f32.xlu0 %v1259_v48  ;;  %3674 = vst [vmem:[#allocation13_spill] sm:$0xff] %v2521_v38  ;;  %v1265_v49 = vmax.f32 %v2515_v62, %v2521_v38 }
  0xb2   : > { %1263 = vmax.xlane.f32.xlu1 %v1262_v24 }
  0xb5   : > { %1266 = vmax.xlane.f32.xlu0 %v1265_v49 }
  0xc3   : > { %359 = vperm.xlu1 %2017, %v2294_v4  }
  0xc7   : > { %364 = vperm.xlu1 %2017, %v2286_v1   ;;  %v1074_v1 = vpop.permute.xlu1 %1073 }
  0xcb   : > { %354 = vperm.xlu0 %2018, %v2288_v2   ;;  %374 = vperm.xlu1 %2017, %v2300_v6   ;;  %v3675_v2 = vmov 1   ;;  %v1082_v6 = vpop.permute.xlu1 %1081 }
  0xcf   : > { %369 = vperm.xlu0 %2018, %v2292_v3   ;;  %389 = vperm.xlu1 %2017, %v2304_v7   ;;  %v1070_v3 = vpop.permute.xlu0 %1069  ;;  %v1090_v55 = vpop.permute.xlu1 %1089 }
  0xd0   : > { %v1130_v4 = vadd.f32 %v2351_v25, %v1070_v3  ;;  %v1140_v24 = vadd.f32 %v2351_v25, %v1090_v55  ;;  %v1141_v49 = vadd.f32 %v2353_v26, %v1090_v55 }
  0xd3   : > { %379 = vperm.xlu0 %2018, %v2298_v5   ;;  %399 = vperm.xlu1 %2017, %v2310_v9   ;;  %v1131_v5 = vadd.f32 %v2353_v26, %v1070_v3  ;;  %v1078_v7 = vpop.permute.xlu0 %1077  ;;  %v1133_v9 = vadd.f32 %v2353_v26, %v1074_v1 }
  0xd4   : > { %v1134_v47 = vadd.f32 %v2351_v25, %v1078_v7  ;;  %v1135_v56 = vadd.f32 %v2353_v26, %v1078_v7  ;;  %v1172_v7 = vmul.f32 0.2, %v1140_v24 }
  0xd5   : > { %v1165_v52 = vmul.f32 0.2, %v1133_v9 }
  0xd6   : > { %v1167_v57 = vmul.f32 0.2, %v1135_v56 }
  0xd7   : > { %384 = vperm.xlu0 %2018, %v2306_v8   ;;  %409 = vperm.xlu1 %2017, %v2316_v11   ;;  %v1132_v8 = vadd.f32 %v2351_v25, %v1074_v1  ;;  %v1163_v11 = vmul.f32 0.2, %v1131_v5  ;;  %v1086_v21 = vpop.permute.xlu0 %1085  ;;  %v2573_v1 = vld [vmem:[%s2349_s29 + $0x68] sm:$0xff] }
  0xd8   : > { %v1138_v3 = vadd.f32 %v2351_v25, %v1086_v21  ;;  %v1199_v38 = vmax.f32 %v1135_v56, %v1167_v57 }
  0xd9   : > { %v1164_v18 = vmul.f32 0.2, %v1132_v8  ;;  %v1195_v42 = vmax.f32 %v1131_v5, %v1163_v11  ;;  %v2580_v11 = vld [vmem:[%s2349_s29 + $0x60] sm:$0xff] }
  0xdb   : > { %394 = vperm.xlu0 %2018, %v2312_v10   ;;  %419 = vperm.xlu1 %2017, %v2322_v13   ;;  %v1162_v10 = vmul.f32 0.2, %v1130_v4  ;;  %v1136_v13 = vadd.f32 %v2351_v25, %v1082_v6  ;;  %v1196_v5 = vmax.f32 %v1132_v8, %v1164_v18  ;;  %v1170_v18 = vmul.f32 0.2, %v1138_v3 }
  0xdc   : > { %v3681_v25 = vunpack.c.h.bf16 %v2565_v44 }
  0xdd   : > { %v1194_v60 = vmax.f32 %v1130_v4, %v1162_v10  ;;  %v1168_v23 = vmul.f32 0.2, %v1136_v13  ;;  %v1139_v4 = vadd.f32 %v2353_v26, %v1086_v21  ;;  %v1197_v10 = vmax.f32 %v1133_v9, %v1165_v52  ;;  %v2593_v9 = vld [vmem:[%s2349_s29 + $0x78] sm:$0xff] }
  0xde   : > { %3678 = vst [vmem:[#allocation16_spill] sm:$0xff] %v2593_v9  ;;  %v3603_v52 = vunpack.c.l.bf16 %v2580_v11  ;;  %v3602_v21 = vunpack.c.h.bf16 %v2580_v11 }
  0xdf   : > { %404 = vperm.xlu0 %2018, %v2318_v12   ;;  %429 = vperm.xlu1 %2017, %v2328_v15   ;;  %v2549_v12 = vld [vmem:[%s3573_s0 + $0x40] sm:$0xff]   ;;  %v2554_v15 = vld [vmem:[%s2349_s29 + $0x50] sm:$0xff]  ;;  %v2603_v45 = vadd.f32 %v1197_v10, %v3681_v25  ;;  %v1204_v10 = vmax.f32 %v1140_v24, %v1172_v7  ;;  %v3692_v7 = vunpack.c.h.bf16 %v2593_v9 }
  0xe0   : > { %1875 = vmatprep.subr.bf16.mxu0 %v2549_v12  ;;  %v3597_v54 = vunpack.c.l.bf16 %v2554_v15  ;;  %v3598_v53 = vunpack.c.h.bf16 %v2554_v15 }
  0xe1   : > { %3682 = vst [vmem:[#allocation18_spill] sm:$0xff] %v2603_v45 }
  0xe2   : > { %v2584_v55 = vadd.f32 %v1194_v60, %v3597_v54  ;;  %v2588_v59 = vadd.f32 %v1195_v42, %v3598_v53  ;;  %v1171_v54 = vmul.f32 0.2, %v1139_v4  ;;  %v3679_v42 = vunpack.c.l.bf16 %v2565_v44 }
  0xe3   : > { %414 = vperm.xlu0 %2018, %v2324_v14   ;;  %v1137_v14 = vadd.f32 %v2353_v26, %v1082_v6  ;;  %v1173_v6 = vmul.f32 0.2, %v1141_v49  ;;  %v1200_v26 = vmax.f32 %v1136_v13, %v1168_v23  ;;  %v2606_v13 = vld [vmem:[%s2349_s29 + $0x70] sm:$0xff] }
  0xe4   : > { %3676 = vst [vmem:[#allocation14_spill] sm:$0xff] %v2584_v55  ;;  %3677 = vst [vmem:[#allocation15_spill] sm:$0xff] %v2588_v59  ;;  %v2599_v53 = vadd.f32 %v1196_v5, %v3679_v42  ;;  %v3686_v5 = vunpack.c.h.bf16 %v2573_v1  ;;  %v3601_v56 = vunpack.c.l.bf16 %v2606_v13  ;;  %v3600_v23 = vunpack.c.h.bf16 %v2606_v13 }
  0xe5   : > { %v1169_v48 = vmul.f32 0.2, %v1137_v14  ;;  %3683 = vst [vmem:[#allocation19_spill] sm:$0xff] %v2606_v13  ;;  %v1205_v25 = vmax.f32 %v1141_v49, %v1173_v6  ;;  %v3690_v49 = vunpack.c.l.bf16 %v2593_v9 }
  0xe6   : > { %3680 = vst [vmem:[#allocation17_spill] sm:$0xff] %v2599_v53 }
  0xe7   : > { %424 = vperm.xlu0 %2018, %v2330_v16   ;;  %v2559_v16 = vld [vmem:[%s3573_s0] sm:$0xff]   ;;  %v1201_v8 = vmax.f32 %v1137_v14, %v1169_v48  ;;  %v1268_v14 = vmax.f32 %v2584_v55, %v2588_v59  ;;  %v1271_v48 = vmax.f32 %v2599_v53, %v2603_v45  ;;  %v2636_v6 = vadd.f32 %v1204_v10, %v3690_v49  ;;  %v2665_v10 = vld [vmem:[%s3573_s0 + $0x48] sm:$0xff]   ;;  %v2687_v49 = vld [vmem:[%s3573_s0 + $0x10] sm:$0xff]  }
  0xe8   : > { %1876 = vmatpush3.bf16.msra.mxu0 %v2559_v16 }
  0xe9   : > { %v2618_v42 = vadd.f32 %v1201_v8, %v3686_v5  ;;  %v1202_v8 = vmax.f32 %v1138_v3, %v1170_v18  ;;  %3691 = vst [vmem:[#allocation24_spill] sm:$0xff] %v2636_v6  ;;  %1877 = vmatprep.subr.bf16.mxu0 %v2665_v10 }
  0xeb   : > { %2019 = vset.pattern.permute.xlu0 %v3675_v2  ;;  %v1166_v2 = vmul.f32 0.2, %v1134_v47  ;;  %3687 = vst [vmem:[#allocation21_spill] sm:$0xff] %v2618_v42 }
  0xed   : > { %v1198_v60 = vmax.f32 %v1134_v47, %v1166_v2  ;;  %v3684_v47 = vunpack.c.l.bf16 %v2573_v1 }
  0xef   : > { %v2614_v2 = vadd.f32 %v1200_v26, %v3684_v47  ;;  %v2622_v57 = vadd.f32 %v1198_v60, %v3603_v52  ;;  %v2630_v26 = vadd.f32 %v1199_v38, %v3602_v21  ;;  %v1203_v47 = vmax.f32 %v1139_v4, %v1171_v54 }
  0xf0   : > { %v2640_v60 = vadd.f32 %v1205_v25, %v3692_v7  ;;  %v2646_v38 = vadd.f32 %v1202_v8, %v3601_v56  ;;  %v2670_v25 = vld [vmem:[%s3573_s0 + $0x8] sm:$0xff]   ;;  %v435_v7 = vsub.s32 0, %v2334_v19 }
  0xf1   : > { %3685 = vst [vmem:[#allocation20_spill] sm:$0xff] %v2614_v2  ;;  %3688 = vst [vmem:[#allocation22_spill] sm:$0xff] %v2622_v57  ;;  %v1277_v24 = vmax.f32 %v2614_v2, %v2618_v42  ;;  %v2650_v54 = vadd.f32 %v1203_v47, %v3600_v23  ;;  %v2677_v47 = vld [vmem:[%s3573_s0 + $0x50] sm:$0xff]   ;;  %1878 = vmatpush3.bf16.msra.mxu0 %v2670_v25 }
  0xf2   : > { %3689 = vst [vmem:[#allocation23_spill] sm:$0xff] %v2630_v26  ;;  %3693 = vst [vmem:[#allocation25_spill] sm:$0xff] %v2640_v60  ;;  %v1283_v3 = vmax.f32 %v2636_v6, %v2640_v60  ;;  %1879 = vmatprep.subr.bf16.mxu0 %v2677_v47  ;;  %v436_v23 = vrot.slane %v2341_v22, %v435_v7 }
  0xf3   : > { %3694 = vst [vmem:[#allocation26_spill] sm:$0xff] %v2646_v38  ;;  %3695 = vst [vmem:[#allocation27_spill] sm:$0xff] %v2650_v54  ;;  %v1280_v4 = vmax.f32 %v2646_v38, %v2650_v54 }
  0xf4   : > { %v2702_v54 = vrot.slane %v436_v23, %v435_v7 }
  0xf5   : > { %1880 = vmatpush3.bf16.msra.mxu0 %v2687_v49 }
 0x103   : > { %1269 = vmax.xlane.f32.xlu1 %v1268_v14  ;;  %v1274_v14 = vmax.f32 %v2622_v57, %v2630_v26 }
 0x106   : > { %1272 = vmax.xlane.f32.xlu0 %v1271_v48 }
 0x107   : > { %1278 = vmax.xlane.f32.xlu1 %v1277_v24 }
 0x10a   : > { %1275 = vmax.xlane.f32.xlu0 %v1274_v14  ;;  %v439_v14 = vsub.s32 2, %v2334_v19 }
 0x10b   : > { %1284 = vmax.xlane.f32.xlu1 %v1283_v3 }
 0x10c   : > { %v440_v56 = vrot.slane %v2341_v22, %v439_v14 }
 0x10e   : > { %1281 = vmax.xlane.f32.xlu0 %v1280_v4  ;;  %v2704_v38 = vrot.slane %v440_v56, %v435_v7 }
 0x12c   : > { %v2656_v18 = vpop.xlane.xlu1 %1239 }
 0x130   : > { %v2658_v48 = vpop.xlane.xlu1 %1245  ;;  %v2660_v5 = vpop.xlane.xlu0 %1242 }
 0x134   : > { %v2672_v8 = vpop.xlane.xlu0 %1248 }
 0x136   : > { %v2681_v24 = vpop.xlane.xlu1 %1251 }
 0x139   : > { %v2694_v4 = vpop.xlane.xlu0 %1254 }
 0x13b   : > { %v2692_v3 = vpop.xlane.xlu1 %1257 }
 0x13c   : > { %3696 = vst [vmem:[#allocation28_spill] sm:$0xff] %v2692_v3 }
 0x13e   : > { %v2700_v52 = vpop.xlane.xlu0 %1260 }
 0x13f   : > { %v2698_v21 = vpop.xlane.xlu1 %1263  ;;  %3698 = vst [vmem:[#allocation30_spill] sm:$0xff] %v2700_v52 }
 0x140   : > { %3697 = vst [vmem:[#allocation29_spill] sm:$0xff] %v2698_v21 }
 0x142   : > { %v2708_v26 = vpop.xlane.xlu0 %1266 }
 0x143   : > { %v360_v60 = vpop.permute.xlu1 %359  ;;  %3699 = vst [vmem:[#allocation31_spill] sm:$0xff] %v2708_v26 }
 0x144   : > { %v453_v19 = vadd.f32 %v2702_v54, %v360_v60  ;;  %v454_v6 = vadd.f32 %v2704_v38, %v360_v60  ;;  %v3700_v60 = vunpack.c.l.bf16 %v2362_v29 }
 0x146   : > { %v485_v57 = vmul.f32 0.2, %v453_v19  ;;  %v486_v42 = vmul.f32 0.2, %v454_v6 }
 0x147   : > { %v365_v2 = vpop.permute.xlu1 %364 }
 0x148   : > { %v455_v22 = vadd.f32 %v2702_v54, %v365_v2  ;;  %v456_v14 = vadd.f32 %v2704_v38, %v365_v2  ;;  %v517_v59 = vmax.f32 %v453_v19, %v485_v57  ;;  %v518_v45 = vmax.f32 %v454_v6, %v486_v42 }
 0x14a   : > { %v355_v23 = vpop.permute.xlu0 %354  ;;  %v487_v53 = vmul.f32 0.2, %v455_v22  ;;  %v488_v56 = vmul.f32 0.2, %v456_v14  ;;  %v2716_v26 = vadd.f32 %v517_v59, %v3700_v60  ;;  %v2720_v46 = vadd.f32 %v518_v45, %v3702_v43 }
 0x14b   : > { %v451_v7 = vadd.f32 %v2702_v54, %v355_v23  ;;  %v452_v55 = vadd.f32 %v2704_v38, %v355_v23  ;;  %v375_v62 = vpop.permute.xlu1 %374 }
 0x14c   : > { %3701 = vst [vmem:[#allocation32_spill] sm:$0xff] %v2716_v26  ;;  %3703 = vst [vmem:[#allocation33_spill] sm:$0xff] %v2720_v46  ;;  %v459_v2 = vadd.f32 %v2702_v54, %v375_v62  ;;  %v460_v42 = vadd.f32 %v2704_v38, %v375_v62  ;;  %v582_v19 = vmax.f32 %v2716_v26, %v2720_v46 }
 0x14d   : > { %v483_v57 = vmul.f32 0.2, %v451_v7  ;;  %v484_v6 = vmul.f32 0.2, %v452_v55  ;;  %v519_v23 = vmax.f32 %v455_v22, %v487_v53  ;;  %v520_v60 = vmax.f32 %v456_v14, %v488_v56 }
 0x14e   : > { %v370_v21 = vpop.permute.xlu0 %369  ;;  %v491_v9 = vmul.f32 0.2, %v459_v2  ;;  %583 = vmax.xlane.f32.xlu1 %v582_v19  ;;  %v492_v58 = vmul.f32 0.2, %v460_v42  ;;  %v3705_v22 = vunpack.c.l.bf16 %v2356_v27 }
 0x14f   : > { %v457_v13 = vadd.f32 %v2702_v54, %v370_v21  ;;  %v458_v59 = vadd.f32 %v2704_v38, %v370_v21  ;;  %v390_v29 = vpop.permute.xlu1 %389  ;;  %v515_v45 = vmax.f32 %v451_v7, %v483_v57  ;;  %v516_v43 = vmax.f32 %v452_v55, %v484_v6 }
 0x150   : > { %v465_v62 = vadd.f32 %v2702_v54, %v390_v29  ;;  %v2731_v52 = vadd.f32 %v519_v23, %v3704_v39  ;;  %v3706_v21 = vunpack.c.h.bf16 %v2356_v27  ;;  %v466_v55 = vadd.f32 %v2704_v38, %v390_v29 }
 0x151   : > { %v489_v46 = vmul.f32 0.2, %v457_v13  ;;  %v490_v26 = vmul.f32 0.2, %v458_v59  ;;  %v2735_v35 = vadd.f32 %v515_v45, %v3705_v22  ;;  %v3707_v39 = vunpack.c.h.bf16 %v2359_v28 }
 0x152   : > { %v380_v53 = vpop.permute.xlu0 %379  ;;  %v2739_v14 = vadd.f32 %v516_v43, %v3706_v21  ;;  %v523_v6 = vmax.f32 %v459_v2, %v491_v9  ;;  %v524_v43 = vmax.f32 %v460_v42, %v492_v58  ;;  %v497_v22 = vmul.f32 0.2, %v465_v62 }
 0x153   : > { %v461_v56 = vadd.f32 %v2702_v54, %v380_v53  ;;  %v462_v7 = vadd.f32 %v2704_v38, %v380_v53  ;;  %v2746_v57 = vadd.f32 %v520_v60, %v3707_v39  ;;  %v2748_v19 = vpop.permute.xlu1 %399  ;;  %v521_v45 = vmax.f32 %v457_v13, %v489_v46 }
 0x154   : > { %v579_v23 = vmax.f32 %v2735_v35, %v2739_v14  ;;  %v522_v27 = vmax.f32 %v458_v59, %v490_v26  ;;  %v3709_v53 = vunpack.c.l.bf16 %v2365_v30  ;;  %v3710_v28 = vunpack.c.h.bf16 %v2365_v30 }
 0x155   : > { %3708 = vst [vmem:[#allocation34_spill] sm:$0xff] %v2746_v57  ;;  %v493_v21 = vmul.f32 0.2, %v461_v56  ;;  %v494_v29 = vmul.f32 0.2, %v462_v7  ;;  %v585_v58 = vmax.f32 %v2731_v52, %v2746_v57  ;;  %v3711_v39 = vunpack.c.l.bf16 %v2375_v40 }
 0x156   : > { %580 = vmax.xlane.f32.xlu0 %v579_v23  ;;  %v385_v17 = vpop.permute.xlu0 %384  ;;  %v2754_v3 = vadd.f32 %v521_v45, %v3709_v53  ;;  %v2758_v9 = vadd.f32 %v522_v27, %v3710_v28  ;;  %v498_v2 = vmul.f32 0.2, %v466_v55  ;;  %v529_v23 = vmax.f32 %v465_v62, %v497_v22 }
 0x157   : > { %v463_v60 = vadd.f32 %v2702_v54, %v385_v17  ;;  %v464_v46 = vadd.f32 %v2704_v38, %v385_v17  ;;  %v525_v13 = vmax.f32 %v461_v56, %v493_v21  ;;  %v526_v26 = vmax.f32 %v462_v7, %v494_v29  ;;  %v2764_v42 = vpop.permute.xlu1 %409 }
 0x158   : > { %v588_v59 = vmax.f32 %v2754_v3, %v2758_v9  ;;  %v2770_v30 = vadd.f32 %v523_v6, %v3711_v39  ;;  %v3712_v53 = vunpack.c.h.bf16 %v2375_v40  ;;  %v3713_v56 = vunpack.c.l.bf16 %v2378_v41 }
 0x159   : > { %v495_v45 = vmul.f32 0.2, %v463_v60  ;;  %v496_v27 = vmul.f32 0.2, %v464_v46  ;;  %v530_v21 = vmax.f32 %v466_v55, %v498_v2  ;;  %v3714_v6 = vunpack.c.h.bf16 %v2378_v41 }
 0x15a   : > { %586 = vmax.xlane.f32.xlu0 %v585_v58  ;;  %589 = vmax.xlane.f32.xlu1 %v588_v59  ;;  %v395_v17 = vpop.permute.xlu0 %394  ;;  %v2774_v28 = vadd.f32 %v524_v43, %v3712_v53  ;;  %v2778_v7 = vadd.f32 %v525_v13, %v3713_v56  ;;  %v3715_v13 = vunpack.c.l.bf16 %v2449_v0  ;;  %v3718_v41 = vunpack.c.l.bf16 %v2406_v37 }
 0x15b   : > { %v527_v29 = vmax.f32 %v463_v60, %v495_v45  ;;  %v2780_v57 = vpop.permute.xlu1 %419  ;;  %v2786_v22 = vadd.f32 %v526_v26, %v3714_v6  ;;  %v528_v58 = vmax.f32 %v464_v46, %v496_v27  ;;  %v3716_v60 = vunpack.c.h.bf16 %v2449_v0  ;;  %v2841_v6 = vld [vmem:[%s3573_s0 + $0x60] sm:$0xff]  }
 0x15c   : > { %v591_v62 = vmax.f32 %v2770_v30, %v2774_v28  ;;  %v2794_v55 = vadd.f32 %v529_v23, %v3715_v13  ;;  %v3720_v45 = vunpack.c.h.bf16 %v2406_v37  ;;  %v2829_v37 = vld [vmem:[%s3573_s0 + $0x58] sm:$0xff]   ;;  %v1288_v13 = vsub.f32 %v2421_v31, %v2660_v5 }
 0x15d   : > { %v594_v40 = vmax.f32 %v2778_v7, %v2786_v22  ;;  %v2798_v59 = vadd.f32 %v530_v21, %v3716_v60  ;;  %v2802_v26 = vadd.f32 %v527_v29, %v3718_v41  ;;  %1881 = vmatprep.subr.bf16.mxu0 %v2829_v37  ;;  %v468_v31 = vadd.f32 %v2704_v38, %v395_v17 }
 0x15e   : > { %592 = vmax.xlane.f32.xlu0 %v591_v62  ;;  %v2790_v43 = vpop.permute.xlu0 %404  ;;  %v2814_v27 = vadd.f32 %v528_v58, %v3720_v45  ;;  %v2834_v62 = vld [vmem:[%s3573_s0 + $0x18] sm:$0xff]   ;;  %v2849_v58 = vld [vmem:[%s3573_s0 + $0x20] sm:$0xff]  }
 0x15f   : > { %595 = vmax.xlane.f32.xlu1 %v594_v40  ;;  %v430_v2 = vpop.permute.xlu1 %429  ;;  %3717 = vst [vmem:[#allocation35_spill] sm:$0xff] %v2798_v59  ;;  %3719 = vst [vmem:[#allocation36_spill] sm:$0xff] %v2802_v26  ;;  %v600_v23 = vmax.f32 %v2794_v55, %v2798_v59  ;;  %1882 = vmatpush3.bf16.msra.mxu0 %v2834_v62  ;;  %v1287_v40 = vsub.f32 %v2399_v51, %v2656_v18 }
 0x160   : > { %v2805_v46 = vadd.f32 %v2702_v54, %v430_v2  ;;  %v2808_v39 = vadd.f32 %v2704_v38, %v430_v2  ;;  %3721 = vst [vmem:[#allocation37_spill] sm:$0xff] %v2814_v27  ;;  %v597_v53 = vmax.f32 %v2802_v26, %v2814_v27  ;;  %1883 = vmatprep.subr.bf16.mxu0 %v2841_v6  ;;  %v3724_v27 = vunpack.c.h.bf16 %v2478_v33 }
 0x161   : > { %v1289_v2 = vsub.f32 %v2425_v63, %v2660_v5  ;;  %v1320_v41 = vmul.f32 1.442695, %v1287_v40  ;;  %v467_v51 = vadd.f32 %v2702_v54, %v395_v17  ;;  %v3722_v17 = vunpack.c.l.bf16 %v2478_v33 }
 0x162   : > { %v2816_v0 = vpop.permute.xlu0 %414  ;;  %598 = vmax.xlane.f32.xlu0 %v597_v53  ;;  %v500_v53 = vmul.f32 0.2, %v468_v31 }
 0x163   : > { %601 = vmax.xlane.f32.xlu1 %v600_v23  ;;  %1884 = vmatpush3.bf16.msra.mxu0 %v2849_v58  ;;  %v1322_v23 = vmul.f32 1.442695, %v1288_v13  ;;  %v1324_v45 = vmul.f32 1.442695, %v1289_v2  ;;  %v499_v5 = vmul.f32 0.2, %v467_v51 }
 0x166   : > { %v425_v56 = vpop.permute.xlu0 %424 }
 0x167   : > { %v2821_v21 = vadd.f32 %v2702_v54, %v425_v56  ;;  %v2824_v29 = vadd.f32 %v2704_v38, %v425_v56 }
 0x174   : > { %1494 = vrot.lane.b32.xlu1 %v2559_v16, %s2238_s23  ;;  %v1286_v16 = vsub.f32 %v2395_v32, %v2656_v18  ;;  %v470_v32 = vadd.f32 %v2704_v38, %v2748_v19 }
 0x176   : > { %v1318_v60 = vmul.f32 1.442695, %v1286_v16  ;;  %v502_v63 = vmul.f32 0.2, %v470_v32 }
 0x178   : > { %1510 = vrot.lane.b32.xlu0 %v2549_v12, %s2238_s23  ;;  %2036 = vpow2.f32 %v1318_v60  ;;  %v469_v12 = vadd.f32 %v2702_v54, %v2748_v19  ;;  %v534_v40 = vmax.f32 %v470_v32, %v502_v63  ;;  %v531_v60 = vmax.f32 %v467_v51, %v499_v5  ;;  %v2917_v5 = vld [vmem:[%s3573_s0 + $0x70] sm:$0xff]  }
 0x179   : > { %2038 = vpow2.f32 %v1320_v41  ;;  %v532_v41 = vmax.f32 %v468_v31, %v500_v53  ;;  %v3726_v32 = vunpack.c.l.bf16 %v2465_v61  ;;  %v3728_v31 = vunpack.c.h.bf16 %v2465_v61  ;;  %v2907_v61 = vld [vmem:[%s3573_s0 + $0x68] sm:$0xff]   ;;  %v3730_v53 = vld [vmem:[#allocation2_spill] sm:$0xff] }
 0x17a   : > { %2040 = vpow2.f32 %v1322_v23  ;;  %v501_v18 = vmul.f32 0.2, %v469_v12  ;;  %v2884_v26 = vadd.f32 %v534_v40, %v3724_v27  ;;  %v2912_v27 = vld [vmem:[%s3573_s0 + $0x28] sm:$0xff]   ;;  %1885 = vmatprep.subr.bf16.mxu0 %v2907_v61 }
 0x17b   : > { %2042 = vpow2.f32 %v1324_v45  ;;  %v2890_v51 = vadd.f32 %v531_v60, %v3726_v32  ;;  %1886 = vmatpush3.bf16.msra.mxu0 %v2912_v27  ;;  %v3731_v40 = vld [vmem:[#allocation3_spill] sm:$0xff] }
 0x17c   : > { %v533_v16 = vmax.f32 %v469_v12, %v501_v18  ;;  %3725 = vst [vmem:[#allocation39_spill] sm:$0xff] %v2884_v26  ;;  %v2894_v18 = vadd.f32 %v532_v41, %v3728_v31  ;;  %1887 = vmatprep.subr.bf16.mxu0 %v2917_v5  ;;  %v1293_v60 = vsub.f32 %v3731_v40, %v2672_v8 }
 0x17d   : > { %3727 = vst [vmem:[#allocation40_spill] sm:$0xff] %v2890_v51 }
 0x17e   : > { %v2880_v45 = vadd.f32 %v533_v16, %v3722_v17  ;;  %3729 = vst [vmem:[#allocation41_spill] sm:$0xff] %v2894_v18  ;;  %v603_v33 = vmax.f32 %v2890_v51, %v2894_v18  ;;  %v1292_v16 = vsub.f32 %v3730_v53, %v2672_v8  ;;  %v3742_v18 = vld [vmem:[#allocation5_spill] sm:$0xff] }
 0x17f   : > { %v1297_v51 = vsub.f32 %v3742_v18, %v2694_v4 }
 0x180   : > { %3723 = vst [vmem:[#allocation38_spill] sm:$0xff] %v2880_v45  ;;  %v606_v63 = vmax.f32 %v2880_v45, %v2884_v26  ;;  %v1330_v17 = vmul.f32 1.442695, %v1292_v16 }
 0x182   : > { %v2868_v56 = vpop.eup %2036 }
 0x183   : > { %v2870_v13 = vpop.eup %2038 }
 0x184   : > { %v2872_v2 = vpop.eup %2040  ;;  %v1382_v23 = vadd.f32 %v2870_v13, %v2868_v56 }
 0x185   : > { %v2874_v19 = vpop.eup %2042 }
 0x186   : > { %v1385_v12 = vadd.f32 %v2874_v19, %v2872_v2 }
 0x197   : > { %1386 = vadd.xlane.f32.xlu0 %v1385_v12  ;;  %v1332_v12 = vmul.f32 1.442695, %v1293_v60 }
 0x198   : > { %1383 = vadd.xlane.f32.xlu1 %v1382_v23 }
 0x19b   : > { %604 = vmax.xlane.f32.xlu0 %v603_v33 }
 0x19c   : > { %607 = vmax.xlane.f32.xlu1 %v606_v63 }
 0x1ad   : > { %1496 = vrot.lane.b32.xlu1 %v2670_v25, %s2238_s23  ;;  %v2927_v25 = vld [vmem:[%s3573_s0 + $0x30] sm:$0xff]  }
 0x1ae   : > { %1888 = vmatpush3.bf16.msra.mxu0 %v2927_v25 }
 0x1b1   : > { %1514 = vrot.lane.b32.xlu1 %v2677_v47, %s2238_s23  ;;  %1512 = vrot.lane.b32.xlu0 %v2665_v10, %s2238_s23  ;;  %v1290_v47 = vsub.f32 %v2403_v36, %v2658_v48  ;;  %v1291_v10 = vsub.f32 %v2416_v50, %v2658_v48  ;;  %v474_v36 = vadd.f32 %v2704_v38, %v2764_v42 }
 0x1b2   : > { %v471_v50 = vadd.f32 %v2702_v54, %v2790_v43  ;;  %v472_v48 = vadd.f32 %v2704_v38, %v2790_v43 }
 0x1b3   : > { %v1326_v41 = vmul.f32 1.442695, %v1290_v47  ;;  %v1328_v23 = vmul.f32 1.442695, %v1291_v10  ;;  %v506_v32 = vmul.f32 0.2, %v474_v36 }
 0x1b4   : > { %v503_v31 = vmul.f32 0.2, %v471_v50  ;;  %v504_v63 = vmul.f32 0.2, %v472_v48 }
 0x1b5   : > { %1498 = vrot.lane.b32.xlu0 %v2687_v49, %s2238_s23  ;;  %2044 = vpow2.f32 %v1326_v41  ;;  %v473_v49 = vadd.f32 %v2702_v54, %v2764_v42  ;;  %v538_v10 = vmax.f32 %v474_v36, %v506_v32  ;;  %v2956_v41 = vpop.xlane.xlu1 %1269  ;;  %v3738_v32 = vunpack.c.h.bf16 %v2554_v15 }
 0x1b6   : > { %2046 = vpow2.f32 %v1328_v23  ;;  %v535_v42 = vmax.f32 %v471_v50, %v503_v31  ;;  %v536_v40 = vmax.f32 %v472_v48, %v504_v63  ;;  %v2958_v23 = vpop.xlane.xlu0 %1272  ;;  %v3736_v48 = vunpack.c.l.bf16 %v2554_v15 }
 0x1b7   : > { %2048 = vpow2.f32 %v1330_v17  ;;  %v505_v8 = vmul.f32 0.2, %v473_v49  ;;  %v3732_v17 = vunpack.c.l.bf16 %v2565_v44 }
 0x1b8   : > { %2050 = vpow2.f32 %v1332_v12  ;;  %v2978_v31 = vadd.f32 %v536_v40, %v3738_v32  ;;  %v3011_v32 = vld [vmem:[%s3573_s0 + $0x78] sm:$0xff]  }
 0x1b9   : > { %v537_v47 = vmax.f32 %v473_v49, %v505_v8  ;;  %v3734_v49 = vunpack.c.h.bf16 %v2565_v44  ;;  %v2974_v8 = vadd.f32 %v535_v42, %v3736_v48  ;;  %1889 = vmatprep.subr.bf16.mxu0 %v3011_v32 }
 0x1ba   : > { %3739 = vst [vmem:[#allocation43_spill] sm:$0xff] %v2978_v31  ;;  %v2984_v44 = vpop.xlane.xlu0 %1275 }
 0x1bb   : > { %v2964_v12 = vadd.f32 %v537_v47, %v3732_v17  ;;  %v2968_v36 = vadd.f32 %v538_v10, %v3734_v49  ;;  %3737 = vst [vmem:[#allocation42_spill] sm:$0xff] %v2974_v8  ;;  %v2982_v47 = vpop.xlane.xlu1 %1278  ;;  %v609_v10 = vmax.f32 %v2974_v8, %v2978_v31  ;;  %v1294_v8 = vsub.f32 %v2446_v34, %v2681_v24 }
 0x1bc   : > { %v478_v34 = vadd.f32 %v2704_v38, %v2780_v57 }
 0x1bd   : > { %3733 = vst [vmem:[#allocation2_spill] sm:$0xff] %v2964_v12  ;;  %3735 = vst [vmem:[#allocation3_spill] sm:$0xff] %v2968_v36  ;;  %v612_v63 = vmax.f32 %v2964_v12, %v2968_v36  ;;  %v1295_v36 = vsub.f32 %v2458_v20, %v2681_v24  ;;  %v3741_v12 = vld [vmem:[#allocation4_spill] sm:$0xff]  ;;  %v1334_v26 = vmul.f32 1.442695, %v1294_v8  ;;  %v475_v20 = vadd.f32 %v2702_v54, %v2816_v0 }
 0x1be   : > { %v2990_v42 = vpop.xlane.xlu0 %1281  ;;  %v476_v24 = vadd.f32 %v2704_v38, %v2816_v0  ;;  %v510_v18 = vmul.f32 0.2, %v478_v34  ;;  %v3743_v38 = vunpack.c.l.bf16 %v2573_v1 }
 0x1bf   : > { %v2948_v33 = vpop.eup %2044  ;;  %v1336_v45 = vmul.f32 1.442695, %v1295_v36  ;;  %2052 = vpow2.f32 %v1334_v26 }
 0x1c0   : > { %v2950_v53 = vpop.eup %2046  ;;  %v542_v36 = vmax.f32 %v478_v34, %v510_v18  ;;  %v3745_v34 = vunpack.c.l.bf16 %v2580_v11 }
 0x1c1   : > { %v2952_v16 = vpop.eup %2048  ;;  %v1388_v43 = vadd.f32 %v2950_v53, %v2948_v33  ;;  %2054 = vpow2.f32 %v1336_v45 }
 0x1c2   : > { %v2954_v60 = vpop.eup %2050 }
 0x1c3   : > { %v1391_v50 = vadd.f32 %v2954_v60, %v2952_v16 }
 0x1c9   : > { %v3044_v26 = vpop.eup %2052 }
 0x1cb   : > { %v3046_v8 = vpop.eup %2054 }
 0x1d4   : > { %1392 = vadd.xlane.f32.xlu0 %v1391_v50 }
 0x1d5   : > { %1389 = vadd.xlane.f32.xlu1 %v1388_v43  ;;  %v2988_v43 = vpop.xlane.xlu1 %1284 }
 0x1d8   : > { %610 = vmax.xlane.f32.xlu0 %v609_v10 }
 0x1d9   : > { %613 = vmax.xlane.f32.xlu1 %v612_v63  ;;  %v3016_v63 = vld [vmem:[%s3573_s0 + $0x38] sm:$0xff]  }
 0x1da   : > { %1890 = vmatpush3.bf16.msra.mxu0 %v3016_v63 }
 0x1db   : > { %v2992_v15 = vpop.xlane.xlu1 %583 }
 0x1e3   : > { %v2994_v40 = vpop.xlane.xlu0 %580 }
 0x1e7   : > { %v2996_v17 = vpop.xlane.xlu1 %589  ;;  %v2998_v49 = vpop.xlane.xlu0 %586 }
 0x1ea   : > { %1500 = vrot.lane.b32.xlu1 %v2834_v62, %s2238_s23 }
 0x1eb   : > { %v3004_v48 = vpop.xlane.xlu0 %592 }
 0x1ec   : > { %v3002_v50 = vpop.xlane.xlu1 %595 }
 0x1ee   : > { %1518 = vrot.lane.b32.xlu1 %v2841_v6, %s2238_s23  ;;  %1516 = vrot.lane.b32.xlu0 %v2829_v37, %s2238_s23  ;;  %v1296_v37 = vsub.f32 %v3741_v12, %v2694_v4  ;;  %v507_v12 = vmul.f32 0.2, %v475_v20 }
 0x1ef   : > { %v3024_v62 = vpop.xlane.xlu0 %598 }
 0x1f0   : > { %v3018_v10 = vpop.xlane.xlu1 %601  ;;  %3740 = vst [vmem:[#allocation44_spill] sm:$0xff] %v3024_v62  ;;  %v1338_v62 = vmul.f32 1.442695, %v1296_v37 }
 0x1f2   : > { %1502 = vrot.lane.b32.xlu0 %v2849_v58, %s2238_s23  ;;  %v1340_v58 = vmul.f32 1.442695, %v1297_v51  ;;  %2056 = vpow2.f32 %v1338_v62  ;;  %v508_v51 = vmul.f32 0.2, %v476_v24 }
 0x1f3   : > { %v1511_v31 = vpop.permute.xlu0 %1510 }
 0x1f4   : > { %v1495_v6 = vpop.permute.xlu1 %1494  ;;  %1939 = vmatprep.subr.bf16.mxu1 %v1511_v31  ;;  %v477_v31 = vadd.f32 %v2702_v54, %v2780_v57  ;;  %2058 = vpow2.f32 %v1340_v58  ;;  %v539_v57 = vmax.f32 %v475_v20, %v507_v12  ;;  %v1394_v54 = vadd.f32 %v3046_v8, %v3044_v26 }
 0x1f5   : > { %1940 = vmatpush3.bf16.msra.mxu1 %v1495_v6  ;;  %v540_v6 = vmax.f32 %v476_v24, %v508_v51  ;;  %v3744_v58 = vunpack.c.h.bf16 %v2573_v1  ;;  %v3746_v24 = vunpack.c.h.bf16 %v2580_v11 }
 0x1f6   : > { %v509_v4 = vmul.f32 0.2, %v477_v31  ;;  %v3066_v20 = vadd.f32 %v539_v57, %v3745_v34 }
 0x1f7   : > { %v3060_v59 = vadd.f32 %v542_v36, %v3744_v58 }
 0x1f8   : > { %v541_v45 = vmax.f32 %v477_v31, %v509_v4  ;;  %v3070_v4 = vadd.f32 %v540_v6, %v3746_v24 }
 0x1fa   : > { %v3056_v0 = vadd.f32 %v541_v45, %v3743_v38  ;;  %v615_v1 = vmax.f32 %v3066_v20, %v3070_v4 }
 0x1fc   : > { %v3048_v62 = vpop.eup %2056  ;;  %v618_v18 = vmax.f32 %v3056_v0, %v3060_v59 }
 0x1fe   : > { %v3050_v37 = vpop.eup %2058 }
 0x1ff   : > { %v1397_v31 = vadd.f32 %v3050_v37, %v3048_v62 }
 0x211   : > { %1398 = vadd.xlane.f32.xlu0 %v1397_v31 }
 0x212   : > { %1395 = vadd.xlane.f32.xlu1 %v1394_v54 }
 0x215   : > { %616 = vmax.xlane.f32.xlu0 %v615_v1  ;;  %v3749_v1 = vld [vmem:[#allocation7_spill] sm:$0xff] }
 0x216   : > { %619 = vmax.xlane.f32.xlu1 %v618_v18  ;;  %v3748_v18 = vld [vmem:[#allocation6_spill] sm:$0xff] }
 0x224   : > { %v1387_v51 = vpop.xlane.xlu0 %1386 }
 0x225   : > { %v1384_v12 = vpop.xlane.xlu1 %1383 }
 0x226   : > { %2060 = vrcp.f32 %v1384_v12 }
 0x227   : > { %1504 = vrot.lane.b32.xlu1 %v2912_v27, %s2238_s23  ;;  %2062 = vrcp.f32 %v1387_v51  ;;  %v3751_v51 = vld [vmem:[#allocation8_spill] sm:$0xff] }
 0x228   : > { %v3080_v11 = vpop.xlane.xlu0 %604 }
 0x229   : > { %v3078_v45 = vpop.xlane.xlu1 %607 }
 0x22b   : > { %1522 = vrot.lane.b32.xlu1 %v2917_v5, %s2238_s23  ;;  %1520 = vrot.lane.b32.xlu0 %v2907_v61, %s2238_s23 }
 0x22c   : > { %v1513_v57 = vpop.permute.xlu0 %1512 }
 0x22d   : > { %v1497_v36 = vpop.permute.xlu1 %1496  ;;  %1941 = vmatprep.subr.bf16.mxu1 %v1513_v57 }
 0x22e   : > { %1942 = vmatpush3.bf16.msra.mxu1 %v1497_v36 }
 0x22f   : > { %1506 = vrot.lane.b32.xlu0 %v2927_v25, %s2238_s23  ;;  %v3750_v25 = vld [vmem:[#allocation30_spill] sm:$0xff] }
 0x230   : > { %v2061_v6 = vpop.eup %2060  ;;  %v1499_v5 = vpop.permute.xlu0 %1498  ;;  %v1300_v36 = vsub.f32 %v3751_v51, %v3750_v25 }
 0x231   : > { %v1515_v54 = vpop.permute.xlu1 %1514  ;;  %v1447_v38 = vmul.f32 %v2061_v6, %v2870_v13  ;;  %v3088_v27 = vmul.f32 %v2061_v6, %v2868_v56  ;;  %v2063_v58 = vpop.eup %2062  ;;  %v3747_v13 = vld [vmem:[#allocation28_spill] sm:$0xff] }
 0x232   : > { %1943 = vmatprep.subr.bf16.mxu1 %v1515_v54  ;;  %v1449_v31 = vmul.f32 %v2063_v58, %v2874_v19  ;;  %v3094_v61 = vmul.f32 %v2063_v58, %v2872_v2  ;;  %v1298_v56 = vsub.f32 %v3748_v18, %v3747_v13  ;;  %v1299_v12 = vsub.f32 %v3749_v1, %v3747_v13  ;;  %v3752_v19 = vld [vmem:[#allocation9_spill] sm:$0xff] }
 0x233   : > { %1944 = vmatpush3.bf16.msra.mxu1 %v1499_v5  ;;  %v1301_v57 = vsub.f32 %v3752_v19, %v3750_v25  ;;  %v1346_v54 = vmul.f32 1.442695, %v1300_v36  ;;  %v513_v58 = vmul.f32 0.2, %v2805_v46  ;;  %v514_v5 = vmul.f32 0.2, %v2808_v39 }
 0x234   : > { %v1479_v34 = vpack.c.bf16 %v1449_v31, %v1447_v38  ;;  %v1342_v2 = vmul.f32 1.442695, %v1298_v56  ;;  %v1344_v6 = vmul.f32 1.442695, %v1299_v12  ;;  %v511_v31 = vmul.f32 0.2, %v2821_v21 }
 0x235   : > { %v1348_v38 = vmul.f32 1.442695, %v1301_v57  ;;  %v545_v18 = vmax.f32 %v2805_v46, %v513_v58  ;;  %v546_v56 = vmax.f32 %v2808_v39, %v514_v5  ;;  %v3757_v57 = vld [vmem:[#allocation16_spill] sm:$0xff] }
 0x236   : > { %1574 = vmatprep.mubr.bf16.mxu1 %v1479_v34  ;;  %2064 = vpow2.f32 %v1342_v2  ;;  %v512_v34 = vmul.f32 0.2, %v2824_v29  ;;  %v543_v25 = vmax.f32 %v2821_v21, %v511_v31  ;;  %v3758_v2 = vunpack.c.l.bf16 %v3757_v57  ;;  %v3760_v21 = vld [vmem:[#allocation19_spill] sm:$0xff] }
 0x237   : > { %2066 = vpow2.f32 %v1344_v6  ;;  %v3759_v46 = vunpack.c.h.bf16 %v3757_v57  ;;  %v3762_v58 = vunpack.c.h.bf16 %v3760_v21 }
 0x238   : > { %2068 = vpow2.f32 %v1346_v54  ;;  %v544_v51 = vmax.f32 %v2824_v29, %v512_v34  ;;  %v3126_v6 = vadd.f32 %v545_v18, %v3758_v2 }
 0x239   : > { %2070 = vpow2.f32 %v1348_v38  ;;  %v3130_v39 = vadd.f32 %v546_v56, %v3759_v46  ;;  %v3761_v38 = vunpack.c.l.bf16 %v3760_v21 }
 0x23a   : > { %v3140_v5 = vadd.f32 %v544_v51, %v3762_v58  ;;  %v3765_v58 = vld [vmem:[#allocation10_spill] sm:$0xff] }
 0x23b   : > { %v3136_v29 = vadd.f32 %v543_v25, %v3761_v38  ;;  %v624_v31 = vmax.f32 %v3126_v6, %v3130_v39  ;;  %v3764_v38 = vld [vmem:[#allocation29_spill] sm:$0xff] }
 0x23d   : > { %v621_v34 = vmax.f32 %v3136_v29, %v3140_v5 }
 0x240   : > { %v3110_v13 = vpop.eup %2064 }
 0x241   : > { %3753 = vst [vmem:[#allocation4_spill] sm:$0xff] %v3110_v13  ;;  %v3114_v1 = vpop.eup %2066 }
 0x242   : > { %3754 = vst [vmem:[#allocation5_spill] sm:$0xff] %v3114_v1  ;;  %v3116_v12 = vpop.eup %2068  ;;  %v1400_v19 = vadd.f32 %v3114_v1, %v3110_v13 }
 0x243   : > { %3755 = vst [vmem:[#allocation28_spill] sm:$0xff] %v3116_v12  ;;  %v3120_v36 = vpop.eup %2070 }
 0x244   : > { %3756 = vst [vmem:[#allocation6_spill] sm:$0xff] %v3120_v36  ;;  %v1403_v54 = vadd.f32 %v3120_v36, %v3116_v12 }
 0x24e   : > { %1404 = vadd.xlane.f32.xlu0 %v1403_v54 }
 0x24f   : > { %1401 = vadd.xlane.f32.xlu1 %v1400_v19 }
 0x252   : > { %622 = vmax.xlane.f32.xlu0 %v621_v34  ;;  %v3766_v34 = vld [vmem:[#allocation11_spill] sm:$0xff] }
 0x253   : > { %625 = vmax.xlane.f32.xlu1 %v624_v31  ;;  %v1302_v31 = vsub.f32 %v3765_v58, %v3764_v38 }
 0x255   : > { %v1350_v58 = vmul.f32 1.442695, %v1302_v31 }
 0x261   : > { %v1393_v56 = vpop.xlane.xlu0 %1392 }
 0x262   : > { %v1390_v18 = vpop.xlane.xlu1 %1389 }
 0x263   : > { %2072 = vrcp.f32 %v1390_v18  ;;  %v1303_v18 = vsub.f32 %v3766_v34, %v3764_v38  ;;  %v3774_v38 = vld [vmem:[#allocation20_spill] sm:$0xff] }
 0x264   : > { %1508 = vrot.lane.b32.xlu1 %v3016_v63, %s2238_s23  ;;  %2074 = vrcp.f32 %v1393_v56  ;;  %v1312_v31 = vsub.f32 %v3774_v38, %v2982_v47 }
 0x265   : > { %v3150_v51 = vpop.xlane.xlu0 %610  ;;  %v1352_v12 = vmul.f32 1.442695, %v1303_v18  ;;  %2076 = vpow2.f32 %v1350_v58 }
 0x266   : > { %v3148_v25 = vpop.xlane.xlu1 %613  ;;  %v1370_v58 = vmul.f32 1.442695, %v1312_v31 }
 0x267   : > { %2078 = vpow2.f32 %v1352_v12 }
 0x268   : > { %1524 = vrot.lane.b32.xlu0 %v3011_v32, %s2238_s23 }
 0x269   : > { %v1517_v57 = vpop.permute.xlu0 %1516 }
 0x26a   : > { %v1501_v19 = vpop.permute.xlu1 %1500  ;;  %1945 = vmatprep.subr.bf16.mxu1 %v1517_v57  ;;  %v3768_v57 = vld [vmem:[#allocation12_spill] sm:$0xff] }
 0x26b   : > { %1946 = vmatpush3.bf16.msra.mxu1 %v1501_v19 }
 0x26d   : > { %v2073_v2 = vpop.eup %2072  ;;  %v1503_v32 = vpop.permute.xlu0 %1502 }
 0x26e   : > { %v1519_v46 = vpop.permute.xlu1 %1518  ;;  %v3155_v54 = vmul.f32 %v2073_v2, %v2950_v53  ;;  %v3158_v21 = vmul.f32 %v2073_v2, %v2948_v33  ;;  %v2075_v63 = vpop.eup %2074  ;;  %v3767_v53 = vld [vmem:[#allocation31_spill] sm:$0xff]  ;;  %v3769_v33 = vld [vmem:[#allocation13_spill] sm:$0xff] }
 0x26f   : > { %1947 = vmatprep.subr.bf16.mxu1 %v1519_v46  ;;  %v3165_v56 = vmul.f32 %v2075_v63, %v2954_v60  ;;  %v3168_v19 = vmul.f32 %v2075_v63, %v2952_v16  ;;  %v1304_v24 = vsub.f32 %v3768_v57, %v3767_v53  ;;  %v1305_v2 = vsub.f32 %v3769_v33, %v3767_v53  ;;  %v3770_v60 = vld [vmem:[#allocation14_spill] sm:$0xff]  ;;  %v3771_v16 = vld [vmem:[#allocation17_spill] sm:$0xff] }
 0x270   : > { %3763 = vst [vmem:[#allocation7_spill] sm:$0xff] %v3158_v21  ;;  %1948 = vmatpush3.bf16.msra.mxu1 %v1503_v32  ;;  %v1306_v34 = vsub.f32 %v3770_v60, %v2956_v41  ;;  %v1308_v63 = vsub.f32 %v3771_v16, %v2958_v23  ;;  %v3772_v57 = vld [vmem:[#allocation18_spill] sm:$0xff]  ;;  %v3773_v32 = vld [vmem:[#allocation15_spill] sm:$0xff]  ;;  %v3775_v60 = vld [vmem:[#allocation21_spill] sm:$0xff] }
 0x271   : > { %v1354_v13 = vmul.f32 1.442695, %v1304_v24  ;;  %v1309_v36 = vsub.f32 %v3772_v57, %v2958_v23  ;;  %v1356_v53 = vmul.f32 1.442695, %v1305_v2  ;;  %v1307_v33 = vsub.f32 %v3773_v32, %v2956_v41  ;;  %v3776_v24 = vld [vmem:[#allocation22_spill] sm:$0xff]  ;;  %v3777_v2 = vld [vmem:[#allocation23_spill] sm:$0xff] }
 0x272   : > { %v1358_v46 = vmul.f32 1.442695, %v1306_v34  ;;  %v1313_v18 = vsub.f32 %v3775_v60, %v2982_v47  ;;  %v1362_v1 = vmul.f32 1.442695, %v1308_v63  ;;  %v1310_v21 = vsub.f32 %v3776_v24, %v2984_v44  ;;  %v3778_v34 = vld [vmem:[#allocation24_spill] sm:$0xff]  ;;  %v3779_v47 = vld [vmem:[#allocation25_spill] sm:$0xff] }
 0x273   : > { %2080 = vpow2.f32 %v1354_v13  ;;  %v1364_v16 = vmul.f32 1.442695, %v1309_v36  ;;  %v1360_v23 = vmul.f32 1.442695, %v1307_v33  ;;  %v1311_v41 = vsub.f32 %v3777_v2, %v2984_v44  ;;  %v3780_v36 = vld [vmem:[#allocation26_spill] sm:$0xff]  ;;  %v3781_v32 = vld [vmem:[#allocation27_spill] sm:$0xff] }
 0x274   : > { %2082 = vpow2.f32 %v1356_v53  ;;  %v1316_v38 = vsub.f32 %v3778_v34, %v2988_v43  ;;  %v1372_v12 = vmul.f32 1.442695, %v1313_v18  ;;  %v1317_v63 = vsub.f32 %v3779_v47, %v2988_v43  ;;  %v3782_v33 = vld [vmem:[#allocation32_spill] sm:$0xff]  ;;  %v3783_v60 = vld [vmem:[#allocation33_spill] sm:$0xff]  ;;  %v3206_v18 = vpop.eup %2076 }
 0x275   : > { %2084 = vpow2.f32 %v1358_v46  ;;  %v1366_v13 = vmul.f32 1.442695, %v1310_v21  ;;  %v1314_v57 = vsub.f32 %v3780_v36, %v2990_v42  ;;  %v1368_v53 = vmul.f32 1.442695, %v1311_v41  ;;  %v3210_v24 = vpop.eup %2078 }
 0x276   : > { %2086 = vpow2.f32 %v1362_v1  ;;  %v1315_v44 = vsub.f32 %v3781_v32, %v2990_v42  ;;  %v1378_v46 = vmul.f32 1.442695, %v1316_v38  ;;  %v629_v31 = vsub.f32 %v3782_v33, %v2992_v15 }
 0x277   : > { %2088 = vpow2.f32 %v1364_v16  ;;  %v1380_v1 = vmul.f32 1.442695, %v1317_v63  ;;  %v630_v43 = vsub.f32 %v3783_v60, %v2992_v15  ;;  %v1374_v21 = vmul.f32 1.442695, %v1314_v57 }
 0x278   : > { %2090 = vpow2.f32 %v1360_v23  ;;  %v627_v16 = vsub.f32 %v2735_v35, %v2994_v40  ;;  %v1376_v42 = vmul.f32 1.442695, %v1315_v44  ;;  %v628_v23 = vsub.f32 %v2739_v14, %v2994_v40 }
 0x279   : > { %2092 = vpow2.f32 %v1370_v58  ;;  %v663_v41 = vmul.f32 1.442695, %v629_v31  ;;  %v633_v15 = vsub.f32 %v2754_v3, %v2996_v17  ;;  %v665_v34 = vmul.f32 1.442695, %v630_v43  ;;  %v3784_v3 = vld [vmem:[#allocation34_spill] sm:$0xff] }
 0x27a   : > { %2094 = vpow2.f32 %v1372_v12  ;;  %v634_v35 = vsub.f32 %v2758_v9, %v2996_v17  ;;  %v659_v12 = vmul.f32 1.442695, %v627_v16  ;;  %v631_v14 = vsub.f32 %v2731_v52, %v2998_v49 }
 0x27b   : > { %2096 = vpow2.f32 %v1366_v13  ;;  %v661_v47 = vmul.f32 1.442695, %v628_v23  ;;  %v632_v63 = vsub.f32 %v3784_v3, %v2998_v49  ;;  %v1406_v13 = vadd.f32 %v3210_v24, %v3206_v18  ;;  %v3786_v23 = vld [vmem:[#allocation44_spill] sm:$0xff]  ;;  %v3789_v3 = vld [vmem:[#allocation38_spill] sm:$0xff] }
 0x27c   : > { %2098 = vpow2.f32 %v1368_v53  ;;  %v671_v9 = vmul.f32 1.442695, %v633_v15  ;;  %v635_v17 = vsub.f32 %v2770_v30, %v3004_v48  ;;  %v673_v52 = vmul.f32 1.442695, %v634_v35  ;;  %v3788_v35 = vld [vmem:[#allocation37_spill] sm:$0xff] }
 0x27d   : > { %v3214_v2 = vpop.eup %2080  ;;  %2100 = vpow2.f32 %v1378_v46  ;;  %v637_v53 = vsub.f32 %v2778_v7, %v3002_v50  ;;  %v667_v44 = vmul.f32 1.442695, %v631_v14  ;;  %v638_v46 = vsub.f32 %v2786_v22, %v3002_v50  ;;  %v3785_v50 = vld [vmem:[#allocation35_spill] sm:$0xff] }
 0x27e   : > { %v3218_v58 = vpop.eup %2082  ;;  %2102 = vpow2.f32 %v1380_v1  ;;  %v669_v30 = vmul.f32 1.442695, %v632_v63  ;;  %v636_v31 = vsub.f32 %v2774_v28, %v3004_v48  ;;  %v675_v60 = vmul.f32 1.442695, %v635_v17  ;;  %v3790_v17 = vld [vmem:[#allocation39_spill] sm:$0xff] }
 0x27f   : > { %v3222_v38 = vpop.eup %2084  ;;  %2104 = vpow2.f32 %v1374_v21  ;;  %v1409_v49 = vadd.f32 %v3218_v58, %v3214_v2  ;;  %v641_v43 = vsub.f32 %v2794_v55, %v3018_v10  ;;  %v679_v22 = vmul.f32 1.442695, %v637_v53 }
 0x280   : > { %v3226_v40 = vpop.eup %2086  ;;  %2106 = vpow2.f32 %v1376_v42  ;;  %v642_v16 = vsub.f32 %v3785_v50, %v3018_v10  ;;  %v681_v42 = vmul.f32 1.442695, %v638_v46  ;;  %v677_v55 = vmul.f32 1.442695, %v636_v31  ;;  %v3791_v31 = vld [vmem:[#allocation40_spill] sm:$0xff] }
 0x281   : > { %v3232_v36 = vpop.eup %2088  ;;  %2108 = vpow2.f32 %v663_v41  ;;  %v3787_v41 = vld [vmem:[#allocation36_spill] sm:$0xff]  ;;  %v645_v63 = vsub.f32 %v3789_v3, %v3078_v45 }
 0x282   : > { %v3236_v57 = vpop.eup %2090  ;;  %2110 = vpow2.f32 %v665_v34  ;;  %v1415_v7 = vadd.f32 %v3232_v36, %v3226_v40  ;;  %v639_v15 = vsub.f32 %v3787_v41, %v3786_v23 }
 0x283   : > { %v3242_v32 = vpop.eup %2092  ;;  %2112 = vpow2.f32 %v659_v12  ;;  %v1412_v28 = vadd.f32 %v3236_v57, %v3222_v38  ;;  %v640_v12 = vsub.f32 %v3788_v35, %v3786_v23 }
 0x284   : > { %v3246_v33 = vpop.eup %2094  ;;  %2114 = vpow2.f32 %v661_v47  ;;  %v687_v47 = vmul.f32 1.442695, %v641_v43  ;;  %v695_v43 = vmul.f32 1.442695, %v645_v63 }
 0x285   : > { %v3252_v1 = vpop.eup %2096  ;;  %2116 = vpow2.f32 %v671_v9  ;;  %v1421_v10 = vadd.f32 %v3246_v33, %v3242_v32  ;;  %v689_v9 = vmul.f32 1.442695, %v642_v16 }
 0x286   : > { %v3256_v21 = vpop.eup %2098  ;;  %2118 = vpow2.f32 %v673_v52  ;;  %v646_v52 = vsub.f32 %v3790_v17, %v3078_v45  ;;  %v3796_v17 = vld [vmem:[#allocation43_spill] sm:$0xff] }
 0x287   : > { %1410 = vadd.xlane.f32.xlu0 %v1409_v49  ;;  %v3262_v48 = vpop.eup %2100  ;;  %2120 = vpow2.f32 %v667_v44  ;;  %v1418_v53 = vadd.f32 %v3256_v21, %v3252_v1  ;;  %v683_v44 = vmul.f32 1.442695, %v639_v15 }
 0x288   : > { %1407 = vadd.xlane.f32.xlu1 %v1406_v13  ;;  %v3266_v34 = vpop.eup %2102  ;;  %2122 = vpow2.f32 %v669_v30  ;;  %v685_v30 = vmul.f32 1.442695, %v640_v12 }
 0x289   : > { %v3272_v14 = vpop.eup %2104  ;;  %2124 = vpow2.f32 %v675_v60  ;;  %v1427_v60 = vadd.f32 %v3266_v34, %v3262_v48 }
 0x28a   : > { %v3276_v13 = vpop.eup %2106  ;;  %2126 = vpow2.f32 %v679_v22  ;;  %v3792_v22 = vld [vmem:[#allocation41_spill] sm:$0xff] }
 0x28b   : > { %1413 = vadd.xlane.f32.xlu0 %v1412_v28  ;;  %v3282_v49 = vpop.eup %2108  ;;  %2128 = vpow2.f32 %v681_v42  ;;  %v644_v50 = vsub.f32 %v3792_v22, %v3080_v11  ;;  %v697_v28 = vmul.f32 1.442695, %v646_v52  ;;  %v3793_v42 = vld [vmem:[#allocation2_spill] sm:$0xff]  ;;  %v1424_v41 = vadd.f32 %v3276_v13, %v3272_v14 }
 0x28c   : > { %1416 = vadd.xlane.f32.xlu1 %v1415_v7  ;;  %v3284_v46 = vpop.eup %2110  ;;  %2130 = vpow2.f32 %v677_v55  ;;  %v643_v7 = vsub.f32 %v3791_v31, %v3080_v11  ;;  %v649_v23 = vsub.f32 %v3793_v42, %v3148_v25  ;;  %v3794_v55 = vld [vmem:[#allocation3_spill] sm:$0xff]  ;;  %v648_v52 = vsub.f32 %v3796_v17, %v3150_v51 }
 0x28d   : > { %v3290_v45 = vpop.eup %2112  ;;  %2132 = vpow2.f32 %v687_v47  ;;  %v650_v35 = vsub.f32 %v3794_v55, %v3148_v25  ;;  %v726_v3 = vadd.f32 %v3284_v46, %v3282_v49 }
 0x28e   : > { %v3294_v16 = vpop.eup %2114  ;;  %2134 = vpow2.f32 %v689_v9  ;;  %v691_v11 = vmul.f32 1.442695, %v643_v7  ;;  %v693_v9 = vmul.f32 1.442695, %v644_v50  ;;  %v703_v25 = vmul.f32 1.442695, %v649_v23 }
 0x28f   : > { %1419 = vadd.xlane.f32.xlu0 %v1418_v53  ;;  %v3300_v15 = vpop.eup %2116  ;;  %2136 = vpow2.f32 %v683_v44  ;;  %v723_v44 = vadd.f32 %v3294_v16, %v3290_v45  ;;  %v705_v31 = vmul.f32 1.442695, %v650_v35  ;;  %v701_v22 = vmul.f32 1.442695, %v648_v52 }
 0x290   : > { %1422 = vadd.xlane.f32.xlu1 %v1421_v10  ;;  %v3304_v12 = vpop.eup %2118  ;;  %2138 = vpow2.f32 %v685_v30  ;;  %v3795_v10 = vld [vmem:[#allocation42_spill] sm:$0xff] }
 0x291   : > { %v647_v47 = vsub.f32 %v3795_v10, %v3150_v51  ;;  %v3310_v63 = vpop.eup %2120  ;;  %2140 = vpow2.f32 %v695_v43  ;;  %v732_v43 = vadd.f32 %v3304_v12, %v3300_v15 }
 0x292   : > { %v3314_v53 = vpop.eup %2122  ;;  %2142 = vpow2.f32 %v697_v28 }
 0x293   : > { %1425 = vadd.xlane.f32.xlu0 %v1424_v41  ;;  %v3318_v30 = vpop.eup %2124  ;;  %2144 = vpow2.f32 %v691_v11  ;;  %v729_v28 = vadd.f32 %v3314_v53, %v3310_v63 }
 0x294   : > { %1428 = vadd.xlane.f32.xlu1 %v1427_v60  ;;  %v3320_v7 = vpop.eup %2126  ;;  %v699_v60 = vmul.f32 1.442695, %v647_v47  ;;  %2146 = vpow2.f32 %v693_v9 }
 0x295   : > { %v3324_v51 = vpop.eup %2128  ;;  %2148 = vpow2.f32 %v703_v25 }
 0x296   : > { %v3326_v50 = vpop.eup %2130  ;;  %2150 = vpow2.f32 %v705_v31  ;;  %v738_v41 = vadd.f32 %v3324_v51, %v3320_v7 }
 0x297   : > { %724 = vadd.xlane.f32.xlu0 %v723_v44  ;;  %v3330_v42 = vpop.eup %2132  ;;  %2152 = vpow2.f32 %v699_v60  ;;  %v735_v10 = vadd.f32 %v3326_v50, %v3318_v30 }
 0x298   : > { %727 = vadd.xlane.f32.xlu1 %v726_v3  ;;  %3797 = vst [vmem:[#allocation30_spill] sm:$0xff] %v3330_v42  ;;  %v3332_v23 = vpop.eup %2134  ;;  %2154 = vpow2.f32 %v701_v22 }
 0x299   : > { %v3336_v55 = vpop.eup %2136  ;;  %v744_v17 = vadd.f32 %v3332_v23, %v3330_v42 }
 0x29a   : > { %3798 = vst [vmem:[#allocation8_spill] sm:$0xff] %v3336_v55  ;;  %v3338_v11 = vpop.eup %2138 }
 0x29b   : > { %730 = vadd.xlane.f32.xlu0 %v729_v28  ;;  %v3342_v47 = vpop.eup %2140  ;;  %v741_v60 = vadd.f32 %v3338_v11, %v3336_v55 }
 0x29c   : > { %733 = vadd.xlane.f32.xlu1 %v732_v43  ;;  %3799 = vst [vmem:[#allocation9_spill] sm:$0xff] %v3342_v47  ;;  %v3344_v9 = vpop.eup %2142 }
 0x29d   : > { %3800 = vst [vmem:[#allocation16_spill] sm:$0xff] %v3344_v9  ;;  %v3348_v25 = vpop.eup %2144  ;;  %v750_v28 = vadd.f32 %v3344_v9, %v3342_v47 }
 0x29e   : > { %v1399_v3 = vpop.xlane.xlu0 %1398  ;;  %v3354_v43 = vpop.eup %2146 }
 0x29f   : > { %v1396_v35 = vpop.xlane.xlu1 %1395  ;;  %736 = vadd.xlane.f32.xlu0 %v735_v10  ;;  %v747_v47 = vadd.f32 %v3354_v43, %v3348_v25 }
 0x2a0   : > { %2156 = vrcp.f32 %v1396_v35  ;;  %739 = vadd.xlane.f32.xlu1 %v738_v41  ;;  %v3358_v41 = vpop.eup %2148 }
 0x2a1   : > { %2158 = vrcp.f32 %v1399_v3 }
 0x2a2   : > { %v617_v22 = vpop.xlane.xlu0 %616 }
 0x2a3   : > { %v620_v52 = vpop.xlane.xlu1 %619  ;;  %v651_v3 = vsub.f32 %v3066_v20, %v617_v22  ;;  %742 = vadd.xlane.f32.xlu0 %v741_v60 }
 0x2a4   : > { %v653_v44 = vsub.f32 %v3056_v0, %v620_v52  ;;  %v654_v31 = vsub.f32 %v3060_v59, %v620_v52  ;;  %745 = vadd.xlane.f32.xlu1 %v744_v17  ;;  %v652_v0 = vsub.f32 %v3070_v4, %v617_v22  ;;  %v3362_v59 = vpop.eup %2150 }
 0x2a5   : > { %v3364_v52 = vpop.eup %2152  ;;  %v707_v42 = vmul.f32 1.442695, %v651_v3  ;;  %v756_v4 = vadd.f32 %v3362_v59, %v3358_v41 }
 0x2a6   : > { %v711_v35 = vmul.f32 1.442695, %v653_v44  ;;  %v713_v10 = vmul.f32 1.442695, %v654_v31  ;;  %v709_v55 = vmul.f32 1.442695, %v652_v0  ;;  %v3368_v9 = vpop.eup %2154  ;;  %v1521_v44 = vpop.permute.xlu0 %1520 }
 0x2a7   : > { %v1505_v17 = vpop.permute.xlu1 %1504  ;;  %748 = vadd.xlane.f32.xlu0 %v747_v47  ;;  %1949 = vmatprep.subr.bf16.mxu1 %v1521_v44 }
 0x2a8   : > { %2160 = vpow2.f32 %v711_v35  ;;  %751 = vadd.xlane.f32.xlu1 %v750_v28  ;;  %1950 = vmatpush3.bf16.msra.mxu1 %v1505_v17  ;;  %v753_v35 = vadd.f32 %v3368_v9, %v3364_v52 }
 0x2a9   : > { %2162 = vpow2.f32 %v713_v10 }
 0x2aa   : > { %v2157_v20 = vpop.eup %2156  ;;  %2164 = vpow2.f32 %v707_v42  ;;  %v1507_v10 = vpop.permute.xlu0 %1506 }
 0x2ab   : > { %2166 = vpow2.f32 %v709_v55  ;;  %v1523_v31 = vpop.permute.xlu1 %1522  ;;  %v1455_v60 = vmul.f32 %v2157_v20, %v3046_v8  ;;  %v1454_v22 = vmul.f32 %v2157_v20, %v3044_v26  ;;  %v2159_v28 = vpop.eup %2158  ;;  %754 = vadd.xlane.f32.xlu0 %v753_v35 }
 0x2ac   : > { %757 = vadd.xlane.f32.xlu1 %v756_v4  ;;  %1951 = vmatprep.subr.bf16.mxu1 %v1523_v31  ;;  %v1457_v42 = vmul.f32 %v2159_v28, %v3050_v37  ;;  %v1456_v47 = vmul.f32 %v2159_v28, %v3048_v62 }
 0x2ad   : > { %1952 = vmatpush3.bf16.msra.mxu1 %v1507_v10 }
 0x2ae   : > { %v1483_v55 = vpack.c.bf16 %v1457_v42, %v1455_v60  ;;  %v1482_v3 = vpack.c.bf16 %v1456_v47, %v1454_v22 }
 0x2b2   : > { %v3378_v0 = vpop.eup %2160 }
 0x2b3   : > { %3801 = vst [vmem:[#allocation19_spill] sm:$0xff] %v3378_v0  ;;  %v3380_v8 = vpop.eup %2162 }
 0x2b4   : > { %v3382_v26 = vpop.eup %2164  ;;  %v762_v17 = vadd.f32 %v3380_v8, %v3378_v0 }
 0x2b5   : > { %v3386_v44 = vpop.eup %2166 }
 0x2b6   : > { %763 = vadd.xlane.f32.xlu1 %v762_v17  ;;  %v759_v37 = vadd.f32 %v3386_v44, %v3382_v26 }
 0x2b8   : > { %760 = vadd.xlane.f32.xlu0 %v759_v37 }
 0x2db   : > { %v1405_v20 = vpop.xlane.xlu0 %1404 }
 0x2dc   : > { %v1402_v62 = vpop.xlane.xlu1 %1401 }
 0x2dd   : > { %2168 = vrcp.f32 %v1402_v62 }
 0x2df   : > { %v623_v22 = vpop.xlane.xlu0 %622 }
 0x2e0   : > { %v626_v4 = vpop.xlane.xlu1 %625  ;;  %v655_v10 = vsub.f32 %v3136_v29, %v623_v22  ;;  %v656_v42 = vsub.f32 %v3140_v5, %v623_v22  ;;  %v3807_v22 = vld [vmem:[#allocation6_spill] sm:$0xff] }
 0x2e1   : > { %v657_v31 = vsub.f32 %v3126_v6, %v626_v4  ;;  %v658_v60 = vsub.f32 %v3130_v39, %v626_v4  ;;  %v3802_v6 = vpack.c.bf16 %v3094_v61, %v3088_v27  ;;  %v3803_v39 = vpack.c.bf16 %v3165_v56, %v3155_v54  ;;  %v3804_v27 = vld [vmem:[#allocation7_spill] sm:$0xff]  ;;  %v3806_v56 = vld [vmem:[#allocation5_spill] sm:$0xff] }
 0x2e2   : > { %v715_v47 = vmul.f32 1.442695, %v655_v10  ;;  %v717_v17 = vmul.f32 1.442695, %v656_v42  ;;  %v3805_v61 = vpack.c.bf16 %v3168_v19, %v3804_v27  ;;  %v3808_v10 = vld [vmem:[#allocation4_spill] sm:$0xff] }
 0x2e3   : > { %v719_v28 = vmul.f32 1.442695, %v657_v31  ;;  %v721_v35 = vmul.f32 1.442695, %v658_v60  ;;  %v1525_v37 = vpop.permute.xlu0 %1524 }
 0x2e4   : > { %v1509_v0 = vpop.permute.xlu1 %1508  ;;  %1953 = vmatprep.subr.bf16.mxu1 %v1525_v37 }
 0x2e5   : > { %2170 = vpow2.f32 %v719_v28  ;;  %1954 = vmatpush3.bf16.msra.mxu1 %v1509_v0 }
 0x2e6   : > { %2172 = vpow2.f32 %v721_v35 }
 0x2e7   : > { %2174 = vpow2.f32 %v715_v47  ;;  %v2169_v29 = vpop.eup %2168  ;;  %v3809_v47 = vld [vmem:[#allocation28_spill] sm:$0xff] }
 0x2e8   : > { %2176 = vpow2.f32 %v717_v17  ;;  %1575 = vmatmul.mubr.bf16.vlgmr.msra.gmra.mrb[0].mxu1 %v3802_v6  ;;  %v1459_v60 = vmul.f32 %v2169_v29, %v3806_v56  ;;  %v1458_v42 = vmul.f32 %v2169_v29, %v3808_v10 }
 0x2e9   : > { %2178 = vrcp.f32 %v1405_v20  ;;  %1582 = vmatprep.mubr.bf16.mxu1 %v3803_v39 }
 0x2ef   : > { %v3400_v5 = vpop.eup %2170 }
 0x2f0   : > { %v3402_v62 = vpop.eup %2172  ;;  %1583 = vmatmul.mubr.bf16.gmra.mrb[4].mxu1 %v3805_v61 }
 0x2f1   : > { %v3404_v4 = vpop.eup %2174  ;;  %v768_v31 = vadd.f32 %v3402_v62, %v3400_v5  ;;  %1590 = vmatprep.mubr.bf16.mxu1 %v1483_v55 }
 0x2f2   : > { %v3408_v0 = vpop.eup %2176 }
 0x2f3   : > { %v2179_v20 = vpop.eup %2178  ;;  %769 = vadd.xlane.f32.xlu1 %v768_v31  ;;  %v765_v54 = vadd.f32 %v3408_v0, %v3404_v4 }
 0x2f4   : > { %v1461_v28 = vmul.f32 %v2179_v20, %v3807_v22  ;;  %v1460_v17 = vmul.f32 %v2179_v20, %v3809_v47 }
 0x2f5   : > { %766 = vadd.xlane.f32.xlu0 %v765_v54 }
 0x2f6   : > { %v1485_v35 = vpack.c.bf16 %v1461_v28, %v1459_v60  ;;  %v1484_v37 = vpack.c.bf16 %v1460_v17, %v1458_v42 }
 0x2f8   : > { %1591 = vmatmul.mubr.bf16.gmra.mrb[8].mxu1 %v1482_v3 }
 0x2f9   : > { %1598 = vmatprep.mubr.bf16.mxu1 %v1485_v35 }
 0x300   : > { %1599 = vmatmul.mubr.bf16.gmra.mrb[12].mxu1 %v1484_v37 }
 0x314   : > { %v1411_v6 = vpop.xlane.xlu0 %1410 }
 0x315   : > { %v1408_v19 = vpop.xlane.xlu1 %1407 }
 0x316   : > { %2180 = vrcp.f32 %v1408_v19 }
 0x317   : > { %2182 = vrcp.f32 %v1411_v6 }
 0x318   : > { %v1414_v55 = vpop.xlane.xlu0 %1413 }
 0x319   : > { %v1417_v39 = vpop.xlane.xlu1 %1416 }
 0x31a   : > { %2184 = vrcp.f32 %v1417_v39 }
 0x31b   : > { %2186 = vrcp.f32 %v1414_v55 }
 0x31c   : > { %v1420_v27 = vpop.xlane.xlu0 %1419 }
 0x31d   : > { %v1423_v31 = vpop.xlane.xlu1 %1422 }
 0x31e   : > { %2188 = vrcp.f32 %v1423_v31 }
 0x31f   : > { %2190 = vrcp.f32 %v1420_v27 }
 0x320   : > { %v2181_v61 = vpop.eup %2180  ;;  %v1426_v56 = vpop.xlane.xlu0 %1425 }
 0x321   : > { %v1429_v3 = vpop.xlane.xlu1 %1428  ;;  %v1463_v29 = vmul.f32 %v2181_v61, %v3210_v24  ;;  %v1462_v20 = vmul.f32 %v2181_v61, %v3206_v18  ;;  %v2183_v54 = vpop.eup %2182 }
 0x322   : > { %v1465_v60 = vmul.f32 %v2183_v54, %v3218_v58  ;;  %v1464_v22 = vmul.f32 %v2183_v54, %v3214_v2  ;;  %2192 = vrcp.f32 %v1429_v3 }
 0x323   : > { %2194 = vrcp.f32 %v1426_v56 }
 0x324   : > { %v2185_v28 = vpop.eup %2184  ;;  %v1487_v10 = vpack.c.bf16 %v1465_v60, %v1463_v29  ;;  %v1486_v42 = vpack.c.bf16 %v1464_v22, %v1462_v20  ;;  %v725_v24 = vpop.xlane.xlu0 %724 }
 0x325   : > { %v728_v35 = vpop.xlane.xlu1 %727  ;;  %v1469_v47 = vmul.f32 %v2185_v28, %v3232_v36  ;;  %v2187_v17 = vpop.eup %2186  ;;  %v1468_v39 = vmul.f32 %v2185_v28, %v3226_v40 }
 0x326   : > { %2196 = vrcp.f32 %v728_v35  ;;  %1606 = vmatprep.mubr.bf16.mxu1 %v1487_v10  ;;  %v1467_v18 = vmul.f32 %v2187_v17, %v3236_v57  ;;  %v1466_v6 = vmul.f32 %v2187_v17, %v3222_v38 }
 0x327   : > { %2198 = vrcp.f32 %v725_v24  ;;  %1607 = vmatmul.mubr.bf16.gmra.mrb[16].mxu1 %v1486_v42 }
 0x328   : > { %v2189_v37 = vpop.eup %2188  ;;  %v1489_v19 = vpack.c.bf16 %v1469_v47, %v1467_v18  ;;  %v731_v55 = vpop.xlane.xlu0 %730  ;;  %v1488_v61 = vpack.c.bf16 %v1468_v39, %v1466_v6 }
 0x329   : > { %v734_v58 = vpop.xlane.xlu1 %733  ;;  %v2191_v2 = vpop.eup %2190  ;;  %v1473_v31 = vmul.f32 %v2189_v37, %v3246_v33  ;;  %v1472_v60 = vmul.f32 %v2189_v37, %v3242_v32 }
 0x32a   : > { %2200 = vrcp.f32 %v734_v58  ;;  %1614 = vmatprep.mubr.bf16.mxu1 %v1489_v19  ;;  %v1471_v36 = vmul.f32 %v2191_v2, %v3256_v21  ;;  %v1470_v33 = vmul.f32 %v2191_v2, %v3252_v1 }
 0x32b   : > { %2202 = vrcp.f32 %v731_v55 }
 0x32c   : > { %v2193_v57 = vpop.eup %2192  ;;  %v737_v29 = vpop.xlane.xlu0 %736  ;;  %v1491_v20 = vpack.c.bf16 %v1473_v31, %v1471_v36  ;;  %v1490_v1 = vpack.c.bf16 %v1472_v60, %v1470_v33 }
 0x32d   : > { %v740_v27 = vpop.xlane.xlu1 %739  ;;  %v2195_v3 = vpop.eup %2194  ;;  %v1477_v42 = vmul.f32 %v2193_v57, %v3266_v34  ;;  %v1476_v19 = vmul.f32 %v2193_v57, %v3262_v48 }
 0x32e   : > { %2204 = vrcp.f32 %v740_v27  ;;  %v1475_v10 = vmul.f32 %v2195_v3, %v3276_v13 }
 0x32f   : > { %2206 = vrcp.f32 %v737_v29  ;;  %1615 = vmatmul.mubr.bf16.gmra.mrb[20].mxu1 %v1488_v61 }
 0x330   : > { %v2197_v54 = vpop.eup %2196  ;;  %1622 = vmatprep.mubr.bf16.mxu1 %v1491_v20  ;;  %v743_v22 = vpop.xlane.xlu0 %742  ;;  %v1493_v32 = vpack.c.bf16 %v1477_v42, %v1475_v10 }
 0x331   : > { %v790_v38 = vmul.f32 %v2197_v54, %v3284_v46  ;;  %v789_v40 = vmul.f32 %v2197_v54, %v3282_v49  ;;  %v2199_v56 = vpop.eup %2198  ;;  %v746_v21 = vpop.xlane.xlu1 %745  ;;  %v3810_v54 = vld [vmem:[#allocation8_spill] sm:$0xff] }
 0x332   : > { %v788_v28 = vmul.f32 %v2199_v56, %v3294_v16  ;;  %v787_v35 = vmul.f32 %v2199_v56, %v3290_v45  ;;  %2208 = vrcp.f32 %v746_v21  ;;  %v3812_v21 = vld [vmem:[#allocation16_spill] sm:$0xff] }
 0x333   : > { %2210 = vrcp.f32 %v743_v22 }
 0x334   : > { %v2201_v47 = vpop.eup %2200  ;;  %v820_v46 = vpack.c.bf16 %v790_v38, %v788_v28  ;;  %v819_v17 = vpack.c.bf16 %v789_v40, %v787_v35  ;;  %v749_v2 = vpop.xlane.xlu0 %748  ;;  %v3811_v40 = vld [vmem:[#allocation30_spill] sm:$0xff]  ;;  %v3813_v35 = vld [vmem:[#allocation9_spill] sm:$0xff] }
 0x335   : > { %v794_v49 = vmul.f32 %v2201_v47, %v3304_v12  ;;  %v2203_v24 = vpop.eup %2202  ;;  %v752_v34 = vpop.xlane.xlu1 %751  ;;  %v793_v58 = vmul.f32 %v2201_v47, %v3300_v15  ;;  %v1474_v12 = vmul.f32 %v2195_v3, %v3272_v14 }
 0x336   : > { %963 = vmatprep.mubr.bf16.mxu0 %v820_v46  ;;  %v792_v18 = vmul.f32 %v2203_v24, %v3314_v53  ;;  %v791_v37 = vmul.f32 %v2203_v24, %v3310_v63  ;;  %2212 = vrcp.f32 %v752_v34 }
 0x337   : > { %964 = vmatmul.mubr.bf16.vlgmr.msra.gmra.mrb[0].mxu0 %v819_v17  ;;  %1623 = vmatmul.mubr.bf16.gmra.mrb[24].mxu1 %v1490_v1  ;;  %2214 = vrcp.f32 %v749_v2  ;;  %v1492_v55 = vpack.c.bf16 %v1476_v19, %v1474_v12 }
 0x338   : > { %v2205_v16 = vpop.eup %2204  ;;  %1630 = vmatprep.mubr.bf16.mxu1 %v1493_v32  ;;  %v822_v13 = vpack.c.bf16 %v794_v49, %v792_v18  ;;  %v821_v39 = vpack.c.bf16 %v793_v58, %v791_v37  ;;  %v755_v63 = vpop.xlane.xlu0 %754 }
 0x339   : > { %v2207_v45 = vpop.eup %2206  ;;  %v798_v53 = vmul.f32 %v2205_v16, %v3324_v51  ;;  %v758_v15 = vpop.xlane.xlu1 %757  ;;  %v797_v48 = vmul.f32 %v2205_v16, %v3320_v7 }
 0x33a   : > { %971 = vmatprep.mubr.bf16.mxu0 %v822_v13  ;;  %v796_v6 = vmul.f32 %v2207_v45, %v3326_v50  ;;  %v795_v14 = vmul.f32 %v2207_v45, %v3318_v30  ;;  %2216 = vrcp.f32 %v758_v15 }
 0x33b   : > { %2218 = vrcp.f32 %v755_v63 }
 0x33c   : > { %v2209_v36 = vpop.eup %2208  ;;  %v824_v31 = vpack.c.bf16 %v798_v53, %v796_v6  ;;  %v823_v57 = vpack.c.bf16 %v797_v48, %v795_v14 }
 0x33d   : > { %v2211_v27 = vpop.eup %2210  ;;  %v802_v51 = vmul.f32 %v2209_v36, %v3332_v23  ;;  %v801_v30 = vmul.f32 %v2209_v36, %v3811_v40 }
 0x33e   : > { %v800_v50 = vmul.f32 %v2211_v27, %v3338_v11  ;;  %v799_v38 = vmul.f32 %v2211_v27, %v3810_v54 }
 0x33f   : > { %972 = vmatmul.mubr.bf16.gmra.mrb[4].mxu0 %v821_v39  ;;  %1631 = vmatmul.mubr.bf16.gmra.mrb[28].mxu1 %v1492_v55 }
 0x340   : > { %979 = vmatprep.mubr.bf16.mxu0 %v824_v31  ;;  %v2213_v61 = vpop.eup %2212  ;;  %v826_v3 = vpack.c.bf16 %v802_v51, %v800_v50  ;;  %v825_v23 = vpack.c.bf16 %v801_v30, %v799_v38 }
 0x341   : > { %v2215_v29 = vpop.eup %2214  ;;  %v806_v11 = vmul.f32 %v2213_v61, %v3812_v21  ;;  %v805_v10 = vmul.f32 %v2213_v61, %v3813_v35 }
 0x342   : > { %v804_v7 = vmul.f32 %v2215_v29, %v3354_v43  ;;  %v803_v28 = vmul.f32 %v2215_v29, %v3348_v25 }
 0x343   : > { %v764_v20 = vpop.xlane.xlu1 %763 }
 0x344   : > { %2220 = vrcp.f32 %v764_v20  ;;  %v2217_v33 = vpop.eup %2216  ;;  %v828_v60 = vpack.c.bf16 %v806_v11, %v804_v7  ;;  %v827_v46 = vpack.c.bf16 %v805_v10, %v803_v28 }
 0x345   : > { %v761_v56 = vpop.xlane.xlu0 %760  ;;  %v2219_v22 = vpop.eup %2218  ;;  %v810_v47 = vmul.f32 %v2217_v33, %v3362_v59  ;;  %v809_v1 = vmul.f32 %v2217_v33, %v3358_v41  ;;  %v3814_v59 = vld [vmem:[#allocation19_spill] sm:$0xff] }
 0x346   : > { %2222 = vrcp.f32 %v761_v56  ;;  %v808_v42 = vmul.f32 %v2219_v22, %v3368_v9  ;;  %v807_v24 = vmul.f32 %v2219_v22, %v3364_v52 }
 0x347   : > { %980 = vmatmul.mubr.bf16.gmra.mrb[8].mxu0 %v823_v57 }
 0x348   : > { %987 = vmatprep.mubr.bf16.mxu0 %v826_v3  ;;  %v830_v17 = vpack.c.bf16 %v810_v47, %v808_v42  ;;  %v829_v18 = vpack.c.bf16 %v809_v1, %v807_v24 }
 0x34e   : > { %v2221_v43 = vpop.eup %2220 }
 0x34f   : > { %988 = vmatmul.mubr.bf16.gmra.mrb[12].mxu0 %v825_v23  ;;  %v814_v25 = vmul.f32 %v2221_v43, %v3380_v8  ;;  %v813_v13 = vmul.f32 %v2221_v43, %v3814_v59 }
 0x350   : > { %995 = vmatprep.mubr.bf16.mxu0 %v828_v60  ;;  %v2223_v49 = vpop.eup %2222 }
 0x351   : > { %v812_v32 = vmul.f32 %v2223_v49, %v3386_v44  ;;  %v811_v9 = vmul.f32 %v2223_v49, %v3382_v26 }
 0x353   : > { %v832_v16 = vpack.c.bf16 %v814_v25, %v812_v32  ;;  %v831_v45 = vpack.c.bf16 %v813_v13, %v811_v9 }
 0x357   : > { %996 = vmatmul.mubr.bf16.gmra.mrb[16].mxu0 %v827_v46 }
 0x358   : > { %1003 = vmatprep.mubr.bf16.mxu0 %v830_v17 }
 0x35f   : > { %1004 = vmatmul.mubr.bf16.gmra.mrb[20].mxu0 %v829_v18 }
 0x360   : > { %1011 = vmatprep.mubr.bf16.mxu0 %v832_v16 }
 0x367   : > { %1012 = vmatmul.mubr.bf16.gmra.mrb[24].mxu0 %v831_v45 }
 0x380   : > { %v770_v34 = vpop.xlane.xlu1 %769 }
 0x381   : > { %2224 = vrcp.f32 %v770_v34 }
 0x382   : > { %v767_v37 = vpop.xlane.xlu0 %766 }
 0x383   : > { %2226 = vrcp.f32 %v767_v37 }
 0x38b   : > { %v2225_v52 = vpop.eup %2224 }
 0x38c   : > { %v818_v41 = vmul.f32 %v2225_v52, %v3402_v62  ;;  %v817_v44 = vmul.f32 %v2225_v52, %v3400_v5 }
 0x38d   : > { %v2227_v8 = vpop.eup %2226 }
 0x38e   : > { %v816_v58 = vmul.f32 %v2227_v8, %v3408_v0  ;;  %v815_v12 = vmul.f32 %v2227_v8, %v3404_v4 }
 0x390   : > { %v834_v19 = vpack.c.bf16 %v818_v41, %v816_v58  ;;  %v833_v26 = vpack.c.bf16 %v817_v44, %v815_v12 }
 0x392   : > { %1019 = vmatprep.mubr.bf16.mxu0 %v834_v19 }
 0x393   : > { %1020 = vmatmul.mubr.bf16.gmra.mrb[28].mxu0 %v833_v26 }
 0x3bb   : > { %v1955_v2 = vpop.f32.mrb[0].mxu1 }
 0x3bc   : > { %v1956_v6 = vpop.f32.mrb[1].mxu1 }
 0x3bd   : > { %v1957_v53 = vadd.f32 %v1956_v6, %v1955_v2  ;;  %v1958_v39 = vpop.f32.mrb[2].mxu1 }
 0x3be   : > { %v1959_v55 = vpop.f32.mrb[3].mxu1 }
 0x3bf   : > { %v1960_v36 = vadd.f32 %v1959_v55, %v1958_v39  ;;  %1655 = vrot.lane.b32.xlu0 %v1957_v53, %s2239_s15 }
 0x3c1   : > { %1657 = vrot.lane.b32.xlu1 %v1960_v36, %s2239_s15 }
 0x3c3   : > { %v1961_v5 = vpop.f32.mrb[4].mxu1 }
 0x3c4   : > { %v1962_v62 = vpop.f32.mrb[5].mxu1 }
 0x3c5   : > { %v1963_v0 = vadd.f32 %v1962_v62, %v1961_v5  ;;  %v1964_v31 = vpop.f32.mrb[6].mxu1 }
 0x3c6   : > { %v1965_v4 = vpop.f32.mrb[7].mxu1 }
 0x3c7   : > { %v1966_v27 = vadd.f32 %v1965_v4, %v1964_v31  ;;  %1659 = vrot.lane.b32.xlu1 %v1963_v0, %s2239_s15 }
 0x3c9   : > { %1661 = vrot.lane.b32.xlu0 %v1966_v27, %s2239_s15 }
 0x3cb   : > { %v1967_v15 = vpop.f32.mrb[8].mxu1 }
 0x3cc   : > { %v1968_v14 = vpop.f32.mrb[9].mxu1 }
 0x3cd   : > { %v1969_v48 = vadd.f32 %v1968_v14, %v1967_v15  ;;  %v1970_v63 = vpop.f32.mrb[10].mxu1 }
 0x3ce   : > { %v1971_v50 = vpop.f32.mrb[11].mxu1 }
 0x3cf   : > { %v1972_v51 = vadd.f32 %v1971_v50, %v1970_v63  ;;  %1663 = vrot.lane.b32.xlu1 %v1969_v48, %s2239_s15  ;;  %v3490_v63 = vld [vmem:[%s3577_s4] ss:$0 sm:$0xff] }
 0x3d1   : > { %1665 = vrot.lane.b32.xlu0 %v1972_v51, %s2239_s15 }
 0x3d3   : > { %v1973_v57 = vpop.f32.mrb[12].mxu1 }
 0x3d4   : > { %v1974_v61 = vpop.f32.mrb[13].mxu1 }
 0x3d5   : > { %v1975_v3 = vadd.f32 %v1974_v61, %v1973_v57  ;;  %v1976_v29 = vpop.f32.mrb[14].mxu1 }
 0x3d6   : > { %v1977_v20 = vpop.f32.mrb[15].mxu1 }
 0x3d7   : > { %v1978_v54 = vadd.f32 %v1977_v20, %v1976_v29  ;;  %1667 = vrot.lane.b32.xlu1 %v1975_v3, %s2239_s15 }
 0x3d9   : > { %1669 = vrot.lane.b32.xlu0 %v1978_v54, %s2239_s15 }
 0x3fa   : > { %v1979_v38 = vpop.f32.mrb[16].mxu1 }
 0x3fb   : > { %v1980_v40 = vpop.f32.mrb[17].mxu1 }
 0x3fc   : > { %v1981_v30 = vadd.f32 %v1980_v40, %v1979_v38  ;;  %v1982_v56 = vpop.f32.mrb[18].mxu1 }
 0x3fd   : > { %v1983_v7 = vpop.f32.mrb[19].mxu1 }
 0x3fe   : > { %v1984_v21 = vadd.f32 %v1983_v7, %v1982_v56  ;;  %1671 = vrot.lane.b32.xlu1 %v1981_v30, %s2239_s15 }
 0x400   : > { %1673 = vrot.lane.b32.xlu0 %v1984_v21, %s2239_s15 }
 0x402   : > { %v1985_v11 = vpop.f32.mrb[20].mxu1 }
 0x403   : > { %v1986_v23 = vpop.f32.mrb[21].mxu1 }
 0x404   : > { %v1987_v33 = vadd.f32 %v1986_v23, %v1985_v11  ;;  %v1988_v60 = vpop.f32.mrb[22].mxu1 }
 0x405   : > { %v1989_v22 = vpop.f32.mrb[23].mxu1 }
 0x406   : > { %v1990_v28 = vadd.f32 %v1989_v22, %v1988_v60  ;;  %1675 = vrot.lane.b32.xlu1 %v1987_v33, %s2239_s15 }
 0x408   : > { %1677 = vrot.lane.b32.xlu0 %v1990_v28, %s2239_s15 }
 0x40a   : > { %v1891_v35 = vpop.f32.mrb[0].mxu0  ;;  %v1991_v10 = vpop.f32.mrb[24].mxu1 }
 0x40b   : > { %v1892_v42 = vpop.f32.mrb[1].mxu0  ;;  %v1992_v47 = vpop.f32.mrb[25].mxu1 }
 0x40c   : > { %v1893_v46 = vadd.f32 %v1892_v42, %v1891_v35  ;;  %v1993_v43 = vadd.f32 %v1992_v47, %v1991_v10  ;;  %v1894_v17 = vpop.f32.mrb[2].mxu0  ;;  %v1994_v49 = vpop.f32.mrb[26].mxu1 }
 0x40d   : > { %v1895_v24 = vpop.f32.mrb[3].mxu0  ;;  %v1995_v1 = vpop.f32.mrb[27].mxu1 }
 0x40e   : > { %v1896_v32 = vadd.f32 %v1895_v24, %v1894_v17  ;;  %v1996_v25 = vadd.f32 %v1995_v1, %v1994_v49  ;;  %1679 = vrot.lane.b32.xlu1 %v1993_v43, %s2239_s15 }
 0x410   : > { %1681 = vrot.lane.b32.xlu0 %v1996_v25, %s2239_s15 }
 0x412   : > { %v1897_v18 = vpop.f32.mrb[4].mxu0  ;;  %v1997_v16 = vpop.f32.mrb[28].mxu1 }
 0x413   : > { %v1898_v9 = vpop.f32.mrb[5].mxu0  ;;  %v1998_v59 = vpop.f32.mrb[29].mxu1 }
 0x414   : > { %v1899_v13 = vadd.f32 %v1898_v9, %v1897_v18  ;;  %v1999_v45 = vadd.f32 %v1998_v59, %v1997_v16  ;;  %v1900_v34 = vpop.f32.mrb[6].mxu0  ;;  %v2000_v37 = vpop.f32.mrb[30].mxu1 }
 0x415   : > { %v1901_v52 = vpop.f32.mrb[7].mxu0  ;;  %v2001_v41 = vpop.f32.mrb[31].mxu1 }
 0x416   : > { %v1902_v44 = vadd.f32 %v1901_v52, %v1900_v34  ;;  %v2002_v8 = vadd.f32 %v2001_v41, %v2000_v37  ;;  %1683 = vrot.lane.b32.xlu1 %v1999_v45, %s2239_s15 }
 0x418   : > { %1685 = vrot.lane.b32.xlu0 %v2002_v8, %s2239_s15 }
 0x41a   : > { %v1903_v58 = vpop.f32.mrb[8].mxu0 }
 0x41b   : > { %v1904_v12 = vpop.f32.mrb[9].mxu0 }
 0x41c   : > { %v1905_v19 = vadd.f32 %v1904_v12, %v1903_v58  ;;  %v1906_v26 = vpop.f32.mrb[10].mxu0 }
 0x41d   : > { %v1907_v2 = vpop.f32.mrb[11].mxu0 }
 0x41e   : > { %v1908_v6 = vadd.f32 %v1907_v2, %v1906_v26 }
 0x422   : > { %v1909_v53 = vpop.f32.mrb[12].mxu0 }
 0x423   : > { %v1910_v39 = vpop.f32.mrb[13].mxu0 }
 0x424   : > { %v1911_v55 = vadd.f32 %v1910_v39, %v1909_v53  ;;  %v1912_v36 = vpop.f32.mrb[14].mxu0 }
 0x425   : > { %v1913_v5 = vpop.f32.mrb[15].mxu0 }
 0x426   : > { %v1914_v62 = vadd.f32 %v1913_v5, %v1912_v36 }
 0x42a   : > { %v1915_v0 = vpop.f32.mrb[16].mxu0 }
 0x42b   : > { %v1916_v31 = vpop.f32.mrb[17].mxu0 }
 0x42c   : > { %v3483_v4 = vadd.f32 %v1916_v31, %v1915_v0  ;;  %v1918_v27 = vpop.f32.mrb[18].mxu0 }
 0x42d   : > { %v1919_v15 = vpop.f32.mrb[19].mxu0 }
 0x42e   : > { %v3485_v14 = vadd.f32 %v1919_v15, %v1918_v27 }
 0x431   : > { %v1656_v51 = vpop.permute.xlu0 %1655 }
 0x432   : > { %v1921_v48 = vpop.f32.mrb[20].mxu0  ;;  %v1704_v61 = vsel %vm1703_vm0, %v1893_v46, %v1656_v51 }
 0x433   : > { %v1922_v50 = vpop.f32.mrb[21].mxu0  ;;  %v1726_v29 = vadd.f32 %v3490_v63, %v1704_v61  ;;  %v1658_v20 = vpop.permute.xlu1 %1657 }
 0x434   : > { %v3492_v57 = vadd.f32 %v1922_v50, %v1921_v48  ;;  %v1924_v3 = vpop.f32.mrb[22].mxu0  ;;  %v1705_v38 = vsel %vm1703_vm0, %v1896_v32, %v1658_v20 }
 0x435   : > { %v1925_v54 = vpop.f32.mrb[23].mxu0  ;;  %v1742_v30 = vmax.f32 %v1726_v29, 0.0  ;;  %v1727_v56 = vadd.f32 %v3490_v63, %v1705_v38 }
 0x436   : > { %v3503_v40 = vadd.f32 %v1925_v54, %v1924_v3 }
 0x437   : > { %1759 = vst.msk [vmem:[%s3500_s22] sm:$0xff] %vm1758_vm1, %v1742_v30  ;;  %v1743_v7 = vmax.f32 %v1727_v56, 0.0 }
 0x439   : > { %1760 = vst.msk [vmem:[%s3500_s22 + $0x8] sm:$0xff] %vm1758_vm1, %v1743_v7  ;;  %v1660_v11 = vpop.permute.xlu1 %1659 }
 0x43a   : > { %v1927_v21 = vpop.f32.mrb[24].mxu0  ;;  %v1706_v33 = vsel %vm1703_vm0, %v1899_v13, %v1660_v11 }
 0x43b   : > { %v1928_v23 = vpop.f32.mrb[25].mxu0  ;;  %v1728_v28 = vadd.f32 %v3490_v63, %v1706_v33  ;;  %v1662_v10 = vpop.permute.xlu0 %1661 }
 0x43c   : > { %v1929_v60 = vadd.f32 %v1928_v23, %v1927_v21  ;;  %v1930_v22 = vpop.f32.mrb[26].mxu0  ;;  %v1707_v47 = vsel %vm1703_vm0, %v1902_v44, %v1662_v10 }
 0x43d   : > { %v1931_v35 = vpop.f32.mrb[27].mxu0  ;;  %v1744_v46 = vmax.f32 %v1728_v28, 0.0  ;;  %v1729_v43 = vadd.f32 %v3490_v63, %v1707_v47 }
 0x43e   : > { %v1932_v42 = vadd.f32 %v1931_v35, %v1930_v22 }
 0x43f   : > { %1761 = vst.msk [vmem:[%s3500_s22 + $0x10] sm:$0xff] %vm1758_vm1, %v1744_v46  ;;  %v1745_v17 = vmax.f32 %v1729_v43, 0.0 }
 0x441   : > { %1762 = vst.msk [vmem:[%s3500_s22 + $0x18] sm:$0xff] %vm1758_vm1, %v1745_v17  ;;  %v1664_v49 = vpop.permute.xlu1 %1663 }
 0x442   : > { %v1708_v24 = vsel %vm1703_vm0, %v1905_v19, %v1664_v49 }
 0x443   : > { %v1730_v1 = vadd.f32 %v3490_v63, %v1708_v24  ;;  %v1666_v32 = vpop.permute.xlu0 %1665 }
 0x444   : > { %v1709_v25 = vsel %vm1703_vm0, %v1908_v6, %v1666_v32 }
 0x445   : > { %v1746_v18 = vmax.f32 %v1730_v1, 0.0  ;;  %v1731_v16 = vadd.f32 %v3490_v63, %v1709_v25 }
 0x447   : > { %1763 = vst.msk [vmem:[%s3500_s22 + $0x20] sm:$0xff] %vm1758_vm1, %v1746_v18  ;;  %v1747_v9 = vmax.f32 %v1731_v16, 0.0 }
 0x449   : > { %1764 = vst.msk [vmem:[%s3500_s22 + $0x28] sm:$0xff] %vm1758_vm1, %v1747_v9  ;;  %v1668_v59 = vpop.permute.xlu1 %1667 }
 0x44a   : > { %v1710_v13 = vsel %vm1703_vm0, %v1911_v55, %v1668_v59 }
 0x44b   : > { %v1732_v45 = vadd.f32 %v3490_v63, %v1710_v13  ;;  %v1670_v34 = vpop.permute.xlu0 %1669 }
 0x44c   : > { %v1711_v37 = vsel %vm1703_vm0, %v1914_v62, %v1670_v34 }
 0x44d   : > { %v1748_v52 = vmax.f32 %v1732_v45, 0.0  ;;  %v1733_v41 = vadd.f32 %v3490_v63, %v1711_v37 }
 0x44f   : > { %1765 = vst.msk [vmem:[%s3500_s22 + $0x30] sm:$0xff] %vm1758_vm1, %v1748_v52  ;;  %v1749_v44 = vmax.f32 %v1733_v41, 0.0 }
 0x451   : > { %1766 = vst.msk [vmem:[%s3500_s22 + $0x38] sm:$0xff] %vm1758_vm1, %v1749_v44 }
 0x466   : > { %v1933_v8 = vpop.f32.mrb[28].mxu0 }
 0x467   : > { %v1934_v58 = vpop.f32.mrb[29].mxu0 }
 0x468   : > { %v1935_v12 = vadd.f32 %v1934_v58, %v1933_v8  ;;  %v1936_v19 = vpop.f32.mrb[30].mxu0 }
 0x469   : > { %v1937_v26 = vpop.f32.mrb[31].mxu0 }
 0x46a   : > { %v1938_v2 = vadd.f32 %v1937_v26, %v1936_v19 }
 0x470   : > { %v1672_v6 = vpop.permute.xlu1 %1671 }
 0x471   : > { %v1712_v53 = vsel %vm1703_vm0, %v3483_v4, %v1672_v6 }
 0x472   : > { %v1734_v39 = vadd.f32 %v3490_v63, %v1712_v53  ;;  %v1674_v55 = vpop.permute.xlu0 %1673 }
 0x473   : > { %v1713_v36 = vsel %vm1703_vm0, %v3485_v14, %v1674_v55 }
 0x474   : > { %v1750_v5 = vmax.f32 %v1734_v39, 0.0  ;;  %v1735_v62 = vadd.f32 %v3490_v63, %v1713_v36 }
 0x476   : > { %1767 = vst.msk [vmem:[%s3500_s22 + $0x40] sm:$0xff] %vm1758_vm1, %v1750_v5  ;;  %v1751_v0 = vmax.f32 %v1735_v62, 0.0 }
 0x478   : > { %1768 = vst.msk [vmem:[%s3500_s22 + $0x48] sm:$0xff] %vm1758_vm1, %v1751_v0  ;;  %v1676_v31 = vpop.permute.xlu1 %1675 }
 0x479   : > { %v1714_v4 = vsel %vm1703_vm0, %v3492_v57, %v1676_v31 }
 0x47a   : > { %v1736_v27 = vadd.f32 %v3490_v63, %v1714_v4  ;;  %v1678_v15 = vpop.permute.xlu0 %1677 }
 0x47b   : > { %v1715_v14 = vsel %vm1703_vm0, %v3503_v40, %v1678_v15 }
 0x47c   : > { %v1752_v48 = vmax.f32 %v1736_v27, 0.0  ;;  %v1737_v50 = vadd.f32 %v3490_v63, %v1715_v14 }
 0x47e   : > { %1769 = vst.msk [vmem:[%s3500_s22 + $0x50] sm:$0xff] %vm1758_vm1, %v1752_v48  ;;  %v1753_v51 = vmax.f32 %v1737_v50, 0.0 }
 0x480   : > { %1770 = vst.msk [vmem:[%s3500_s22 + $0x58] sm:$0xff] %vm1758_vm1, %v1753_v51  ;;  %v1680_v61 = vpop.permute.xlu1 %1679 }
 0x481   : > { %v1716_v3 = vsel %vm1703_vm0, %v1929_v60, %v1680_v61 }
 0x482   : > { %v1738_v57 = vadd.f32 %v3490_v63, %v1716_v3  ;;  %v1682_v29 = vpop.permute.xlu0 %1681 }
 0x483   : > { %v1717_v20 = vsel %vm1703_vm0, %v1932_v42, %v1682_v29 }
 0x484   : > { %v1754_v54 = vmax.f32 %v1738_v57, 0.0  ;;  %v1739_v38 = vadd.f32 %v3490_v63, %v1717_v20 }
 0x486   : > { %1771 = vst.msk [vmem:[%s3500_s22 + $0x60] sm:$0xff] %vm1758_vm1, %v1754_v54  ;;  %v1755_v40 = vmax.f32 %v1739_v38, 0.0 }
 0x488   : > { %1772 = vst.msk [vmem:[%s3500_s22 + $0x68] sm:$0xff] %vm1758_vm1, %v1755_v40  ;;  %v1684_v30 = vpop.permute.xlu1 %1683 }
 0x489   : > { %v1718_v56 = vsel %vm1703_vm0, %v1935_v12, %v1684_v30 }
 0x48a   : > { %v1740_v7 = vadd.f32 %v3490_v63, %v1718_v56  ;;  %v1686_v21 = vpop.permute.xlu0 %1685 }
 0x48b   : > { %v1719_v11 = vsel %vm1703_vm0, %v1938_v2, %v1686_v21 }
 0x48c   : > { %v1756_v23 = vmax.f32 %v1740_v7, 0.0  ;;  %v1741_v33 = vadd.f32 %v3490_v63, %v1719_v11 }
 0x48e   : > { %1773 = vst.msk [vmem:[%s3500_s22 + $0x70] sm:$0xff] %vm1758_vm1, %v1756_v23  ;;  %v1757_v60 = vmax.f32 %v1741_v33, 0.0 }
 0x490   : > { %1774 = vst.msk [vmem:[%s3500_s22 + $0x78] sm:$0xff] %vm1758_vm1, %v1757_v60 }
 0x491 PF: > { %s15_s18 = sadd.s32 1, %s2234_s18  }
 0x492   : > { %p12_p4 = scmp.ge.s32.totalorder %s15_s18, 4  }
 0x494   :  { %14 = sbr.rel (!%p12_p4) target bundleno = 1 (0x1), region = 73 }

</bundles_post_ra>
